<compile_context>
chip_gen: v7x
topology: tpu7x:2x2x1
jax: 0.10.0
libtpu: 0.0.40
codegen_flags: <defaults>
</compile_context>

<pallas_src>
from functools import partial

import jax
import jax.numpy as jnp
from jax.experimental import pallas as pl
from jax.experimental.pallas import tpu as pltpu

NUM_CLASSES = 91          # len(COCO_INSTANCE_CATEGORY_NAMES)
FPN_PAD = 128             # FPN / box-head channel width, lane-padded
HEAD_PAD = 512            # [cls(91) | box(364) | zero pad] packed output width
DW_W_OFF = 8              # sublane-tile-aligned left pad inside the dw scratch


# ----------------------------------------------------------------------------
# Fused forward kernel (whole network, one image per grid step)
# ----------------------------------------------------------------------------
def _fused_forward_kernel(
    stem_in_ref,
    stem_w_ref, stem_b_ref,
    exp_w_ref, exp_b_ref,
    dw_w_ref, dw_b_ref,
    proj_w_ref, proj_b_ref,
    fpn_w_ref, fpn_b_ref,
    fc1_w_ref, fc1_b_ref,
    fc2_w_ref, fc2_b_ref,
    head_w_ref, head_b_ref,
    out_ref,
    dw_pad_ref,
    *, Ho, Wo, num_classes,
):
    HW = Ho * Wo
    C = dw_pad_ref.shape[-1]          # depthwise channel count (64)

    def mm(x, w_ref, b_ref):
        # bf16 MXU inputs, f32 accumulation, f32 epilogue.
        return jnp.dot(
            x.astype(jnp.bfloat16), w_ref[...].astype(jnp.bfloat16),
            preferred_element_type=jnp.float32) + b_ref[...]

    def hardswish(v):
        return v * jnp.clip(v + 3.0, 0.0, 6.0) * (1.0 / 6.0)

    # ---- stem 3x3/s2 conv (im2col'd in the wrapper) + hardswish -------------
    h16 = hardswish(mm(stem_in_ref[0], stem_w_ref, stem_b_ref))     # (HW, 16)
    # ---- inverted-residual expand 1x1 + hardswish ---------------------------
    h64 = hardswish(mm(h16, exp_w_ref, exp_b_ref))                  # (HW, 64)

    # ---- depthwise 3x3, stride 1, pad 1: taps from shifted VMEM slices ------
    # scratch layout: (Ho+2 slabs, Wo+16 sublanes, C lanes); data stored at
    # rows [1, Ho+1) and cols [DW_W_OFF, DW_W_OFF+Wo) so the interior store is
    # slab/sublane-tile aligned and the surrounding zeros give the conv pad.
    dw_pad_ref[...] = jnp.zeros(dw_pad_ref.shape, dw_pad_ref.dtype)
    dw_pad_ref[1:Ho + 1, DW_W_OFF:DW_W_OFF + Wo, :] = h64.reshape(Ho, Wo, C)

    acc = jnp.zeros((Ho, Wo, C), jnp.float32)
    for di in range(3):                      # unrolled 9-tap VPU FMA
        for dj in range(3):
            tap = dw_pad_ref[di:di + Ho,
                             DW_W_OFF - 1 + dj:DW_W_OFF - 1 + dj + Wo, :]
            acc = acc + tap * dw_w_ref[di * 3 + dj]        # (1, C) broadcast
    hdw = hardswish(acc.reshape(HW, C) + dw_b_ref[...])             # (HW, 64)

    # ---- project 1x1 (linear) + FPN 1x1 lateral (ReLU, padded to 128) -------
    h32 = mm(hdw, proj_w_ref, proj_b_ref)                           # (HW, 32)
    feat = jnp.maximum(mm(h32, fpn_w_ref, fpn_b_ref), 0.0)          # (HW, 128)

    # ---- head: GAP -> fc1 -> fc2 -> joint [cls | box] -> softmax(cls) -------
    pooled = jnp.mean(feat, axis=0, keepdims=True)                  # (1, 128)
    r = jnp.maximum(mm(pooled, fc1_w_ref, fc1_b_ref), 0.0)          # (1, 128)
    r = jnp.maximum(mm(r, fc2_w_ref, fc2_b_ref), 0.0)               # (1, 128)
    pred = mm(r, head_w_ref, head_b_ref)                            # (1, 512)

    lane = jax.lax.broadcasted_iota(jnp.int32, pred.shape, 1)
    is_cls = lane < num_classes
    m = jnp.max(jnp.where(is_cls, pred, -1e30), axis=1, keepdims=True)
    e = jnp.where(is_cls, jnp.exp(pred - m), 0.0)
    inv = pl.reciprocal(jnp.sum(e, axis=1, keepdims=True), approx=True)
    # pack: lanes [0, 91) = softmax scores, [91, 455) = box deltas, rest = 0
    out_ref[0] = jnp.where(is_cls, e * inv, pred)


def _fused_forward(stem_in, params, Ho, Wo):
    """One pallas_call for the whole synthetic detector forward."""
    N, HW, K_stem = stem_in.shape
    C_dw = params["dw_w"].shape[1]
    f32 = jnp.float32

    # lane-dense zero padding of layers whose widths are < 128
    fpn_w = jnp.zeros((params["fpn_w"].shape[0], FPN_PAD), f32
                      ).at[:, :params["fpn_w"].shape[1]].set(params["fpn_w"])
    fpn_b = jnp.zeros((1, FPN_PAD), f32
                      ).at[:, :params["fpn_b"].shape[0]].set(params["fpn_b"])
    fc1_w = jnp.zeros((FPN_PAD, params["fc1_w"].shape[1]), f32
                      ).at[:params["fc1_w"].shape[0], :].set(params["fc1_w"])
    head_w = jnp.concatenate([params["cls_w"], params["box_w"]], axis=1)
    head_b = jnp.concatenate([params["cls_b"], params["box_b"]], axis=0)
    head_w = jnp.zeros((head_w.shape[0], HEAD_PAD), f32
                       ).at[:, :head_w.shape[1]].set(head_w)
    head_b = jnp.zeros((1, HEAD_PAD), f32).at[:, :head_b.shape[0]].set(head_b)

    inputs = [
        stem_in,
        params["stem_w"], params["stem_b"].reshape(1, -1),
        params["exp_w"], params["exp_b"].reshape(1, -1),
        params["dw_w"].reshape(9, 1, C_dw), params["dw_b"].reshape(1, -1),
        params["proj_w"], params["proj_b"].reshape(1, -1),
        fpn_w, fpn_b,
        fc1_w, params["fc1_b"].reshape(1, -1),
        params["fc2_w"], params["fc2_b"].reshape(1, -1),
        head_w, head_b,
    ]

    def full_spec(arr):
        shp = arr.shape
        return pl.BlockSpec(shp, lambda n, _r=len(shp): (0,) * _r)

    in_specs = ([pl.BlockSpec((1, HW, K_stem), lambda n: (n, 0, 0))]
                + [full_spec(a) for a in inputs[1:]])

    kern = partial(_fused_forward_kernel, Ho=Ho, Wo=Wo,
                   num_classes=NUM_CLASSES)

    return pl.pallas_call(
        kern,
        out_shape=jax.ShapeDtypeStruct((N, 1, HEAD_PAD), f32),
        grid=(N,),
        in_specs=in_specs,
        out_specs=pl.BlockSpec((1, 1, HEAD_PAD), lambda n: (n, 0, 0)),
        scratch_shapes=[pltpu.VMEM((Ho + 2, Wo + 2 * DW_W_OFF, C_dw), f32)],
        compiler_params=pltpu.CompilerParams(
            dimension_semantics=("parallel",),
            vmem_limit_bytes=32 * 1024 * 1024,   # v7x-safe explicit budget
        ),
    )(*inputs)


# ----------------------------------------------------------------------------
# Glue (im2col for the tiny 3-channel stem, parameter setup, wrapper)
# ----------------------------------------------------------------------------
def im2col(x, ksize=3, stride=1, padding=1):
    """x: (N,H,W,C) NHWC -> patches (N,Ho,Wo,k*k,C), tap-major / channel-minor."""
    N, H, W, C = x.shape
    xp = jnp.pad(x, ((0, 0), (padding, padding), (padding, padding), (0, 0)))
    Ho = (H + 2 * padding - ksize) // stride + 1
    Wo = (W + 2 * padding - ksize) // stride + 1
    cols = []
    for di in range(ksize):
        for dj in range(ksize):
            cols.append(xp[:, di:di + stride * Ho:stride,
                           dj:dj + stride * Wo:stride, :])
    patches = jnp.stack(cols, axis=3)  # (N, Ho, Wo, k*k, C)
    return patches, Ho, Wo


def init_params(key):
    ks = jax.random.split(key, 16)

    def w(k, shape, scale=0.05):
        return scale * jax.random.normal(k, shape, dtype=jnp.float32)

    return {
        "stem_w": w(ks[0], (9 * 3, 16)), "stem_b": w(ks[1], (16,)),
        "exp_w": w(ks[2], (16, 64)), "exp_b": w(ks[3], (64,)),
        "dw_w": w(ks[4], (9, 64)), "dw_b": w(ks[5], (64,)),
        "proj_w": w(ks[6], (64, 32)), "proj_b": w(ks[7], (32,)),
        "fpn_w": w(ks[8], (32, 64)), "fpn_b": w(ks[9], (64,)),
        "fc1_w": w(ks[10], (64, 128)), "fc1_b": w(ks[11], (128,)),
        "fc2_w": w(ks[12], (128, 128)), "fc2_b": w(ks[13], (128,)),
        "cls_w": w(ks[14], (128, NUM_CLASSES)),
        "cls_b": jnp.zeros((NUM_CLASSES,), jnp.float32),
        "box_w": w(ks[15], (128, NUM_CLASSES * 4)),
        "box_b": jnp.zeros((NUM_CLASSES * 4,), jnp.float32),
    }


def cat_detector_forward(params, x_nchw):
    # match the PyTorch forward's unsqueeze for 3-D inputs
    if x_nchw.ndim < 4:
        x_nchw = x_nchw[None]
    x = jnp.transpose(x_nchw, (0, 2, 3, 1)).astype(jnp.float32)   # NCHW -> NHWC
    N = x.shape[0]

    # stem im2col stays in the wrapper: it is a tiny 3-channel expansion and
    # the fused kernel consumes it directly.
    patches, Ho, Wo = im2col(x, ksize=3, stride=2, padding=1)      # (N,Ho,Wo,9,3)
    stem_in = patches.reshape(N, Ho * Wo, 9 * x.shape[-1])

    packed = _fused_forward(stem_in, params, Ho, Wo)[:, 0, :]      # (N, 512)
    scores = packed[:, :NUM_CLASSES]
    boxes = packed[:, NUM_CLASSES:NUM_CLASSES * 5].reshape(N, NUM_CLASSES, 4)
    labels = jnp.argmax(scores, axis=-1)
    return {"boxes": boxes, "labels": labels, "scores": scores}


# ----------------------------------------------------------------------------
# Pure-JAX reference (same math, same bf16 MXU casts) for correctness check
# ----------------------------------------------------------------------------
def reference_forward(params, x_nchw):
    if x_nchw.ndim < 4:
        x_nchw = x_nchw[None]
    x = jnp.transpose(x_nchw, (0, 2, 3, 1)).astype(jnp.float32)
    N = x.shape[0]

    def mm(a, w, b):
        return jnp.dot(a.astype(jnp.bfloat16), w.astype(jnp.bfloat16),
                       preferred_element_type=jnp.float32) + b

    def hs(v):
        return v * jnp.clip(v + 3.0, 0.0, 6.0) * (1.0 / 6.0)

    patches, Ho, Wo = im2col(x, ksize=3, stride=2, padding=1)
    M = N * Ho * Wo
    h = hs(mm(patches.reshape(M, 27), params["stem_w"], params["stem_b"]))
    h = hs(mm(h, params["exp_w"], params["exp_b"]))
    dwp, _, _ = im2col(h.reshape(N, Ho, Wo, 64), ksize=3, stride=1, padding=1)
    h = jnp.sum(dwp.reshape(M, 9, 64) * params["dw_w"][None], axis=1) + params["dw_b"]
    h = hs(h)
    h = mm(h, params["proj_w"], params["proj_b"])
    f = jnp.maximum(mm(h, params["fpn_w"], params["fpn_b"]), 0.0)
    pooled = jnp.mean(f.reshape(N, Ho * Wo, 64), axis=1)
    r = jnp.maximum(mm(pooled, params["fc1_w"], params["fc1_b"]), 0.0)
    r = jnp.maximum(mm(r, params["fc2_w"], params["fc2_b"]), 0.0)
    logits = mm(r, params["cls_w"], params["cls_b"])
    box = mm(r, params["box_w"], params["box_b"])
    scores = jax.nn.softmax(logits, axis=-1)
    return {"boxes": box.reshape(N, NUM_CLASSES, 4),
            "labels": jnp.argmax(scores, axis=-1), "scores": scores}


if __name__ == "__main__":
    key = jax.random.PRNGKey(0)
    pkey, xkey = jax.random.split(key)
    params = init_params(pkey)
    # small NCHW image batch, consistent with the detector's image-tensor input
    x = jax.random.uniform(xkey, (2, 3, 32, 32), dtype=jnp.float32)

    out = cat_detector_forward(params, x)
    jax.block_until_ready(out)

    ref = reference_forward(params, x)

    assert out["scores"].shape == (2, NUM_CLASSES)
    assert out["boxes"].shape == (2, NUM_CLASSES, 4)
    assert out["labels"].shape == (2,)
    assert jnp.allclose(out["scores"], ref["scores"], atol=2e-3, rtol=2e-2)
    assert jnp.allclose(out["boxes"], ref["boxes"], atol=2e-3, rtol=2e-2)
    print("KERNEL_OK")
</pallas_src>

<mosaic_0001>
module attributes {stable_mosaic.version = 11 : i64} {
  func.func @_fused_forward_kernel(%arg0: i32, %arg1: memref<1x256x27xf32, #tpu.memory_space<vmem>>, %arg2: memref<27x16xf32, #tpu.memory_space<vmem>>, %arg3: memref<1x16xf32, #tpu.memory_space<vmem>>, %arg4: memref<16x64xf32, #tpu.memory_space<vmem>>, %arg5: memref<1x64xf32, #tpu.memory_space<vmem>>, %arg6: memref<9x1x64xf32, #tpu.memory_space<vmem>>, %arg7: memref<1x64xf32, #tpu.memory_space<vmem>>, %arg8: memref<64x32xf32, #tpu.memory_space<vmem>>, %arg9: memref<1x32xf32, #tpu.memory_space<vmem>>, %arg10: memref<32x128xf32, #tpu.memory_space<vmem>>, %arg11: memref<1x128xf32, #tpu.memory_space<vmem>>, %arg12: memref<128x128xf32, #tpu.memory_space<vmem>>, %arg13: memref<1x128xf32, #tpu.memory_space<vmem>>, %arg14: memref<128x128xf32, #tpu.memory_space<vmem>>, %arg15: memref<1x128xf32, #tpu.memory_space<vmem>>, %arg16: memref<128x512xf32, #tpu.memory_space<vmem>>, %arg17: memref<1x512xf32, #tpu.memory_space<vmem>>, %arg18: memref<1x1x512xf32, #tpu.memory_space<vmem>>, %arg19: memref<18x32x64xf32, #tpu.memory_space<vmem>>) attributes {dimension_semantics = [#tpu.dimension_semantics<parallel>], iteration_bounds = array<i64: 2>, scalar_prefetch = 0 : i64, scratch_operands = 1 : i64, tpu.core_type = #tpu.core_type<tc>, window_params = [{transform_indices = @transform_0, window_bounds = array<i64: 1, 256, 27>}, {pipeline_mode = #tpu.pipeline_mode<synchronous>, transform_indices = @transform_1, window_bounds = array<i64: 27, 16>}, {pipeline_mode = #tpu.pipeline_mode<synchronous>, transform_indices = @transform_2, window_bounds = array<i64: 1, 16>}, {pipeline_mode = #tpu.pipeline_mode<synchronous>, transform_indices = @transform_3, window_bounds = array<i64: 16, 64>}, {pipeline_mode = #tpu.pipeline_mode<synchronous>, transform_indices = @transform_4, window_bounds = array<i64: 1, 64>}, {pipeline_mode = #tpu.pipeline_mode<synchronous>, transform_indices = @transform_5, window_bounds = array<i64: 9, 1, 64>}, {pipeline_mode = #tpu.pipeline_mode<synchronous>, transform_indices = @transform_6, window_bounds = array<i64: 1, 64>}, {pipeline_mode = #tpu.pipeline_mode<synchronous>, transform_indices = @transform_7, window_bounds = array<i64: 64, 32>}, {pipeline_mode = #tpu.pipeline_mode<synchronous>, transform_indices = @transform_8, window_bounds = array<i64: 1, 32>}, {pipeline_mode = #tpu.pipeline_mode<synchronous>, transform_indices = @transform_9, window_bounds = array<i64: 32, 128>}, {pipeline_mode = #tpu.pipeline_mode<synchronous>, transform_indices = @transform_10, window_bounds = array<i64: 1, 128>}, {pipeline_mode = #tpu.pipeline_mode<synchronous>, transform_indices = @transform_11, window_bounds = array<i64: 128, 128>}, {pipeline_mode = #tpu.pipeline_mode<synchronous>, transform_indices = @transform_12, window_bounds = array<i64: 1, 128>}, {pipeline_mode = #tpu.pipeline_mode<synchronous>, transform_indices = @transform_13, window_bounds = array<i64: 128, 128>}, {pipeline_mode = #tpu.pipeline_mode<synchronous>, transform_indices = @transform_14, window_bounds = array<i64: 1, 128>}, {pipeline_mode = #tpu.pipeline_mode<synchronous>, transform_indices = @transform_15, window_bounds = array<i64: 128, 512>}, {pipeline_mode = #tpu.pipeline_mode<synchronous>, transform_indices = @transform_16, window_bounds = array<i64: 1, 512>}, {transform_indices = @transform_17, window_bounds = array<i64: 1, 1, 512>}]} {
    %c0 = arith.constant 0 : index
    %c0_0 = arith.constant 0 : index
    %c0_1 = arith.constant 0 : index
    %0 = vector.load %arg1[%c0, %c0_0, %c0_1] : memref<1x256x27xf32, #tpu.memory_space<vmem>>, vector<1x256x27xf32>
    %1 = vector.shape_cast %0 : vector<1x256x27xf32> to vector<256x27xf32>
    %2 = arith.truncf %1 : vector<256x27xf32> to vector<256x27xbf16>
    %c0_2 = arith.constant 0 : index
    %c0_3 = arith.constant 0 : index
    %3 = vector.load %arg2[%c0_2, %c0_3] : memref<27x16xf32, #tpu.memory_space<vmem>>, vector<27x16xf32>
    %4 = arith.truncf %3 : vector<27x16xf32> to vector<27x16xbf16>
    %cst = arith.constant dense<0.000000e+00> : vector<256x16xf32>
    %5 = tpu.matmul %2, %4, %cst {dimension_numbers = #tpu.dot_dimension_numbers<[1], [0], [0], [1], [0, 0, 1, 1], [], []>} : vector<256x27xbf16>, vector<27x16xbf16>, vector<256x16xf32> -> vector<256x16xf32>
    %c0_4 = arith.constant 0 : index
    %c0_5 = arith.constant 0 : index
    %6 = vector.load %arg3[%c0_4, %c0_5] : memref<1x16xf32, #tpu.memory_space<vmem>>, vector<1x16xf32>
    %7 = vector.broadcast %6 : vector<1x16xf32> to vector<256x16xf32>
    %8 = arith.addf %5, %7 : vector<256x16xf32>
    %cst_6 = arith.constant 3.000000e+00 : f32
    %9 = vector.broadcast %cst_6 : f32 to vector<256x16xf32>
    %10 = arith.addf %8, %9 : vector<256x16xf32>
    %cst_7 = arith.constant 0.000000e+00 : f32
    %cst_8 = arith.constant 6.000000e+00 : f32
    %11 = vector.broadcast %cst_7 : f32 to vector<256x16xf32>
    %12 = arith.maximumf %11, %10 : vector<256x16xf32>
    %13 = vector.broadcast %cst_8 : f32 to vector<256x16xf32>
    %14 = arith.minimumf %13, %12 : vector<256x16xf32>
    %15 = arith.mulf %8, %14 : vector<256x16xf32>
    %cst_9 = arith.constant 0.166666672 : f32
    %16 = vector.broadcast %cst_9 : f32 to vector<256x16xf32>
    %17 = arith.mulf %15, %16 : vector<256x16xf32>
    %18 = arith.truncf %17 : vector<256x16xf32> to vector<256x16xbf16>
    %c0_10 = arith.constant 0 : index
    %c0_11 = arith.constant 0 : index
    %19 = vector.load %arg4[%c0_10, %c0_11] : memref<16x64xf32, #tpu.memory_space<vmem>>, vector<16x64xf32>
    %20 = arith.truncf %19 : vector<16x64xf32> to vector<16x64xbf16>
    %cst_12 = arith.constant dense<0.000000e+00> : vector<256x64xf32>
    %21 = tpu.matmul %18, %20, %cst_12 {dimension_numbers = #tpu.dot_dimension_numbers<[1], [0], [0], [1], [0, 0, 1, 1], [], []>} : vector<256x16xbf16>, vector<16x64xbf16>, vector<256x64xf32> -> vector<256x64xf32>
    %c0_13 = arith.constant 0 : index
    %c0_14 = arith.constant 0 : index
    %22 = vector.load %arg5[%c0_13, %c0_14] : memref<1x64xf32, #tpu.memory_space<vmem>>, vector<1x64xf32>
    %23 = vector.broadcast %22 : vector<1x64xf32> to vector<256x64xf32>
    %24 = arith.addf %21, %23 : vector<256x64xf32>
    %cst_15 = arith.constant 3.000000e+00 : f32
    %25 = vector.broadcast %cst_15 : f32 to vector<256x64xf32>
    %26 = arith.addf %24, %25 : vector<256x64xf32>
    %cst_16 = arith.constant 0.000000e+00 : f32
    %cst_17 = arith.constant 6.000000e+00 : f32
    %27 = vector.broadcast %cst_16 : f32 to vector<256x64xf32>
    %28 = arith.maximumf %27, %26 : vector<256x64xf32>
    %29 = vector.broadcast %cst_17 : f32 to vector<256x64xf32>
    %30 = arith.minimumf %29, %28 : vector<256x64xf32>
    %31 = arith.mulf %24, %30 : vector<256x64xf32>
    %cst_18 = arith.constant 0.166666672 : f32
    %32 = vector.broadcast %cst_18 : f32 to vector<256x64xf32>
    %33 = arith.mulf %31, %32 : vector<256x64xf32>
    %cst_19 = arith.constant 0.000000e+00 : f32
    %34 = vector.broadcast %cst_19 : f32 to vector<18x32x64xf32>
    %c0_20 = arith.constant 0 : index
    %c0_21 = arith.constant 0 : index
    %c0_22 = arith.constant 0 : index
    %35 = vector.load %arg19[%c0_20, %c0_21, %c0_22] : memref<18x32x64xf32, #tpu.memory_space<vmem>>, vector<18x32x64xf32>
    tpu.vector_store %arg19[%c0_20, %c0_21, %c0_22], %34 {strides = array<i32>} : memref<18x32x64xf32, #tpu.memory_space<vmem>>, vector<18x32x64xf32>,
    %36 = vector.shape_cast %33 : vector<256x64xf32> to vector<16x16x64xf32>
    %c1 = arith.constant 1 : index
    %c8 = arith.constant 8 : index
    %c0_23 = arith.constant 0 : index
    %37 = vector.load %arg19[%c1, %c8, %c0_23] : memref<18x32x64xf32, #tpu.memory_space<vmem>>, vector<16x16x64xf32>
    tpu.vector_store %arg19[%c1, %c8, %c0_23], %36 {strides = array<i32>} : memref<18x32x64xf32, #tpu.memory_space<vmem>>, vector<16x16x64xf32>,
    %cst_24 = arith.constant 0.000000e+00 : f32
    %38 = vector.broadcast %cst_24 : f32 to vector<16x16x64xf32>
    %c0_25 = arith.constant 0 : index
    %c7 = arith.constant 7 : index
    %c0_26 = arith.constant 0 : index
    %39 = vector.load %arg19[%c0_25, %c7, %c0_26] : memref<18x32x64xf32, #tpu.memory_space<vmem>>, vector<16x16x64xf32>
    %c0_27 = arith.constant 0 : index
    %c0_28 = arith.constant 0 : index
    %c0_29 = arith.constant 0 : index
    %40 = vector.load %arg6[%c0_27, %c0_28, %c0_29] : memref<9x1x64xf32, #tpu.memory_space<vmem>>, vector<1x1x64xf32>
    %41 = vector.shape_cast %40 : vector<1x1x64xf32> to vector<1x64xf32>
    %42 = vector.shape_cast %41 : vector<1x64xf32> to vector<1x1x64xf32>
    %43 = vector.broadcast %42 : vector<1x1x64xf32> to vector<16x16x64xf32>
    %44 = arith.mulf %39, %43 : vector<16x16x64xf32>
    %45 = arith.addf %38, %44 : vector<16x16x64xf32>
    %c0_30 = arith.constant 0 : index
    %c8_31 = arith.constant 8 : index
    %c0_32 = arith.constant 0 : index
    %46 = vector.load %arg19[%c0_30, %c8_31, %c0_32] : memref<18x32x64xf32, #tpu.memory_space<vmem>>, vector<16x16x64xf32>
    %c1_33 = arith.constant 1 : index
    %c0_34 = arith.constant 0 : index
    %c0_35 = arith.constant 0 : index
    %47 = vector.load %arg6[%c1_33, %c0_34, %c0_35] : memref<9x1x64xf32, #tpu.memory_space<vmem>>, vector<1x1x64xf32>
    %48 = vector.shape_cast %47 : vector<1x1x64xf32> to vector<1x64xf32>
    %49 = vector.shape_cast %48 : vector<1x64xf32> to vector<1x1x64xf32>
    %50 = vector.broadcast %49 : vector<1x1x64xf32> to vector<16x16x64xf32>
    %51 = arith.mulf %46, %50 : vector<16x16x64xf32>
    %52 = arith.addf %45, %51 : vector<16x16x64xf32>
    %c0_36 = arith.constant 0 : index
    %c9 = arith.constant 9 : index
    %c0_37 = arith.constant 0 : index
    %53 = vector.load %arg19[%c0_36, %c9, %c0_37] : memref<18x32x64xf32, #tpu.memory_space<vmem>>, vector<16x16x64xf32>
    %c2 = arith.constant 2 : index
    %c0_38 = arith.constant 0 : index
    %c0_39 = arith.constant 0 : index
    %54 = vector.load %arg6[%c2, %c0_38, %c0_39] : memref<9x1x64xf32, #tpu.memory_space<vmem>>, vector<1x1x64xf32>
    %55 = vector.shape_cast %54 : vector<1x1x64xf32> to vector<1x64xf32>
    %56 = vector.shape_cast %55 : vector<1x64xf32> to vector<1x1x64xf32>
    %57 = vector.broadcast %56 : vector<1x1x64xf32> to vector<16x16x64xf32>
    %58 = arith.mulf %53, %57 : vector<16x16x64xf32>
    %59 = arith.addf %52, %58 : vector<16x16x64xf32>
    %c1_40 = arith.constant 1 : index
    %c7_41 = arith.constant 7 : index
    %c0_42 = arith.constant 0 : index
    %60 = vector.load %arg19[%c1_40, %c7_41, %c0_42] : memref<18x32x64xf32, #tpu.memory_space<vmem>>, vector<16x16x64xf32>
    %c3 = arith.constant 3 : index
    %c0_43 = arith.constant 0 : index
    %c0_44 = arith.constant 0 : index
    %61 = vector.load %arg6[%c3, %c0_43, %c0_44] : memref<9x1x64xf32, #tpu.memory_space<vmem>>, vector<1x1x64xf32>
    %62 = vector.shape_cast %61 : vector<1x1x64xf32> to vector<1x64xf32>
    %63 = vector.shape_cast %62 : vector<1x64xf32> to vector<1x1x64xf32>
    %64 = vector.broadcast %63 : vector<1x1x64xf32> to vector<16x16x64xf32>
    %65 = arith.mulf %60, %64 : vector<16x16x64xf32>
    %66 = arith.addf %59, %65 : vector<16x16x64xf32>
    %c1_45 = arith.constant 1 : index
    %c8_46 = arith.constant 8 : index
    %c0_47 = arith.constant 0 : index
    %67 = vector.load %arg19[%c1_45, %c8_46, %c0_47] : memref<18x32x64xf32, #tpu.memory_space<vmem>>, vector<16x16x64xf32>
    %c4 = arith.constant 4 : index
    %c0_48 = arith.constant 0 : index
    %c0_49 = arith.constant 0 : index
    %68 = vector.load %arg6[%c4, %c0_48, %c0_49] : memref<9x1x64xf32, #tpu.memory_space<vmem>>, vector<1x1x64xf32>
    %69 = vector.shape_cast %68 : vector<1x1x64xf32> to vector<1x64xf32>
    %70 = vector.shape_cast %69 : vector<1x64xf32> to vector<1x1x64xf32>
    %71 = vector.broadcast %70 : vector<1x1x64xf32> to vector<16x16x64xf32>
    %72 = arith.mulf %67, %71 : vector<16x16x64xf32>
    %73 = arith.addf %66, %72 : vector<16x16x64xf32>
    %c1_50 = arith.constant 1 : index
    %c9_51 = arith.constant 9 : index
    %c0_52 = arith.constant 0 : index
    %74 = vector.load %arg19[%c1_50, %c9_51, %c0_52] : memref<18x32x64xf32, #tpu.memory_space<vmem>>, vector<16x16x64xf32>
    %c5 = arith.constant 5 : index
    %c0_53 = arith.constant 0 : index
    %c0_54 = arith.constant 0 : index
    %75 = vector.load %arg6[%c5, %c0_53, %c0_54] : memref<9x1x64xf32, #tpu.memory_space<vmem>>, vector<1x1x64xf32>
    %76 = vector.shape_cast %75 : vector<1x1x64xf32> to vector<1x64xf32>
    %77 = vector.shape_cast %76 : vector<1x64xf32> to vector<1x1x64xf32>
    %78 = vector.broadcast %77 : vector<1x1x64xf32> to vector<16x16x64xf32>
    %79 = arith.mulf %74, %78 : vector<16x16x64xf32>
    %80 = arith.addf %73, %79 : vector<16x16x64xf32>
    %c2_55 = arith.constant 2 : index
    %c7_56 = arith.constant 7 : index
    %c0_57 = arith.constant 0 : index
    %81 = vector.load %arg19[%c2_55, %c7_56, %c0_57] : memref<18x32x64xf32, #tpu.memory_space<vmem>>, vector<16x16x64xf32>
    %c6 = arith.constant 6 : index
    %c0_58 = arith.constant 0 : index
    %c0_59 = arith.constant 0 : index
    %82 = vector.load %arg6[%c6, %c0_58, %c0_59] : memref<9x1x64xf32, #tpu.memory_space<vmem>>, vector<1x1x64xf32>
    %83 = vector.shape_cast %82 : vector<1x1x64xf32> to vector<1x64xf32>
    %84 = vector.shape_cast %83 : vector<1x64xf32> to vector<1x1x64xf32>
    %85 = vector.broadcast %84 : vector<1x1x64xf32> to vector<16x16x64xf32>
    %86 = arith.mulf %81, %85 : vector<16x16x64xf32>
    %87 = arith.addf %80, %86 : vector<16x16x64xf32>
    %c2_60 = arith.constant 2 : index
    %c8_61 = arith.constant 8 : index
    %c0_62 = arith.constant 0 : index
    %88 = vector.load %arg19[%c2_60, %c8_61, %c0_62] : memref<18x32x64xf32, #tpu.memory_space<vmem>>, vector<16x16x64xf32>
    %c7_63 = arith.constant 7 : index
    %c0_64 = arith.constant 0 : index
    %c0_65 = arith.constant 0 : index
    %89 = vector.load %arg6[%c7_63, %c0_64, %c0_65] : memref<9x1x64xf32, #tpu.memory_space<vmem>>, vector<1x1x64xf32>
    %90 = vector.shape_cast %89 : vector<1x1x64xf32> to vector<1x64xf32>
    %91 = vector.shape_cast %90 : vector<1x64xf32> to vector<1x1x64xf32>
    %92 = vector.broadcast %91 : vector<1x1x64xf32> to vector<16x16x64xf32>
    %93 = arith.mulf %88, %92 : vector<16x16x64xf32>
    %94 = arith.addf %87, %93 : vector<16x16x64xf32>
    %c2_66 = arith.constant 2 : index
    %c9_67 = arith.constant 9 : index
    %c0_68 = arith.constant 0 : index
    %95 = vector.load %arg19[%c2_66, %c9_67, %c0_68] : memref<18x32x64xf32, #tpu.memory_space<vmem>>, vector<16x16x64xf32>
    %c8_69 = arith.constant 8 : index
    %c0_70 = arith.constant 0 : index
    %c0_71 = arith.constant 0 : index
    %96 = vector.load %arg6[%c8_69, %c0_70, %c0_71] : memref<9x1x64xf32, #tpu.memory_space<vmem>>, vector<1x1x64xf32>
    %97 = vector.shape_cast %96 : vector<1x1x64xf32> to vector<1x64xf32>
    %98 = vector.shape_cast %97 : vector<1x64xf32> to vector<1x1x64xf32>
    %99 = vector.broadcast %98 : vector<1x1x64xf32> to vector<16x16x64xf32>
    %100 = arith.mulf %95, %99 : vector<16x16x64xf32>
    %101 = arith.addf %94, %100 : vector<16x16x64xf32>
    %102 = vector.shape_cast %101 : vector<16x16x64xf32> to vector<256x64xf32>
    %c0_72 = arith.constant 0 : index
    %c0_73 = arith.constant 0 : index
    %103 = vector.load %arg7[%c0_72, %c0_73] : memref<1x64xf32, #tpu.memory_space<vmem>>, vector<1x64xf32>
    %104 = vector.broadcast %103 : vector<1x64xf32> to vector<256x64xf32>
    %105 = arith.addf %102, %104 : vector<256x64xf32>
    %cst_74 = arith.constant 3.000000e+00 : f32
    %106 = vector.broadcast %cst_74 : f32 to vector<256x64xf32>
    %107 = arith.addf %105, %106 : vector<256x64xf32>
    %cst_75 = arith.constant 0.000000e+00 : f32
    %cst_76 = arith.constant 6.000000e+00 : f32
    %108 = vector.broadcast %cst_75 : f32 to vector<256x64xf32>
    %109 = arith.maximumf %108, %107 : vector<256x64xf32>
    %110 = vector.broadcast %cst_76 : f32 to vector<256x64xf32>
    %111 = arith.minimumf %110, %109 : vector<256x64xf32>
    %112 = arith.mulf %105, %111 : vector<256x64xf32>
    %cst_77 = arith.constant 0.166666672 : f32
    %113 = vector.broadcast %cst_77 : f32 to vector<256x64xf32>
    %114 = arith.mulf %112, %113 : vector<256x64xf32>
    %115 = arith.truncf %114 : vector<256x64xf32> to vector<256x64xbf16>
    %c0_78 = arith.constant 0 : index
    %c0_79 = arith.constant 0 : index
    %116 = vector.load %arg8[%c0_78, %c0_79] : memref<64x32xf32, #tpu.memory_space<vmem>>, vector<64x32xf32>
    %117 = arith.truncf %116 : vector<64x32xf32> to vector<64x32xbf16>
    %cst_80 = arith.constant dense<0.000000e+00> : vector<256x32xf32>
    %118 = tpu.matmul %115, %117, %cst_80 {dimension_numbers = #tpu.dot_dimension_numbers<[1], [0], [0], [1], [0, 0, 1, 1], [], []>} : vector<256x64xbf16>, vector<64x32xbf16>, vector<256x32xf32> -> vector<256x32xf32>
    %c0_81 = arith.constant 0 : index
    %c0_82 = arith.constant 0 : index
    %119 = vector.load %arg9[%c0_81, %c0_82] : memref<1x32xf32, #tpu.memory_space<vmem>>, vector<1x32xf32>
    %120 = vector.broadcast %119 : vector<1x32xf32> to vector<256x32xf32>
    %121 = arith.addf %118, %120 : vector<256x32xf32>
    %122 = arith.truncf %121 : vector<256x32xf32> to vector<256x32xbf16>
    %c0_83 = arith.constant 0 : index
    %c0_84 = arith.constant 0 : index
    %123 = vector.load %arg10[%c0_83, %c0_84] : memref<32x128xf32, #tpu.memory_space<vmem>>, vector<32x128xf32>
    %124 = arith.truncf %123 : vector<32x128xf32> to vector<32x128xbf16>
    %cst_85 = arith.constant dense<0.000000e+00> : vector<256x128xf32>
    %125 = tpu.matmul %122, %124, %cst_85 {dimension_numbers = #tpu.dot_dimension_numbers<[1], [0], [0], [1], [0, 0, 1, 1], [], []>} : vector<256x32xbf16>, vector<32x128xbf16>, vector<256x128xf32> -> vector<256x128xf32>
    %c0_86 = arith.constant 0 : index
    %c0_87 = arith.constant 0 : index
    %126 = vector.load %arg11[%c0_86, %c0_87] : memref<1x128xf32, #tpu.memory_space<vmem>>, vector<1x128xf32>
    %127 = vector.broadcast %126 : vector<1x128xf32> to vector<256x128xf32>
    %128 = arith.addf %125, %127 : vector<256x128xf32>
    %cst_88 = arith.constant 0.000000e+00 : f32
    %129 = vector.broadcast %cst_88 : f32 to vector<256x128xf32>
    %130 = arith.maximumf %128, %129 : vector<256x128xf32>
    %cst_89 = arith.constant dense<0.000000e+00> : vector<128xf32>
    %131 = vector.multi_reduction <add>, %130, %cst_89 [0] : vector<256x128xf32> to vector<128xf32>
    %132 = vector.shape_cast %131 : vector<128xf32> to vector<1x128xf32>
    %cst_90 = arith.constant 2.560000e+02 : f32
    %133 = vector.broadcast %cst_90 : f32 to vector<1x128xf32>
    %134 = arith.divf %132, %133 : vector<1x128xf32>
    %135 = arith.truncf %134 : vector<1x128xf32> to vector<1x128xbf16>
    %c0_91 = arith.constant 0 : index
    %c0_92 = arith.constant 0 : index
    %136 = vector.load %arg12[%c0_91, %c0_92] : memref<128x128xf32, #tpu.memory_space<vmem>>, vector<128x128xf32>
    %137 = arith.truncf %136 : vector<128x128xf32> to vector<128x128xbf16>
    %cst_93 = arith.constant dense<0.000000e+00> : vector<1x128xf32>
    %138 = tpu.matmul %135, %137, %cst_93 {dimension_numbers = #tpu.dot_dimension_numbers<[1], [0], [0], [1], [0, 0, 1, 1], [], []>} : vector<1x128xbf16>, vector<128x128xbf16>, vector<1x128xf32> -> vector<1x128xf32>
    %c0_94 = arith.constant 0 : index
    %c0_95 = arith.constant 0 : index
    %139 = vector.load %arg13[%c0_94, %c0_95] : memref<1x128xf32, #tpu.memory_space<vmem>>, vector<1x128xf32>
    %140 = arith.addf %138, %139 : vector<1x128xf32>
    %cst_96 = arith.constant 0.000000e+00 : f32
    %141 = vector.broadcast %cst_96 : f32 to vector<1x128xf32>
    %142 = arith.maximumf %140, %141 : vector<1x128xf32>
    %143 = arith.truncf %142 : vector<1x128xf32> to vector<1x128xbf16>
    %c0_97 = arith.constant 0 : index
    %c0_98 = arith.constant 0 : index
    %144 = vector.load %arg14[%c0_97, %c0_98] : memref<128x128xf32, #tpu.memory_space<vmem>>, vector<128x128xf32>
    %145 = arith.truncf %144 : vector<128x128xf32> to vector<128x128xbf16>
    %cst_99 = arith.constant dense<0.000000e+00> : vector<1x128xf32>
    %146 = tpu.matmul %143, %145, %cst_99 {dimension_numbers = #tpu.dot_dimension_numbers<[1], [0], [0], [1], [0, 0, 1, 1], [], []>} : vector<1x128xbf16>, vector<128x128xbf16>, vector<1x128xf32> -> vector<1x128xf32>
    %c0_100 = arith.constant 0 : index
    %c0_101 = arith.constant 0 : index
    %147 = vector.load %arg15[%c0_100, %c0_101] : memref<1x128xf32, #tpu.memory_space<vmem>>, vector<1x128xf32>
    %148 = arith.addf %146, %147 : vector<1x128xf32>
    %cst_102 = arith.constant 0.000000e+00 : f32
    %149 = vector.broadcast %cst_102 : f32 to vector<1x128xf32>
    %150 = arith.maximumf %148, %149 : vector<1x128xf32>
    %151 = arith.truncf %150 : vector<1x128xf32> to vector<1x128xbf16>
    %c0_103 = arith.constant 0 : index
    %c0_104 = arith.constant 0 : index
    %152 = vector.load %arg16[%c0_103, %c0_104] : memref<128x512xf32, #tpu.memory_space<vmem>>, vector<128x512xf32>
    %153 = arith.truncf %152 : vector<128x512xf32> to vector<128x512xbf16>
    %cst_105 = arith.constant dense<0.000000e+00> : vector<1x512xf32>
    %154 = tpu.matmul %151, %153, %cst_105 {dimension_numbers = #tpu.dot_dimension_numbers<[1], [0], [0], [1], [0, 0, 1, 1], [], []>} : vector<1x128xbf16>, vector<128x512xbf16>, vector<1x512xf32> -> vector<1x512xf32>
    %c0_106 = arith.constant 0 : index
    %c0_107 = arith.constant 0 : index
    %155 = vector.load %arg17[%c0_106, %c0_107] : memref<1x512xf32, #tpu.memory_space<vmem>>, vector<1x512xf32>
    %156 = arith.addf %154, %155 : vector<1x512xf32>
    %157 = tpu.iota {dimensions = array<i32: 1>} : vector<1x512xi32>
    %c91_i32 = arith.constant 91 : i32
    %158 = vector.broadcast %c91_i32 : i32 to vector<1x512xi32>
    %159 = arith.cmpi slt, %157, %158 : vector<1x512xi32>
    %cst_108 = arith.constant -1.000000e+30 : f32
    %160 = vector.broadcast %cst_108 : f32 to vector<1x512xf32>
    %161 = arith.select %159, %156, %160 : vector<1x512xi1>, vector<1x512xf32>
    %cst_109 = arith.constant dense<0xFF800000> : vector<1xf32>
    %162 = vector.multi_reduction <maximumf>, %161, %cst_109 [1] : vector<1x512xf32> to vector<1xf32>
    %163 = vector.shape_cast %162 : vector<1xf32> to vector<1x1xf32>
    %164 = vector.broadcast %163 : vector<1x1xf32> to vector<1x512xf32>
    %165 = arith.subf %156, %164 : vector<1x512xf32>
    %166 = math.exp %165 : vector<1x512xf32>
    %cst_110 = arith.constant 0.000000e+00 : f32
    %167 = vector.broadcast %cst_110 : f32 to vector<1x512xf32>
    %168 = arith.select %159, %166, %167 : vector<1x512xi1>, vector<1x512xf32>
    %cst_111 = arith.constant dense<0.000000e+00> : vector<1xf32>
    %169 = vector.multi_reduction <add>, %168, %cst_111 [1] : vector<1x512xf32> to vector<1xf32>
    %170 = vector.shape_cast %169 : vector<1xf32> to vector<1x1xf32>
    %171 = tpu.reciprocal %170 {approx = true} : vector<1x1xf32> -> vector<1x1xf32>
    %172 = vector.broadcast %171 : vector<1x1xf32> to vector<1x512xf32>
    %173 = arith.mulf %168, %172 : vector<1x512xf32>
    %174 = arith.select %159, %173, %156 : vector<1x512xi1>, vector<1x512xf32>
    %c0_112 = arith.constant 0 : index
    %c0_113 = arith.constant 0 : index
    %c0_114 = arith.constant 0 : index
    %175 = vector.load %arg18[%c0_112, %c0_113, %c0_114] : memref<1x1x512xf32, #tpu.memory_space<vmem>>, vector<1x1x512xf32>
    %176 = vector.shape_cast %175 : vector<1x1x512xf32> to vector<1x512xf32>
    %177 = vector.shape_cast %174 : vector<1x512xf32> to vector<1x1x512xf32>
    tpu.vector_store %arg18[%c0_112, %c0_113, %c0_114], %177 {strides = array<i32>} : memref<1x1x512xf32, #tpu.memory_space<vmem>>, vector<1x1x512xf32>,
    return
  }
  func.func @transform_0(%arg0: i32) -> (i32, i32, i32) {
    %c0_i32 = arith.constant 0 : i32
    %c0_i32_0 = arith.constant 0 : i32
    %c0_i32_1 = arith.constant 0 : i32
    return %arg0, %c0_i32, %c0_i32_0 : i32, i32, i32
  }
  func.func @transform_1(%arg0: i32) -> (i32, i32) {
    %c0_i32 = arith.constant 0 : i32
    %c0_i32_0 = arith.constant 0 : i32
    %c0_i32_1 = arith.constant 0 : i32
    return %c0_i32, %c0_i32_0 : i32, i32
  }
  func.func @transform_2(%arg0: i32) -> (i32, i32) {
    %c0_i32 = arith.constant 0 : i32
    %c0_i32_0 = arith.constant 0 : i32
    %c0_i32_1 = arith.constant 0 : i32
    return %c0_i32, %c0_i32_0 : i32, i32
  }
  func.func @transform_3(%arg0: i32) -> (i32, i32) {
    %c0_i32 = arith.constant 0 : i32
    %c0_i32_0 = arith.constant 0 : i32
    %c0_i32_1 = arith.constant 0 : i32
    return %c0_i32, %c0_i32_0 : i32, i32
  }
  func.func @transform_4(%arg0: i32) -> (i32, i32) {
    %c0_i32 = arith.constant 0 : i32
    %c0_i32_0 = arith.constant 0 : i32
    %c0_i32_1 = arith.constant 0 : i32
    return %c0_i32, %c0_i32_0 : i32, i32
  }
  func.func @transform_5(%arg0: i32) -> (i32, i32, i32) {
    %c0_i32 = arith.constant 0 : i32
    %c0_i32_0 = arith.constant 0 : i32
    %c0_i32_1 = arith.constant 0 : i32
    %c0_i32_2 = arith.constant 0 : i32
    return %c0_i32, %c0_i32_0, %c0_i32_1 : i32, i32, i32
  }
  func.func @transform_6(%arg0: i32) -> (i32, i32) {
    %c0_i32 = arith.constant 0 : i32
    %c0_i32_0 = arith.constant 0 : i32
    %c0_i32_1 = arith.constant 0 : i32
    return %c0_i32, %c0_i32_0 : i32, i32
  }
  func.func @transform_7(%arg0: i32) -> (i32, i32) {
    %c0_i32 = arith.constant 0 : i32
    %c0_i32_0 = arith.constant 0 : i32
    %c0_i32_1 = arith.constant 0 : i32
    return %c0_i32, %c0_i32_0 : i32, i32
  }
  func.func @transform_8(%arg0: i32) -> (i32, i32) {
    %c0_i32 = arith.constant 0 : i32
    %c0_i32_0 = arith.constant 0 : i32
    %c0_i32_1 = arith.constant 0 : i32
    return %c0_i32, %c0_i32_0 : i32, i32
  }
  func.func @transform_9(%arg0: i32) -> (i32, i32) {
    %c0_i32 = arith.constant 0 : i32
    %c0_i32_0 = arith.constant 0 : i32
    %c0_i32_1 = arith.constant 0 : i32
    return %c0_i32, %c0_i32_0 : i32, i32
  }
  func.func @transform_10(%arg0: i32) -> (i32, i32) {
    %c0_i32 = arith.constant 0 : i32
    %c0_i32_0 = arith.constant 0 : i32
    %c0_i32_1 = arith.constant 0 : i32
    return %c0_i32, %c0_i32_0 : i32, i32
  }
  func.func @transform_11(%arg0: i32) -> (i32, i32) {
    %c0_i32 = arith.constant 0 : i32
    %c0_i32_0 = arith.constant 0 : i32
    %c0_i32_1 = arith.constant 0 : i32
    return %c0_i32, %c0_i32_0 : i32, i32
  }
  func.func @transform_12(%arg0: i32) -> (i32, i32) {
    %c0_i32 = arith.constant 0 : i32
    %c0_i32_0 = arith.constant 0 : i32
    %c0_i32_1 = arith.constant 0 : i32
    return %c0_i32, %c0_i32_0 : i32, i32
  }
  func.func @transform_13(%arg0: i32) -> (i32, i32) {
    %c0_i32 = arith.constant 0 : i32
    %c0_i32_0 = arith.constant 0 : i32
    %c0_i32_1 = arith.constant 0 : i32
    return %c0_i32, %c0_i32_0 : i32, i32
  }
  func.func @transform_14(%arg0: i32) -> (i32, i32) {
    %c0_i32 = arith.constant 0 : i32
    %c0_i32_0 = arith.constant 0 : i32
    %c0_i32_1 = arith.constant 0 : i32
    return %c0_i32, %c0_i32_0 : i32, i32
  }
  func.func @transform_15(%arg0: i32) -> (i32, i32) {
    %c0_i32 = arith.constant 0 : i32
    %c0_i32_0 = arith.constant 0 : i32
    %c0_i32_1 = arith.constant 0 : i32
    return %c0_i32, %c0_i32_0 : i32, i32
  }
  func.func @transform_16(%arg0: i32) -> (i32, i32) {
    %c0_i32 = arith.constant 0 : i32
    %c0_i32_0 = arith.constant 0 : i32
    %c0_i32_1 = arith.constant 0 : i32
    return %c0_i32, %c0_i32_0 : i32, i32
  }
  func.func @transform_17(%arg0: i32) -> (i32, i32, i32) {
    %c0_i32 = arith.constant 0 : i32
    %c0_i32_0 = arith.constant 0 : i32
    %c0_i32_1 = arith.constant 0 : i32
    return %arg0, %c0_i32, %c0_i32_0 : i32, i32, i32
  }
}

</mosaic_0001>

<bundles_post_ra>
// kernel: tpu_custom_call.1
= control target key start
LH: loop header
LB: loop body
LE: loop exit
PB: predicated region body
PF: predicated region fallthrough
CT: control target
= control target key end

     0   :  { %s6693_s0 = inlined_call_operand.vmem [shape: f32[2,256,27], index: 0, kind: input, shape index: {}]   ;;  %s6694_s1 = inlined_call_operand.vmem [shape: f32[27,16], index: 1, kind: input, shape index: {}]   ;;  %s6695_s2 = inlined_call_operand.hbm [shape: f32[1,16], index: 2, kind: input, shape index: {}]   ;;  %s6696_s3 = inlined_call_operand.vmem [shape: f32[16,64], index: 3, kind: input, shape index: {}]   ;;  %s6697_s4 = inlined_call_operand.hbm [shape: f32[1,64], index: 4, kind: input, shape index: {}]   ;;  %s6698_s5 = inlined_call_operand.hbm [shape: f32[9,1,64], index: 5, kind: input, shape index: {}]   ;;  %s6699_s6 = inlined_call_operand.hbm [shape: f32[1,64], index: 6, kind: input, shape index: {}]   ;;  %s6700_s7 = inlined_call_operand.vmem [shape: f32[64,32], index: 7, kind: input, shape index: {}]   ;;  %s6701_s8 = inlined_call_operand.hbm [shape: f32[1,32], index: 8, kind: input, shape index: {}]   ;;  %s6702_s9 = inlined_call_operand.vmem [shape: f32[32,128], index: 9, kind: input, shape index: {}]   ;;  %s6703_s10 = inlined_call_operand.hbm [shape: f32[1,128], index: 10, kind: input, shape index: {}]   ;;  %s6704_s11 = inlined_call_operand.vmem [shape: f32[128,128], index: 11, kind: input, shape index: {}]   ;;  %s6705_s12 = inlined_call_operand.hbm [shape: f32[1,128], index: 12, kind: input, shape index: {}]   ;;  %s6706_s13 = inlined_call_operand.vmem [shape: f32[128,128], index: 13, kind: input, shape index: {}]   ;;  %s6707_s14 = inlined_call_operand.hbm [shape: f32[1,128], index: 14, kind: input, shape index: {}]   ;;  %s6708_s15 = inlined_call_operand.vmem [shape: f32[128,512], index: 15, kind: input, shape index: {}]   ;;  %s6709_s16 = inlined_call_operand.vmem [shape: f32[1,512], index: 16, kind: input, shape index: {}]   ;;  %s6710_s17 = inlined_call_operand.hbm [shape: f32[2,1,512], index: 17, kind: output, shape index: {}]  }
   0x1   :  { %6725 = sst [smem:[#allocation32_spill]] %s6693_s0 }
   0x2   :  { %6726 = sst [smem:[#allocation33_spill]] %s6694_s1 }
   0x3   :  { %6727 = sst [smem:[#allocation34_spill]] %s6695_s2 }
   0x4   :  { %6728 = sst [smem:[#allocation35_spill]] %s6697_s4 }
   0x5   :  { %6729 = sst [smem:[#allocation36_spill]] %s6699_s6 }
   0x6   :  { %6730 = sst [smem:[#allocation37_spill]] %s6703_s10 }
   0x7   :  { %6731 = sst [smem:[#allocation38_spill]] %s6710_s17 }
   0x8   :  { %22 = vsyncpa [#allocation4], 0 }
   0x9   :  { %23 = vsyncpa [#allocation7], 0 }
   0xa   :  { %24 = vsyncpa [#allocation10], 0 }
   0xb   :  { %25 = vsyncpa [#allocation13], 0 }
   0xc   :  { %26 = vsyncpa [#allocation16], 0 }
   0xd   :  { %27 = vsyncpa [#allocation5], 0 }
   0xe   :  { %29 = vsyncpa [#allocation5 + $0x1], 0  ;;  %s4803_s24 = smov 0   ;;  %s4805_s25 = smov 0  }
   0xf   :  { %s4807_s26 = smov 0   ;;  %s4809_s27 = smov 0  }
  0x10 LB: > { %6732 = sst [smem:[#allocation24_spill]] %s4682_s24  ;;  %s4824_s28 = sadd.s32 4294967295, %s4694_s27   ;;  %s4694_s27 = sphi %s4809_s27, %s6770_s27   ;;  %s4690_s26 = sphi %s4807_s26, %s6773_s26   ;;  %s4686_s25 = sphi %s4805_s25, %s6772_s25   ;;  %s4682_s24 = sphi %s4803_s24, %s6771_s24  }
  0x11   : > { %6733 = sst [smem:[#allocation25_spill]] %s4686_s25  ;;  %s3859_s29 = sadd.s32 4294967294, %s4694_s27  }
  0x12   : > { %6734 = sst [smem:[#allocation26_spill]] %s4690_s26  ;;  %s4828_s0 = sadd.s32 1, %s4694_s27  }
  0x13   : > { %6735 = sst [smem:[#allocation27_spill]] %s4694_s27  ;;  %s404_s30 = sadd.s32 1, %s4690_s26 }
  0x14   : > { %6736 = sst [smem:[#allocation28_spill]] %s4828_s0  ;;  %s401_s18 = ssub.s32 %s4694_s27, %s4828_s0 }
  0x15   : > { %p414_p0 = scmp.ne.s32.totalorder %s4690_s26, %s4686_s25  ;;  %p402_p1 = scmp.eq.s32.totalorder %s401_s18, 0 }
  0x16   : > { %p415_p2 = scmp.eq.s32.totalorder %s4824_s28, 1  ;;  %p420_p3 = scmp.ne.s32.totalorder %s4686_s25, %s4682_s24 }
  0x17   : > { %p421_p4 = scmp.eq.s32.totalorder %s3859_s29, 1  ;;  %p3860_p7 = scmp.ge.s32.totalorder %s4694_s27, 1 }
  0x18   : > { %s4839_s19 = scalar_select %p402_p1, %s4690_s26, %s404_s30  }
  0x19   : > { %p4841_p5 = por %p415_p2, %p414_p0  ;;  %p4845_p6 = por %p421_p4, %p420_p3 }
  0x1a   : > { %6737 = sst [smem:[#allocation29_spill]] %s4839_s19  ;;  %p428_p8 = scmp.lt.s32.totalorder %s4694_s27, 3 }
  0x1b   : > { %s6738_s1 = scalar_select %p4841_p5, 1, 0 }
  0x1c   : > { %s6740_s20 = scalar_select %p4845_p6, 1, 0 }
  0x1d   : > { %6739 = sst [smem:[#allocation30_spill]] %s6738_s1  ;;  %p6719_p9 = scmp.eq.s32.totalorder %s4824_s28, 0 }
  0x1e   : > { %6741 = sst [smem:[#allocation31_spill]] %s6740_s20  ;;  %p4852_p10 = pnand %p3860_p7, %p428_p8 }
  0x1f   : > { %s4696_s22 = smov [#allocation6]   ;;  %s4697_s29 = smov [#allocation9]  }
  0x20   : > { %s6742_s21 = scalar_select %p4852_p10, 1, 0 }
  0x21   : > { %s458_s23 = sshll.u32 %s4696_s22, 4  ;;  %p4278_p11 = pneg %p4852_p10  ;;  %s459_s23 = int_to_ptr.vmem [resolvable:$true] %s458_s23 }
  0x22   : > { %s482_s30 = sshll.u32 %s4697_s29, 4  ;;  %s4698_s19 = smov [#allocation12]   ;;  %s4864_s30 = int_to_ptr.vmem [resolvable:$true] %s482_s30 }
  0x23   : > { %p4860_p12 = pnand %p6719_p9, %p4278_p11  ;;  %s510_s26 = sshll.u32 %s4698_s19, 4  ;;  %s4866_s26 = int_to_ptr.vmem [resolvable:$true] %s510_s26 }
  0x24   : > { %s6744_s4 = sld [smem:[#allocation35_spill]] }
  0x25   : > { %p4876_p0 = pneg %p4860_p12 }
  0x2a   : > { %s4388_s22 = scalar_lea.hbm %s6744_s4, 16 }
  0x2b   : > { %p4389_p13 = scmp.ne.s32.totalorder %s6744_s4, %s4388_s22  ;;  %p4395_p3 = scmp.lt.u32.totalorder %s4388_s22, %s6744_s4 }
  0x2d   : > { %p4391_p1 = pnand %p4876_p0, %p4389_p13 }
  0x2f   : > { %p4392_p2 = pneg %p4391_p1 }
  0x31   : > { %p4397_p4 = pnand %p4395_p3, %p4392_p2 }
  0x33   : > { %4400 = shalt.err (!%p4397_p4)
}
  0x34   : > { %s4401_s0 = scalar_lea.vmem %s459_s23, 16  ;;  %s4408_s24 = scalar_lea.vmem %s459_s23, 32 }
  0x35   : > { %p4402_p7 = scmp.ne.s32.totalorder %s459_s23, %s4401_s0  ;;  %p4409_p9 = scmp.lt.s32.totalorder %s459_s23, %s459_s23 }
  0x36   : > { %p4410_p6 = scmp.lt.s32.totalorder %s4408_s24, %s4401_s0 }
  0x37   : > { %p4404_p8 = pnand %p4402_p7, %p4876_p0 }
  0x38   : > { %p4411_p5 = por %p4410_p6, %p4409_p9 }
  0x39   : > { %p4405_p11 = pneg %p4404_p8 }
  0x3b   : > { %p4412_p10 = pnand %p4411_p5, %p4405_p11 }
  0x3d   : > { %4415 = shalt.err (!%p4412_p10)
}
  0x3e   : > { %4284 = dma.hbm_to_vmem [thread:$0]  (!%p4860_p12), %s6744_s4, 16, %s459_s23, [#allocation7]  }
  0x3f   : > { %s6746_s6 = sld [smem:[#allocation36_spill]] }
  0x45   : > { %s4416_s19 = scalar_lea.hbm %s6746_s6, 16 }
  0x46   : > { %p4417_p13 = scmp.ne.s32.totalorder %s6746_s6, %s4416_s19  ;;  %p4423_p5 = scmp.lt.u32.totalorder %s4416_s19, %s6746_s6 }
  0x48   : > { %p4419_p1 = pnand %p4417_p13, %p4876_p0 }
  0x4a   : > { %p4420_p6 = pneg %p4419_p1 }
  0x4c   : > { %p4425_p9 = pnand %p4423_p5, %p4420_p6 }
  0x4e   : > { %4428 = shalt.err (!%p4425_p9)
}
  0x4f   : > { %s4429_s23 = scalar_lea.vmem %s4864_s30, 16  ;;  %s4436_s25 = scalar_lea.vmem %s4864_s30, 32 }
  0x50   : > { %p4430_p10 = scmp.ne.s32.totalorder %s4864_s30, %s4429_s23  ;;  %p4437_p4 = scmp.lt.s32.totalorder %s4864_s30, %s4864_s30 }
  0x51   : > { %p4438_p7 = scmp.lt.s32.totalorder %s4436_s25, %s4429_s23 }
  0x52   : > { %p4432_p2 = pnand %p4430_p10, %p4876_p0 }
  0x53   : > { %p4439_p8 = por %p4438_p7, %p4437_p4 }
  0x54   : > { %p4433_p3 = pneg %p4432_p2 }
  0x56   : > { %p4440_p11 = pnand %p4439_p8, %p4433_p3 }
  0x58   : > { %4443 = shalt.err (!%p4440_p11)
}
  0x59   : > { %4290 = dma.hbm_to_vmem [thread:$0]  (!%p4860_p12), %s6746_s6, 16, %s4864_s30, [#allocation10]  }
  0x5a   : > { %s6747_s10 = sld [smem:[#allocation37_spill]] }
  0x60   : > { %s4444_s22 = scalar_lea.hbm %s6747_s10, 16 }
  0x61   : > { %p4445_p13 = scmp.ne.s32.totalorder %s6747_s10, %s4444_s22  ;;  %p4451_p5 = scmp.lt.u32.totalorder %s4444_s22, %s6747_s10 }
  0x63   : > { %p4447_p1 = pnand %p4445_p13, %p4876_p0 }
  0x65   : > { %p4448_p6 = pneg %p4447_p1 }
  0x67   : > { %p4453_p9 = pnand %p4451_p5, %p4448_p6 }
  0x69   : > { %4456 = shalt.err (!%p4453_p9)
}
  0x6a   : > { %s4457_s30 = scalar_lea.vmem %s4866_s26, 16  ;;  %s4464_s25 = scalar_lea.vmem %s4866_s26, 32 }
  0x6b   : > { %p4458_p10 = scmp.ne.s32.totalorder %s4866_s26, %s4457_s30  ;;  %p4465_p4 = scmp.lt.s32.totalorder %s4866_s26, %s4866_s26 }
  0x6c   : > { %p4466_p7 = scmp.lt.s32.totalorder %s4464_s25, %s4457_s30 }
  0x6d   : > { %p4460_p2 = pnand %p4458_p10, %p4876_p0 }
  0x6e   : > { %p4467_p8 = por %p4466_p7, %p4465_p4 }
  0x6f   : > { %p4461_p3 = pneg %p4460_p2 }
  0x71   : > { %p4468_p11 = pnand %p4467_p8, %p4461_p3 }
  0x73   : > { %4471 = shalt.err (!%p4468_p11)
}
  0x74   : > { %4296 = dma.hbm_to_vmem [thread:$0]  (!%p4860_p12), %s6747_s10, 16, %s4866_s26, [#allocation13]  }
  0x75   : > { %s4699_s20 = smov [#allocation3]   ;;  %s4700_s22 = smov [#allocation8]  }
  0x76   : > { %s444_s17 = sshll.u32 %s4699_s20, 4  ;;  %s468_s19 = sshll.u32 %s4700_s22, 4  ;;  %s445_s17 = int_to_ptr.vmem [resolvable:$true] %s444_s17  ;;  %s469_s19 = int_to_ptr.vmem [resolvable:$true] %s468_s19 }
  0x77   : > { %s6748_s2 = sld [smem:[#allocation34_spill]] }
  0x7d   : > { %s4472_s23 = scalar_lea.hbm %s6748_s2, 16 }
  0x7e   : > { %p4473_p13 = scmp.ne.s32.totalorder %s6748_s2, %s4472_s23  ;;  %p4479_p5 = scmp.lt.u32.totalorder %s4472_s23, %s6748_s2 }
  0x80   : > { %p4475_p1 = pnand %p4473_p13, %p4876_p0 }
  0x82   : > { %p4476_p6 = pneg %p4475_p1 }
  0x84   : > { %p4481_p9 = pnand %p4479_p5, %p4476_p6 }
  0x86   : > { %4484 = shalt.err (!%p4481_p9)
}
  0x87   : > { %s4485_s26 = scalar_lea.vmem %s445_s17, 16  ;;  %s4492_s27 = scalar_lea.vmem %s445_s17, 32 }
  0x88   : > { %p4486_p10 = scmp.ne.s32.totalorder %s445_s17, %s4485_s26  ;;  %p4493_p4 = scmp.lt.s32.totalorder %s445_s17, %s445_s17 }
  0x89   : > { %p4494_p7 = scmp.lt.s32.totalorder %s4492_s27, %s4485_s26 }
  0x8a   : > { %p4488_p2 = pnand %p4486_p10, %p4876_p0 }
  0x8b   : > { %p4495_p8 = por %p4494_p7, %p4493_p4 }
  0x8c   : > { %p4489_p3 = pneg %p4488_p2 }
  0x8e   : > { %p4496_p11 = pnand %p4495_p8, %p4489_p3 }
  0x90   : > { %4499 = shalt.err (!%p4496_p11)
}
  0x91   : > { %4281 = dma.hbm_to_vmem [thread:$0]  (!%p4860_p12), %s6748_s2, 16, %s445_s17, [#allocation4]  }
  0x92   : > { %s4500_s24 = scalar_lea.hbm %s6698_s5, 144 }
  0x93   : > { %p4501_p13 = scmp.ne.s32.totalorder %s6698_s5, %s4500_s24  ;;  %p4507_p5 = scmp.lt.u32.totalorder %s4500_s24, %s6698_s5 }
  0x95   : > { %p4503_p1 = pnand %p4501_p13, %p4876_p0 }
  0x97   : > { %p4504_p6 = pneg %p4503_p1 }
  0x99   : > { %p4509_p9 = pnand %p4507_p5, %p4504_p6 }
  0x9b   : > { %4512 = shalt.err (!%p4509_p9)
}
  0x9c   : > { %s4513_s26 = scalar_lea.vmem %s469_s19, 144  ;;  %s4520_s17 = scalar_lea.vmem %s469_s19, 160 }
  0x9d   : > { %p4514_p10 = scmp.ne.s32.totalorder %s469_s19, %s4513_s26  ;;  %p4521_p4 = scmp.lt.s32.totalorder %s469_s19, %s469_s19 }
  0x9e   : > { %p4522_p7 = scmp.lt.s32.totalorder %s4520_s17, %s4513_s26 }
  0x9f   : > { %p4516_p2 = pnand %p4514_p10, %p4876_p0 }
  0xa0   : > { %p4523_p8 = por %p4522_p7, %p4521_p4 }
  0xa1   : > { %p4517_p3 = pneg %p4516_p2 }
  0xa3   : > { %p4524_p11 = pnand %p4523_p8, %p4517_p3 }
  0xa5   : > { %4527 = shalt.err (!%p4524_p11)
}
  0xa6   : > { %s4701_s27 = smov 16   ;;  %s4702_s20 = smov 1  }
  0xa7   : > { %4287 = dma.hbm_to_vmem [thread:$0]  (!%p4860_p12), %s6698_s5, 144, %s469_s19, [#allocation7], %s4701_s27, %s4701_s27, %s4702_s20  }
  0xa8   : > { %s4703_s0 = smov [#allocation11]   ;;  %s4704_s23 = smov [#allocation14]  }
  0xa9   : > { %s496_s24 = sshll.u32 %s4703_s0, 4  ;;  %s524_s30 = sshll.u32 %s4704_s23, 4  ;;  %s497_s24 = int_to_ptr.vmem [resolvable:$true] %s496_s24  ;;  %s525_s30 = int_to_ptr.vmem [resolvable:$true] %s524_s30 }
  0xaa   : > { %s4528_s26 = scalar_lea.hbm %s6701_s8, 16 }
  0xab   : > { %p4529_p13 = scmp.ne.s32.totalorder %s6701_s8, %s4528_s26  ;;  %p4535_p5 = scmp.lt.u32.totalorder %s4528_s26, %s6701_s8 }
  0xad   : > { %p4531_p1 = pnand %p4529_p13, %p4876_p0 }
  0xaf   : > { %p4532_p6 = pneg %p4531_p1 }
  0xb1   : > { %p4537_p9 = pnand %p4535_p5, %p4532_p6 }
  0xb3   : > { %4540 = shalt.err (!%p4537_p9)
}
  0xb4   : > { %s4541_s19 = scalar_lea.vmem %s497_s24, 16  ;;  %s4548_s27 = scalar_lea.vmem %s497_s24, 32 }
  0xb5   : > { %p4542_p10 = scmp.ne.s32.totalorder %s497_s24, %s4541_s19  ;;  %p4549_p4 = scmp.lt.s32.totalorder %s497_s24, %s497_s24 }
  0xb6   : > { %p4550_p7 = scmp.lt.s32.totalorder %s4548_s27, %s4541_s19 }
  0xb7   : > { %p4544_p2 = pnand %p4542_p10, %p4876_p0 }
  0xb8   : > { %p4551_p8 = por %p4550_p7, %p4549_p4 }
  0xb9   : > { %p4545_p3 = pneg %p4544_p2 }
  0xbb   : > { %p4552_p11 = pnand %p4551_p8, %p4545_p3 }
  0xbd   : > { %4555 = shalt.err (!%p4552_p11)
}
  0xbe   : > { %4293 = dma.hbm_to_vmem [thread:$0]  (!%p4860_p12), %s6701_s8, 16, %s497_s24, [#allocation10]  }
  0xbf   : > { %s4556_s22 = scalar_lea.hbm %s6705_s12, 16 }
  0xc0   : > { %p4557_p13 = scmp.ne.s32.totalorder %s6705_s12, %s4556_s22  ;;  %p4563_p5 = scmp.lt.u32.totalorder %s4556_s22, %s6705_s12 }
  0xc2   : > { %p4559_p1 = pnand %p4557_p13, %p4876_p0 }
  0xc4   : > { %p4560_p6 = pneg %p4559_p1 }
  0xc6   : > { %p4565_p9 = pnand %p4563_p5, %p4560_p6 }
  0xc8   : > { %4568 = shalt.err (!%p4565_p9)
}
  0xc9   : > { %s4569_s1 = scalar_lea.vmem %s525_s30, 16  ;;  %s4576_s24 = scalar_lea.vmem %s525_s30, 32 }
  0xca   : > { %p4570_p10 = scmp.ne.s32.totalorder %s525_s30, %s4569_s1  ;;  %p4577_p4 = scmp.lt.s32.totalorder %s525_s30, %s525_s30 }
  0xcb   : > { %p4578_p7 = scmp.lt.s32.totalorder %s4576_s24, %s4569_s1 }
  0xcc   : > { %p4572_p2 = pnand %p4570_p10, %p4876_p0 }
  0xcd   : > { %p4579_p8 = por %p4578_p7, %p4577_p4 }
  0xce   : > { %p4573_p3 = pneg %p4572_p2 }
  0xd0   : > { %p4580_p11 = pnand %p4579_p8, %p4573_p3 }
  0xd2   : > { %4583 = shalt.err (!%p4580_p11)
}
  0xd3   : > { %4299 = dma.hbm_to_vmem [thread:$0]  (!%p4860_p12), %s6705_s12, 16, %s525_s30, [#allocation13]  }
  0xd4   : > { %s4705_s19 = smov [#allocation15]   ;;  %s4584_s6 = scalar_lea.hbm %s6707_s14, 16 }
  0xd5   : > { %s538_s27 = sshll.u32 %s4705_s19, 4  ;;  %p4585_p13 = scmp.ne.s32.totalorder %s6707_s14, %s4584_s6  ;;  %s539_s27 = int_to_ptr.vmem [resolvable:$true] %s538_s27 }
  0xd6   : > { %p4591_p5 = scmp.lt.u32.totalorder %s4584_s6, %s6707_s14 }
  0xd7   : > { %p4587_p1 = pnand %p4585_p13, %p4876_p0 }
  0xd9   : > { %p4588_p6 = pneg %p4587_p1 }
  0xdb   : > { %p4593_p9 = pnand %p4591_p5, %p4588_p6 }
  0xdd   : > { %4596 = shalt.err (!%p4593_p9)
}
  0xde   : > { %s4597_s30 = scalar_lea.vmem %s539_s27, 16  ;;  %s4604_s23 = scalar_lea.vmem %s539_s27, 32 }
  0xdf   : > { %p4598_p10 = scmp.ne.s32.totalorder %s539_s27, %s4597_s30  ;;  %p4605_p4 = scmp.lt.s32.totalorder %s539_s27, %s539_s27 }
  0xe0   : > { %p4606_p7 = scmp.lt.s32.totalorder %s4604_s23, %s4597_s30 }
  0xe1   : > { %p4600_p2 = pnand %p4598_p10, %p4876_p0 }
  0xe2   : > { %p4607_p8 = por %p4606_p7, %p4605_p4 }
  0xe3   : > { %p4601_p3 = pneg %p4600_p2 }
  0xe5   : > { %p4608_p11 = pnand %p4607_p8, %p4601_p3 }
  0xe7   : > { %4611 = shalt.err (!%p4608_p11)
}
  0xe8   : > { %4302 = dma.hbm_to_vmem [thread:$0]  (!%p4860_p12), %s6707_s14, 16, %s539_s27, [#allocation16]  }
  0xe9   : > { %p6749_p13 = scmp.ne.s32.totalorder %s6742_s21, 0 }
  0xea   : > { %p6750_p1 = scmp.eq.s32.totalorder (!%p6749_p13), %s4824_s28, 0 }
  0xeb   : > { %565 = sbr.rel (%p6749_p13) target bundleno = 2425 (0x979), region = 88 }
  0xf2   : > { %4657 = dma.done.wait (%p6750_p1), [#allocation4], 16   ;;  %p6751_p0 = pmov %p6750_p1 }
  0xf4   : > { %4659 = vsyncadd (%p6751_p0), [#allocation4], 4294967280  ;;  %p6752_p6 = pmov %p6751_p0 }
  0xf5   : > { %p6753_p5 = pmov %p6751_p0 }
  0xf6   : > { %4661 = dma.done.wait (%p6752_p6), [#allocation7], 160  }
  0xf7   : > { %4663 = vsyncadd (%p6753_p5), [#allocation7], 4294967136  ;;  %p6754_p9 = pmov %p6751_p0 }
  0xf8   : > { %p6755_p12 = pmov %p6751_p0 }
  0xf9   : > { %4665 = dma.done.wait (%p6754_p9), [#allocation10], 32  }
  0xfa   : > { %4667 = vsyncadd (%p6755_p12), [#allocation10], 4294967264  ;;  %p6756_p10 = pmov %p6751_p0 }
  0xfb   : > { %p6757_p2 = pmov %p6751_p0 }
  0xfc   : > { %4669 = dma.done.wait (%p6756_p10), [#allocation13], 32  }
  0xfd   : > { %4671 = vsyncadd (%p6757_p2), [#allocation13], 4294967264  ;;  %p6758_p3 = pmov %p6751_p0 }
  0xfe   : > { %p6759_p4 = pmov %p6751_p0 }
  0xff   : > { %4673 = dma.done.wait (%p6758_p3), [#allocation16], 16  }
 0x100   : > { %4675 = vsyncadd (%p6759_p4), [#allocation16], 4294967280  ;;  %p645_p7 = scmp.lt.s32.totalorder %s4824_s28, 1  ;;  %vm761_vm0 = vcmask 1044480   ;;  %vm762_vm1 = vcmask 1045504   ;;  %v4706_v0 = vmov 65535  }
 0x101   : > { %v763_v1 = vsel %vm761_vm0, 4294967295, %v4706_v0  ;;  %s6760_s26 = sld [smem:[#allocation32_spill]]  ;;  %s6761_s2 = sld [smem:[#allocation33_spill]]  ;;  %vm712_vm2 = vcmask 220160   ;;  %v1105_v58 = vld [vmem:[%s6696_s3] sm:$0xff]  ;;  %v1106_v59 = vld [vmem:[%s6696_s3 + $0x8] sm:$0xff] }
 0x102   : > { %s646_s21 = scalar_select %p645_p7, %s4824_s28, 1  ;;  %v764_v7 = vsel %vm762_vm1, %v763_v1, 0  ;;  %v1107_v60 = vpack.c.bf16 %v1106_v59, %v1105_v58  ;;  %v2742_v61 = vld [vmem:[%s6700_s7] sm:$0xff]  ;;  %v2743_v62 = vld [vmem:[%s6700_s7 + $0x8] sm:$0xff]  ;;  %vm1115_vm3 = vcmask 130048   ;;  %vm1485_vm4 = vcmask 523264  }
 0x103   : > { %v5131_v63 = vpack.c.bf16 %v2743_v62, %v2742_v61  ;;  %v5134_v0 = vld [vmem:[#allocation3] ss:$0 sm:$0xff]  ;;  %vm2999_vm5 = vcmask 261120   ;;  %vm4708_vm6 = vmmov 0   ;;  %vm3628_vm7 = vcmask 1040384   ;;  %s6762_s29 = sld [smem:[#allocation25_spill]] }
 0x104   : > { %s3965_s18 = sshll.u32 %s646_s21, 8  ;;  %4094 = vmatprep.subr.bf16.mxu1 %v1107_v60  ;;  %s3966_s19 = sshll.u32 %s4824_s28, 6 }
 0x105   : > { %4095 = vmatpush3.bf16.msra.mxu1 %v1107_v60  ;;  %s6764_s22 = sld [smem:[#allocation38_spill]]  ;;  %s4712_s28 = smov [#allocation17]  }
 0x106   : > { %4128 = vmatprep.subr.bf16.mxu1 %v5131_v63  ;;  %s4616_s23 = sshll.u32 %s4712_s28, 4  ;;  %s4617_s23 = int_to_ptr.vmem [resolvable:$false] %s4616_s23 }
 0x107   : > { %s5057_s17 = scalar_lea.vmem %s6760_s26, %s3965_s18  ;;  %v699_v2 = vld [vmem:[%s6761_s2] sm:$0xff]  ;;  %v700_v3 = vld [vmem:[%s6761_s2 + $0x8] sm:$0xff]  ;;  %v701_v4 = vld [vmem:[%s6761_s2 + $0x10] sm:$0xff]  ;;  %s4618_s25 = scalar_lea.vmem %s4617_s23, 128 }
 0x108   : > { %v703_v5 = vpack.c.bf16 %v700_v3, %v699_v2  ;;  %v702_v6 = vld [vmem:[%s6761_s2 + $0x18] sm:$0x7]  ;;  %v651_v8 = vld [vmem:[%s5057_s17] sm:$0xff]  ;;  %v652_v9 = vld [vmem:[%s5057_s17 + $0x8] sm:$0xff] }
 0x109   : > { %v704_v10 = vpack.c.bf16 %v702_v6, %v701_v4  ;;  %v683_v11 = vpack.c.bf16 %v652_v9, %v651_v8  ;;  %v653_v13 = vld [vmem:[%s5057_s17 + $0x10] sm:$0xff]  ;;  %v654_v14 = vld [vmem:[%s5057_s17 + $0x18] sm:$0xff]  ;;  %v655_v15 = vld [vmem:[%s5057_s17 + $0x20] sm:$0xff]  ;;  %s642_s24 = sand.u32 1, %s6762_s29  }
 0x10a   : > { %4058 = vmatprep.subr.bf16.mxu0 %v703_v5  ;;  %v656_v16 = vld [vmem:[%s5057_s17 + $0x28] sm:$0xff]  ;;  %v684_v17 = vpack.c.bf16 %v654_v14, %v653_v13  ;;  %v657_v19 = vld [vmem:[%s5057_s17 + $0x30] sm:$0xff]  ;;  %v658_v20 = vld [vmem:[%s5057_s17 + $0x38] sm:$0xff]  ;;  %s3879_s26 = sshll.u32 %s642_s24, 2  ;;  %s3707_s0 = scalar_lea.sflag [#allocation5], %s642_s24 }
 0x10b   : > { %4059 = vmatpush3.bf16.msra.mxu0 %v703_v5  ;;  %v766_v12 = vand.u32 %v764_v7, %v704_v10  ;;  %4062 = vmatprep.mubr.msk.bf16.mxu0 %vm712_vm2, %v683_v11  ;;  %v685_v18 = vpack.c.bf16 %v656_v16, %v655_v15  ;;  %v659_v21 = vld [vmem:[%s5057_s17 + $0x40] sm:$0xff]  ;;  %v660_v22 = vld [vmem:[%s5057_s17 + $0x48] sm:$0xff]  ;;  %v686_v23 = vpack.c.bf16 %v658_v20, %v657_v19  ;;  %v661_v25 = vld [vmem:[%s5057_s17 + $0x50] sm:$0xff]  ;;  %s644_s27 = scalar_lea.vmem [#allocation17], %s3879_s26  ;;  %s6651_s4 = scalar_lea.hbm %s6764_s22, %s3966_s19 }
 0x10c   : > { %v687_v24 = vpack.c.bf16 %v660_v22, %v659_v21  ;;  %v662_v26 = vld [vmem:[%s5057_s17 + $0x58] sm:$0xff]  ;;  %v663_v27 = vld [vmem:[%s5057_s17 + $0x60] sm:$0xff]  ;;  %v664_v28 = vld [vmem:[%s5057_s17 + $0x68] sm:$0xff]  ;;  %s3721_s20 = sshll.u32 %s644_s27, 4  ;;  %s6653_s20 = int_to_ptr.vmem [resolvable:$true] %s3721_s20 }
 0x10d   : > { %4060 = vmatprep.subr.bf16.mxu0 %v766_v12  ;;  %v688_v29 = vpack.c.bf16 %v662_v26, %v661_v25  ;;  %v689_v30 = vpack.c.bf16 %v664_v28, %v663_v27  ;;  %v665_v31 = vld [vmem:[%s5057_s17 + $0x70] sm:$0xff]  ;;  %v666_v32 = vld [vmem:[%s5057_s17 + $0x78] sm:$0xff]  ;;  %v667_v33 = vld [vmem:[%s5057_s17 + $0x80] sm:$0xff]  ;;  %s4612_s30 = scalar_lea.vmem %s6653_s20, 64  ;;  %p4619_p0 = scmp.lt.s32.totalorder %s6653_s20, %s4617_s23 }
 0x10e   : > { %v668_v34 = vld [vmem:[%s5057_s17 + $0x88] sm:$0xff]  ;;  %v690_v35 = vpack.c.bf16 %v666_v32, %v665_v31  ;;  %v669_v37 = vld [vmem:[%s5057_s17 + $0x90] sm:$0xff]  ;;  %v670_v38 = vld [vmem:[%s5057_s17 + $0x98] sm:$0xff]  ;;  %p4613_p8 = scmp.ne.s32.totalorder %s6653_s20, %s4612_s30  ;;  %p4620_p6 = scmp.lt.s32.totalorder %s4618_s25, %s4612_s30 }
 0x10f   : > { %4061 = vmatpush3.bf16.msra.mxu0 %v766_v12  ;;  %v691_v36 = vpack.c.bf16 %v668_v34, %v667_v33  ;;  %v671_v39 = vld [vmem:[%s5057_s17 + $0xa0] sm:$0xff]  ;;  %v672_v40 = vld [vmem:[%s5057_s17 + $0xa8] sm:$0xff]  ;;  %v692_v41 = vpack.c.bf16 %v670_v38, %v669_v37  ;;  %v673_v43 = vld [vmem:[%s5057_s17 + $0xb0] sm:$0xff] }
 0x110   : > { %v693_v42 = vpack.c.bf16 %v672_v40, %v671_v39  ;;  %v674_v44 = vld [vmem:[%s5057_s17 + $0xb8] sm:$0xff]  ;;  %v675_v45 = vld [vmem:[%s5057_s17 + $0xc0] sm:$0xff]  ;;  %v676_v46 = vld [vmem:[%s5057_s17 + $0xc8] sm:$0xff]  ;;  %p4621_p5 = por %p4620_p6, %p4619_p0 }
 0x111   : > { %v694_v47 = vpack.c.bf16 %v674_v44, %v673_v43  ;;  %v695_v48 = vpack.c.bf16 %v676_v46, %v675_v45  ;;  %v677_v49 = vld [vmem:[%s5057_s17 + $0xd0] sm:$0xff]  ;;  %v678_v50 = vld [vmem:[%s5057_s17 + $0xd8] sm:$0xff]  ;;  %v679_v51 = vld [vmem:[%s5057_s17 + $0xe0] sm:$0xff] }
 0x112   : > { %4063 = vmatmul.mubr.msk.bf16.vlgmr.msra.gmra.mrb[0].mxu0 %vm712_vm2, %v684_v17  ;;  %v680_v52 = vld [vmem:[%s5057_s17 + $0xe8] sm:$0xff]  ;;  %v696_v53 = vpack.c.bf16 %v678_v50, %v677_v49  ;;  %v681_v55 = vld [vmem:[%s5057_s17 + $0xf0] sm:$0xff]  ;;  %v682_v56 = vld [vmem:[%s5057_s17 + $0xf8] sm:$0xff]  ;;  %s6763_s17 = sld [smem:[#allocation30_spill]] }
 0x113   : > { %4066 = vmatprep.mubr.msk.bf16.mxu0 %vm712_vm2, %v685_v18  ;;  %v697_v54 = vpack.c.bf16 %v680_v52, %v679_v51  ;;  %v698_v57 = vpack.c.bf16 %v682_v56, %v681_v55 }
 0x118   : > { %p6765_p11 = scmp.ne.s32.totalorder %s6763_s17, 0 }
 0x11a   : > { %4067 = vmatmul.mubr.msk.bf16.gmra.mrb[4].mxu0 %vm712_vm2, %v686_v23  ;;  %p4614_p13 = pnand %p4613_p8, %p6765_p11 }
 0x11b   : > { %4070 = vmatprep.mubr.msk.bf16.mxu0 %vm712_vm2, %v687_v24 }
 0x11c   : > { %p4615_p1 = pneg %p4614_p13 }
 0x11e   : > { %p4622_p9 = pnand %p4621_p5, %p4615_p1 }
 0x122   : > { %4071 = vmatmul.mubr.msk.bf16.gmra.mrb[8].mxu0 %vm712_vm2, %v688_v29 }
 0x123   : > { %4074 = vmatprep.mubr.msk.bf16.mxu0 %vm712_vm2, %v689_v30 }
 0x12a   : > { %4075 = vmatmul.mubr.msk.bf16.gmra.mrb[12].mxu0 %vm712_vm2, %v690_v35 }
 0x12b   : > { %4078 = vmatprep.mubr.msk.bf16.mxu0 %vm712_vm2, %v691_v36 }
 0x132   : > { %4079 = vmatmul.mubr.msk.bf16.gmra.mrb[16].mxu0 %vm712_vm2, %v692_v41 }
 0x133   : > { %4082 = vmatprep.mubr.msk.bf16.mxu0 %vm712_vm2, %v693_v42 }
 0x13a   : > { %4083 = vmatmul.mubr.msk.bf16.gmra.mrb[20].mxu0 %vm712_vm2, %v694_v47 }
 0x13b   : > { %4086 = vmatprep.mubr.msk.bf16.mxu0 %vm712_vm2, %v695_v48 }
 0x142   : > { %4087 = vmatmul.mubr.msk.bf16.gmra.mrb[24].mxu0 %vm712_vm2, %v696_v53 }
 0x143   : > { %4090 = vmatprep.mubr.msk.bf16.mxu0 %vm712_vm2, %v697_v54 }
 0x14a   : > { %4091 = vmatmul.mubr.msk.bf16.gmra.mrb[28].mxu0 %vm712_vm2, %v698_v57 }
 0x1e5   : > { %v4064_v1 = vpop.f32.mrb[0].mxu0 }
 0x1e6   : > { %v811_v2 = vadd.f32 %v4064_v1, %v5134_v0  ;;  %v802_v3 = vpop.f32.mrb[1].mxu0 }
 0x1e7   : > { %v803_v4 = vadd.f32 %v5134_v0, %v802_v3  ;;  %v4065_v5 = vpop.f32.mrb[2].mxu0 }
 0x1e8   : > { %v931_v6 = vadd.f32 3.0, %v811_v2  ;;  %v814_v7 = vadd.f32 %v4065_v5, %v5134_v0  ;;  %v805_v8 = vpop.f32.mrb[3].mxu0 }
 0x1e9   : > { %v929_v9 = vadd.f32 3.0, %v803_v4  ;;  %v806_v10 = vadd.f32 %v5134_v0, %v805_v8 }
 0x1ea   : > { %v963_v11 = vmax.f32 %v931_v6, 0.0  ;;  %v932_v12 = vadd.f32 3.0, %v814_v7 }
 0x1eb   : > { %v961_v13 = vmax.f32 %v929_v9, 0.0  ;;  %v930_v14 = vadd.f32 3.0, %v806_v10 }
 0x1ec   : > { %v995_v15 = vmin.f32 %v963_v11, 6.0  ;;  %v964_v16 = vmax.f32 %v932_v12, 0.0 }
 0x1ed   : > { %v993_v17 = vmin.f32 %v961_v13, 6.0  ;;  %v962_v18 = vmax.f32 %v930_v14, 0.0  ;;  %v4068_v19 = vpop.f32.mrb[4].mxu0 }
 0x1ee   : > { %v1027_v20 = vmul.f32 %v995_v15, %v811_v2  ;;  %v996_v21 = vmin.f32 %v964_v16, 6.0  ;;  %v827_v22 = vadd.f32 %v4068_v19, %v5134_v0  ;;  %v818_v23 = vpop.f32.mrb[5].mxu0 }
 0x1ef   : > { %v1025_v24 = vmul.f32 %v993_v17, %v803_v4  ;;  %v994_v25 = vmin.f32 %v962_v18, 6.0  ;;  %v819_v26 = vadd.f32 %v5134_v0, %v818_v23  ;;  %v4069_v27 = vpop.f32.mrb[6].mxu0 }
 0x1f0   : > { %v1028_v28 = vmul.f32 %v996_v21, %v814_v7  ;;  %v935_v29 = vadd.f32 3.0, %v827_v22  ;;  %v830_v30 = vadd.f32 %v4069_v27, %v5134_v0  ;;  %v821_v31 = vpop.f32.mrb[7].mxu0  ;;  %v1059_v35 = vmul.f32 0.16666667, %v1027_v20 }
 0x1f1   : > { %v1026_v32 = vmul.f32 %v994_v25, %v806_v10  ;;  %v933_v33 = vadd.f32 3.0, %v819_v26  ;;  %v822_v34 = vadd.f32 %v5134_v0, %v821_v31  ;;  %v1057_v39 = vmul.f32 0.16666667, %v1025_v24 }
 0x1f2   : > { %v1060_v36 = vmul.f32 0.16666667, %v1028_v28  ;;  %v967_v37 = vmax.f32 %v935_v29, 0.0  ;;  %v936_v38 = vadd.f32 3.0, %v830_v30 }
 0x1f3   : > { %v1058_v40 = vmul.f32 0.16666667, %v1026_v32  ;;  %v965_v41 = vmax.f32 %v933_v33, 0.0  ;;  %v934_v42 = vadd.f32 3.0, %v822_v34 }
 0x1f4   : > { %v1090_v43 = vpack.c.bf16 %v1060_v36, %v1059_v35  ;;  %v999_v44 = vmin.f32 %v967_v37, 6.0  ;;  %v968_v45 = vmax.f32 %v936_v38, 0.0 }
 0x1f5   : > { %v997_v46 = vmin.f32 %v965_v41, 6.0  ;;  %v966_v47 = vmax.f32 %v934_v42, 0.0  ;;  %v4072_v48 = vpop.f32.mrb[8].mxu0  ;;  %v1089_v49 = vpack.c.bf16 %v1058_v40, %v1057_v39 }
 0x1f6   : > { %v1031_v50 = vmul.f32 %v999_v44, %v827_v22  ;;  %v1000_v51 = vmin.f32 %v968_v45, 6.0  ;;  %v843_v52 = vadd.f32 %v4072_v48, %v5134_v0  ;;  %v834_v53 = vpop.f32.mrb[9].mxu0 }
 0x1f7   : > { %v1029_v54 = vmul.f32 %v997_v46, %v819_v26  ;;  %v998_v55 = vmin.f32 %v966_v47, 6.0  ;;  %v835_v56 = vadd.f32 %v5134_v0, %v834_v53  ;;  %v4073_v57 = vpop.f32.mrb[10].mxu0  ;;  %4096 = vmatprep.mubr.msk.bf16.mxu1 %vm1115_vm3, %v1089_v49 }
 0x1f8   : > { %v1032_v58 = vmul.f32 %v1000_v51, %v830_v30  ;;  %v939_v59 = vadd.f32 3.0, %v843_v52  ;;  %v846_v60 = vadd.f32 %v4073_v57, %v5134_v0  ;;  %v837_v61 = vpop.f32.mrb[11].mxu0  ;;  %4097 = vmatmul.mubr.msk.bf16.vlgmr.msra.gmra.mrb[0].mxu1 %vm1115_vm3, %v1090_v43  ;;  %v1063_v3 = vmul.f32 0.16666667, %v1031_v50 }
 0x1f9   : > { %v1030_v62 = vmul.f32 %v998_v55, %v822_v34  ;;  %v937_v1 = vadd.f32 3.0, %v835_v56  ;;  %v838_v2 = vadd.f32 %v5134_v0, %v837_v61  ;;  %4129 = vmatpush3.bf16.msra.mxu1 %v5131_v63  ;;  %v1061_v7 = vmul.f32 0.16666667, %v1029_v54 }
 0x1fa   : > { %v1064_v4 = vmul.f32 0.16666667, %v1032_v58  ;;  %v971_v5 = vmax.f32 %v939_v59, 0.0  ;;  %v940_v6 = vadd.f32 3.0, %v846_v60 }
 0x1fb   : > { %v1062_v8 = vmul.f32 0.16666667, %v1030_v62  ;;  %v969_v9 = vmax.f32 %v937_v1, 0.0  ;;  %v938_v10 = vadd.f32 3.0, %v838_v2 }
 0x1fc   : > { %v1092_v11 = vpack.c.bf16 %v1064_v4, %v1063_v3  ;;  %v1003_v12 = vmin.f32 %v971_v5, 6.0  ;;  %v972_v13 = vmax.f32 %v940_v6, 0.0 }
 0x1fd   : > { %v1091_v14 = vpack.c.bf16 %v1062_v8, %v1061_v7  ;;  %v1001_v15 = vmin.f32 %v969_v9, 6.0  ;;  %v970_v16 = vmax.f32 %v938_v10, 0.0  ;;  %v4076_v17 = vpop.f32.mrb[12].mxu0 }
 0x1fe   : > { %v1035_v18 = vmul.f32 %v1003_v12, %v843_v52  ;;  %v1004_v19 = vmin.f32 %v972_v13, 6.0  ;;  %v859_v20 = vadd.f32 %v4076_v17, %v5134_v0  ;;  %v850_v63 = vpop.f32.mrb[13].mxu0 }
 0x1ff   : > { %v1033_v21 = vmul.f32 %v1001_v15, %v835_v56  ;;  %v1002_v22 = vmin.f32 %v970_v16, 6.0  ;;  %v851_v23 = vadd.f32 %v5134_v0, %v850_v63  ;;  %v4077_v24 = vpop.f32.mrb[14].mxu0  ;;  %4100 = vmatprep.mubr.msk.bf16.mxu1 %vm1115_vm3, %v1091_v14 }
 0x200   : > { %v1036_v25 = vmul.f32 %v1004_v19, %v846_v60  ;;  %v943_v26 = vadd.f32 3.0, %v859_v20  ;;  %v862_v27 = vadd.f32 %v4077_v24, %v5134_v0  ;;  %v853_v28 = vpop.f32.mrb[15].mxu0  ;;  %4101 = vmatmul.mubr.msk.bf16.gmra.mrb[4].mxu1 %vm1115_vm3, %v1092_v11  ;;  %v1067_v32 = vmul.f32 0.16666667, %v1035_v18 }
 0x201   : > { %v1034_v29 = vmul.f32 %v1002_v22, %v838_v2  ;;  %v941_v30 = vadd.f32 3.0, %v851_v23  ;;  %v854_v31 = vadd.f32 %v5134_v0, %v853_v28  ;;  %v1065_v36 = vmul.f32 0.16666667, %v1033_v21 }
 0x202   : > { %v1068_v33 = vmul.f32 0.16666667, %v1036_v25  ;;  %v975_v34 = vmax.f32 %v943_v26, 0.0  ;;  %v944_v35 = vadd.f32 3.0, %v862_v27 }
 0x203   : > { %v1066_v37 = vmul.f32 0.16666667, %v1034_v29  ;;  %v973_v38 = vmax.f32 %v941_v30, 0.0  ;;  %v942_v39 = vadd.f32 3.0, %v854_v31 }
 0x204   : > { %v1094_v40 = vpack.c.bf16 %v1068_v33, %v1067_v32  ;;  %v1007_v41 = vmin.f32 %v975_v34, 6.0  ;;  %v976_v42 = vmax.f32 %v944_v35, 0.0 }
 0x205   : > { %v1093_v43 = vpack.c.bf16 %v1066_v37, %v1065_v36  ;;  %v1005_v44 = vmin.f32 %v973_v38, 6.0  ;;  %v974_v45 = vmax.f32 %v942_v39, 0.0  ;;  %v4080_v46 = vpop.f32.mrb[16].mxu0 }
 0x206   : > { %v1039_v47 = vmul.f32 %v1007_v41, %v859_v20  ;;  %v1008_v48 = vmin.f32 %v976_v42, 6.0  ;;  %v875_v49 = vadd.f32 %v4080_v46, %v5134_v0  ;;  %v866_v50 = vpop.f32.mrb[17].mxu0 }
 0x207   : > { %v1037_v51 = vmul.f32 %v1005_v44, %v851_v23  ;;  %v1006_v52 = vmin.f32 %v974_v45, 6.0  ;;  %v867_v53 = vadd.f32 %v5134_v0, %v866_v50  ;;  %v4081_v54 = vpop.f32.mrb[18].mxu0  ;;  %4104 = vmatprep.mubr.msk.bf16.mxu1 %vm1115_vm3, %v1093_v43 }
 0x208   : > { %v1040_v55 = vmul.f32 %v1008_v48, %v862_v27  ;;  %v947_v56 = vadd.f32 3.0, %v875_v49  ;;  %v878_v57 = vadd.f32 %v4081_v54, %v5134_v0  ;;  %v869_v58 = vpop.f32.mrb[19].mxu0  ;;  %4105 = vmatmul.mubr.msk.bf16.gmra.mrb[8].mxu1 %vm1115_vm3, %v1094_v40  ;;  %v1071_v62 = vmul.f32 0.16666667, %v1039_v47 }
 0x209   : > { %v1038_v59 = vmul.f32 %v1006_v52, %v854_v31  ;;  %v945_v60 = vadd.f32 3.0, %v867_v53  ;;  %v870_v61 = vadd.f32 %v5134_v0, %v869_v58  ;;  %v1069_v4 = vmul.f32 0.16666667, %v1037_v51 }
 0x20a   : > { %v1072_v1 = vmul.f32 0.16666667, %v1040_v55  ;;  %v979_v2 = vmax.f32 %v947_v56, 0.0  ;;  %v948_v3 = vadd.f32 3.0, %v878_v57 }
 0x20b   : > { %v1070_v5 = vmul.f32 0.16666667, %v1038_v59  ;;  %v977_v6 = vmax.f32 %v945_v60, 0.0  ;;  %v946_v7 = vadd.f32 3.0, %v870_v61 }
 0x20c   : > { %v1096_v8 = vpack.c.bf16 %v1072_v1, %v1071_v62  ;;  %v1011_v9 = vmin.f32 %v979_v2, 6.0  ;;  %v980_v10 = vmax.f32 %v948_v3, 0.0 }
 0x20d   : > { %v1095_v11 = vpack.c.bf16 %v1070_v5, %v1069_v4  ;;  %v1009_v12 = vmin.f32 %v977_v6, 6.0  ;;  %v978_v13 = vmax.f32 %v946_v7, 0.0  ;;  %v4084_v14 = vpop.f32.mrb[20].mxu0 }
 0x20e   : > { %v1043_v15 = vmul.f32 %v1011_v9, %v875_v49  ;;  %v1012_v16 = vmin.f32 %v980_v10, 6.0  ;;  %v891_v17 = vadd.f32 %v4084_v14, %v5134_v0  ;;  %v882_v18 = vpop.f32.mrb[21].mxu0 }
 0x20f   : > { %v1041_v19 = vmul.f32 %v1009_v12, %v867_v53  ;;  %v1010_v20 = vmin.f32 %v978_v13, 6.0  ;;  %v883_v63 = vadd.f32 %v5134_v0, %v882_v18  ;;  %v4085_v21 = vpop.f32.mrb[22].mxu0  ;;  %4108 = vmatprep.mubr.msk.bf16.mxu1 %vm1115_vm3, %v1095_v11 }
 0x210   : > { %v1044_v22 = vmul.f32 %v1012_v16, %v878_v57  ;;  %v951_v23 = vadd.f32 3.0, %v891_v17  ;;  %v894_v24 = vadd.f32 %v4085_v21, %v5134_v0  ;;  %v885_v25 = vpop.f32.mrb[23].mxu0  ;;  %4109 = vmatmul.mubr.msk.bf16.gmra.mrb[12].mxu1 %vm1115_vm3, %v1096_v8  ;;  %v1075_v29 = vmul.f32 0.16666667, %v1043_v15 }
 0x211   : > { %v1042_v26 = vmul.f32 %v1010_v20, %v870_v61  ;;  %v949_v27 = vadd.f32 3.0, %v883_v63  ;;  %v886_v28 = vadd.f32 %v5134_v0, %v885_v25  ;;  %v1073_v33 = vmul.f32 0.16666667, %v1041_v19 }
 0x212   : > { %v1076_v30 = vmul.f32 0.16666667, %v1044_v22  ;;  %v983_v31 = vmax.f32 %v951_v23, 0.0  ;;  %v952_v32 = vadd.f32 3.0, %v894_v24 }
 0x213   : > { %v1074_v34 = vmul.f32 0.16666667, %v1042_v26  ;;  %v981_v35 = vmax.f32 %v949_v27, 0.0  ;;  %v950_v36 = vadd.f32 3.0, %v886_v28 }
 0x214   : > { %v1098_v37 = vpack.c.bf16 %v1076_v30, %v1075_v29  ;;  %v1015_v38 = vmin.f32 %v983_v31, 6.0  ;;  %v984_v39 = vmax.f32 %v952_v32, 0.0 }
 0x215   : > { %v1097_v40 = vpack.c.bf16 %v1074_v34, %v1073_v33  ;;  %v1013_v41 = vmin.f32 %v981_v35, 6.0  ;;  %v982_v42 = vmax.f32 %v950_v36, 0.0  ;;  %v4088_v43 = vpop.f32.mrb[24].mxu0 }
 0x216   : > { %v1047_v44 = vmul.f32 %v1015_v38, %v891_v17  ;;  %v1016_v45 = vmin.f32 %v984_v39, 6.0  ;;  %v907_v46 = vadd.f32 %v4088_v43, %v5134_v0  ;;  %v898_v47 = vpop.f32.mrb[25].mxu0 }
 0x217   : > { %v1045_v48 = vmul.f32 %v1013_v41, %v883_v63  ;;  %v1014_v49 = vmin.f32 %v982_v42, 6.0  ;;  %v899_v50 = vadd.f32 %v5134_v0, %v898_v47  ;;  %v4089_v51 = vpop.f32.mrb[26].mxu0  ;;  %4112 = vmatprep.mubr.msk.bf16.mxu1 %vm1115_vm3, %v1097_v40 }
 0x218   : > { %v1048_v52 = vmul.f32 %v1016_v45, %v894_v24  ;;  %v955_v53 = vadd.f32 3.0, %v907_v46  ;;  %v910_v54 = vadd.f32 %v4089_v51, %v5134_v0  ;;  %v901_v55 = vpop.f32.mrb[27].mxu0  ;;  %4113 = vmatmul.mubr.msk.bf16.gmra.mrb[16].mxu1 %vm1115_vm3, %v1098_v37  ;;  %v1079_v59 = vmul.f32 0.16666667, %v1047_v44 }
 0x219   : > { %v1046_v56 = vmul.f32 %v1014_v49, %v886_v28  ;;  %v953_v57 = vadd.f32 3.0, %v899_v50  ;;  %v902_v58 = vadd.f32 %v5134_v0, %v901_v55  ;;  %v1077_v1 = vmul.f32 0.16666667, %v1045_v48  ;;  %v2746_v55 = vld [vmem:[%s6700_s7 + $0x20] sm:$0xff] }
 0x21a   : > { %v1080_v60 = vmul.f32 0.16666667, %v1048_v52  ;;  %v987_v61 = vmax.f32 %v955_v53, 0.0  ;;  %v956_v62 = vadd.f32 3.0, %v910_v54  ;;  %v4707_v51 = vmov 0.0   ;;  %v2744_v52 = vld [vmem:[%s6700_s7 + $0x10] sm:$0xff] }
 0x21b   : > { %v1078_v2 = vmul.f32 0.16666667, %v1046_v56  ;;  %v985_v3 = vmax.f32 %v953_v57, 0.0  ;;  %v954_v4 = vadd.f32 3.0, %v902_v58  ;;  %1495 = vst.msk [vmem:[#allocation2 + $0x48] sm:$0xff] %vm1485_vm4, %v4707_v51  ;;  %1486 = vst.msk [vmem:[#allocation2] sm:$0xff] %vm1485_vm4, %v4707_v51 }
 0x21c   : > { %v1100_v5 = vpack.c.bf16 %v1080_v60, %v1079_v59  ;;  %v1019_v6 = vmin.f32 %v987_v61, 6.0  ;;  %v988_v7 = vmax.f32 %v956_v62, 0.0  ;;  %1487 = vst.msk [vmem:[#allocation2 + $0x8] sm:$0xff] %vm1485_vm4, %v4707_v51  ;;  %1488 = vst.msk [vmem:[#allocation2 + $0x10] sm:$0xff] %vm1485_vm4, %v4707_v51  ;;  %v2745_v53 = vld [vmem:[%s6700_s7 + $0x18] sm:$0xff]  ;;  %v2747_v56 = vld [vmem:[%s6700_s7 + $0x28] sm:$0xff] }
 0x21d   : > { %v1099_v8 = vpack.c.bf16 %v1078_v2, %v1077_v1  ;;  %v1017_v9 = vmin.f32 %v985_v3, 6.0  ;;  %v986_v10 = vmax.f32 %v954_v4, 0.0  ;;  %v4092_v11 = vpop.f32.mrb[28].mxu0  ;;  %1489 = vst.msk [vmem:[#allocation2 + $0x18] sm:$0xff] %vm1485_vm4, %v4707_v51  ;;  %1490 = vst.msk [vmem:[#allocation2 + $0x20] sm:$0xff] %vm1485_vm4, %v4707_v51  ;;  %v2752_v57 = vpack.c.bf16 %v2747_v56, %v2746_v55  ;;  %v2749_v59 = vld [vmem:[%s6700_s7 + $0x38] sm:$0xff] }
 0x21e   : > { %v1051_v12 = vmul.f32 %v1019_v6, %v907_v46  ;;  %v1020_v13 = vmin.f32 %v988_v7, 6.0  ;;  %v923_v14 = vadd.f32 %v4092_v11, %v5134_v0  ;;  %v914_v15 = vpop.f32.mrb[29].mxu0  ;;  %1491 = vst.msk [vmem:[#allocation2 + $0x28] sm:$0xff] %vm1485_vm4, %v4707_v51  ;;  %1492 = vst.msk [vmem:[#allocation2 + $0x30] sm:$0xff] %vm1485_vm4, %v4707_v51  ;;  %v5348_v61 = vld [vmem:[#allocation6] ss:$0 sm:$0xff] }
 0x21f   : > { %v1049_v16 = vmul.f32 %v1017_v9, %v899_v50  ;;  %v1018_v17 = vmin.f32 %v986_v10, 6.0  ;;  %v915_v18 = vadd.f32 %v5134_v0, %v914_v15  ;;  %v4093_v19 = vpop.f32.mrb[30].mxu0  ;;  %4116 = vmatprep.mubr.msk.bf16.mxu1 %vm1115_vm3, %v1099_v8  ;;  %1493 = vst.msk [vmem:[#allocation2 + $0x38] sm:$0xff] %vm1485_vm4, %v4707_v51  ;;  %1494 = vst.msk [vmem:[#allocation2 + $0x40] sm:$0xff] %vm1485_vm4, %v4707_v51  ;;  %v5352_v6 = vld [vmem:[#allocation8] ss:$0 sm:$0xff] }
 0x220   : > { %v1052_v20 = vmul.f32 %v1020_v13, %v910_v54  ;;  %v959_v63 = vadd.f32 3.0, %v923_v14  ;;  %v926_v21 = vadd.f32 %v4093_v19, %v5134_v0  ;;  %v917_v22 = vpop.f32.mrb[31].mxu0  ;;  %4117 = vmatmul.mubr.msk.bf16.gmra.mrb[20].mxu1 %vm1115_vm3, %v1100_v5  ;;  %v1083_v26 = vmul.f32 0.16666667, %v1051_v12  ;;  %1496 = vst.msk [vmem:[#allocation2 + $0x50] sm:$0xff] %vm1485_vm4, %v4707_v51  ;;  %1497 = vst.msk [vmem:[#allocation2 + $0x58] sm:$0xff] %vm1485_vm4, %v4707_v51 }
 0x221   : > { %v1050_v23 = vmul.f32 %v1018_v17, %v902_v58  ;;  %v957_v24 = vadd.f32 3.0, %v915_v18  ;;  %v918_v25 = vadd.f32 %v5134_v0, %v917_v22  ;;  %v1081_v30 = vmul.f32 0.16666667, %v1049_v16  ;;  %1498 = vst.msk [vmem:[#allocation2 + $0x60] sm:$0xff] %vm1485_vm4, %v4707_v51  ;;  %1499 = vst.msk [vmem:[#allocation2 + $0x68] sm:$0xff] %vm1485_vm4, %v4707_v51  ;;  %v2748_v58 = vld [vmem:[%s6700_s7 + $0x30] sm:$0xff] }
 0x222   : > { %v1084_v27 = vmul.f32 0.16666667, %v1052_v20  ;;  %v991_v28 = vmax.f32 %v959_v63, 0.0  ;;  %v960_v29 = vadd.f32 3.0, %v926_v21  ;;  %1500 = vst.msk [vmem:[#allocation2 + $0x70] sm:$0xff] %vm1485_vm4, %v4707_v51  ;;  %1501 = vst.msk [vmem:[#allocation2 + $0x78] sm:$0xff] %vm1485_vm4, %v4707_v51  ;;  %v2751_v54 = vpack.c.bf16 %v2745_v53, %v2744_v52 }
 0x223   : > { %v1082_v31 = vmul.f32 0.16666667, %v1050_v23  ;;  %v989_v32 = vmax.f32 %v957_v24, 0.0  ;;  %v958_v33 = vadd.f32 3.0, %v918_v25  ;;  %1502 = vst.msk [vmem:[#allocation2 + $0x80] sm:$0xff] %vm1485_vm4, %v4707_v51  ;;  %1503 = vst.msk [vmem:[#allocation2 + $0x88] sm:$0xff] %vm1485_vm4, %v4707_v51  ;;  %v2753_v60 = vpack.c.bf16 %v2749_v59, %v2748_v58 }
 0x224   : > { %v1102_v34 = vpack.c.bf16 %v1084_v27, %v1083_v26  ;;  %v1023_v35 = vmin.f32 %v991_v28, 6.0  ;;  %v992_v36 = vmax.f32 %v960_v29, 0.0  ;;  %1504 = vst.msk [vmem:[#allocation2 + $0x90] sm:$0xff] %vm1485_vm4, %v4707_v51  ;;  %1505 = vst.msk [vmem:[#allocation2 + $0x98] sm:$0xff] %vm1485_vm4, %v4707_v51  ;;  %4130 = vmatprep.subr.bf16.mxu1 %v2751_v54  ;;  %v1591_v3 = vld [vmem:[#allocation2 + $0x7] sm:$0xff]  ;;  %v1592_v16 = vld [vmem:[#allocation2 + $0xf] sm:$0xff] }
 0x225   : > { %v1101_v37 = vpack.c.bf16 %v1082_v31, %v1081_v30  ;;  %v1021_v38 = vmin.f32 %v989_v32, 6.0  ;;  %v990_v39 = vmax.f32 %v958_v33, 0.0  ;;  %1506 = vst.msk [vmem:[#allocation2 + $0xa0] sm:$0xff] %vm1485_vm4, %v4707_v51  ;;  %1507 = vst.msk [vmem:[#allocation2 + $0xa8] sm:$0xff] %vm1485_vm4, %v4707_v51  ;;  %4131 = vmatpush3.bf16.msra.mxu1 %v2751_v54  ;;  %v1694_v7 = vld [vmem:[#allocation2 + $0x8] sm:$0xff]  ;;  %v1630_v17 = vmul.f32 %v5352_v6, %v1591_v3 }
 0x226   : > { %v1055_v40 = vmul.f32 %v1023_v35, %v923_v14  ;;  %v1024_v41 = vmin.f32 %v992_v36, 6.0  ;;  %1508 = vst.msk [vmem:[#allocation2 + $0xb0] sm:$0xff] %vm1485_vm4, %v4707_v51  ;;  %1509 = vst.msk [vmem:[#allocation2 + $0xb8] sm:$0xff] %vm1485_vm4, %v4707_v51  ;;  %4132 = vmatprep.subr.bf16.mxu1 %v2752_v57  ;;  %v5354_v8 = vld [vmem:[#allocation8 + $0x1] ss:$0 sm:$0xff]  ;;  %v1798_v23 = vld [vmem:[#allocation2 + $0x9] sm:$0xff]  ;;  %v1631_v28 = vmul.f32 %v5352_v6, %v1592_v16 }
 0x227   : > { %v1053_v42 = vmul.f32 %v1021_v38, %v915_v18  ;;  %v1022_v43 = vmin.f32 %v990_v39, 6.0  ;;  %4120 = vmatprep.mubr.msk.bf16.mxu1 %vm1115_vm3, %v1101_v37  ;;  %1510 = vst.msk [vmem:[#allocation2 + $0xc0] sm:$0xff] %vm1485_vm4, %v4707_v51  ;;  %1511 = vst.msk [vmem:[#allocation2 + $0xc8] sm:$0xff] %vm1485_vm4, %v4707_v51  ;;  %v1695_v18 = vld [vmem:[#allocation2 + $0x10] sm:$0xff]  ;;  %v1734_v19 = vmul.f32 %v5354_v8, %v1694_v7  ;;  %v5360_v24 = vld [vmem:[#allocation8 + $0x2] ss:$0 sm:$0xff] }
 0x228   : > { %v1056_v0 = vmul.f32 %v1024_v41, %v926_v21  ;;  %4121 = vmatmul.mubr.msk.bf16.gmra.mrb[24].mxu1 %vm1115_vm3, %v1102_v34  ;;  %v1087_v45 = vmul.f32 0.16666667, %v1055_v40  ;;  %1512 = vst.msk [vmem:[#allocation2 + $0xd0] sm:$0xff] %vm1485_vm4, %v4707_v51  ;;  %1513 = vst.msk [vmem:[#allocation2 + $0xd8] sm:$0xff] %vm1485_vm4, %v4707_v51  ;;  %v1735_v29 = vmul.f32 %v5354_v8, %v1695_v18 }
 0x229   : > { %v1054_v44 = vmul.f32 %v1022_v43, %v918_v25  ;;  %v1085_v47 = vmul.f32 0.16666667, %v1053_v42  ;;  %1514 = vst.msk [vmem:[#allocation2 + $0xe0] sm:$0xff] %vm1485_vm4, %v4707_v51  ;;  %1515 = vst.msk [vmem:[#allocation2 + $0xe8] sm:$0xff] %vm1485_vm4, %v4707_v51  ;;  %4133 = vmatpush3.bf16.msra.mxu1 %v2752_v57  ;;  %v1766_v34 = vadd.f32 %v1734_v19, %v1630_v17 }
 0x22a   : > { %v1088_v46 = vmul.f32 0.16666667, %v1056_v0  ;;  %1516 = vst.msk [vmem:[#allocation2 + $0xf0] sm:$0xff] %vm1485_vm4, %v4707_v51  ;;  %1517 = vst.msk [vmem:[#allocation2 + $0xf8] sm:$0xff] %vm1485_vm4, %v4707_v51  ;;  %4134 = vmatprep.subr.bf16.mxu1 %v2753_v60  ;;  %v1838_v39 = vmul.f32 %v5360_v24, %v1798_v23  ;;  %v1767_v53 = vadd.f32 %v1735_v29, %v1631_v28 }
 0x22b   : > { %v1086_v48 = vmul.f32 0.16666667, %v1054_v44  ;;  %1518 = vst.msk [vmem:[#allocation2 + $0x100] sm:$0xff] %vm1485_vm4, %v4707_v51  ;;  %1519 = vst.msk [vmem:[#allocation2 + $0x108] sm:$0xff] %vm1485_vm4, %v4707_v51  ;;  %v1799_v44 = vld [vmem:[#allocation2 + $0x11] sm:$0xff] }
 0x22c   : > { %v1104_v49 = vpack.c.bf16 %v1088_v46, %v1087_v45  ;;  %1520 = vst.msk [vmem:[#allocation2 + $0x110] sm:$0xff] %vm1485_vm4, %v4707_v51  ;;  %1521 = vst.msk [vmem:[#allocation2 + $0x118] sm:$0xff] %vm1485_vm4, %v4707_v51  ;;  %v1839_v57 = vmul.f32 %v5360_v24, %v1799_v44  ;;  %v1870_v7 = vadd.f32 %v1838_v39, %v1766_v34 }
 0x22d   : > { %v1103_v50 = vpack.c.bf16 %v1086_v48, %v1085_v47  ;;  %1522 = vst.msk [vmem:[#allocation2 + $0x120] sm:$0xff] %vm1485_vm4, %v4707_v51  ;;  %1523 = vst.msk [vmem:[#allocation2 + $0x128] sm:$0xff] %vm1485_vm4, %v4707_v51  ;;  %4135 = vmatpush3.bf16.msra.mxu1 %v2753_v60 }
 0x22e   : > { %1524 = vst.msk [vmem:[#allocation2 + $0x130] sm:$0xff] %vm1485_vm4, %v4707_v51  ;;  %1525 = vst.msk [vmem:[#allocation2 + $0x138] sm:$0xff] %vm1485_vm4, %v4707_v51  ;;  %4204 = vmatprep.subr.bf16.mxu1 %v4707_v51 }
 0x22f   : > { %4124 = vmatprep.mubr.msk.bf16.mxu1 %vm1115_vm3, %v1103_v50  ;;  %1526 = vst.msk [vmem:[#allocation2 + $0x140] sm:$0xff] %vm1485_vm4, %v4707_v51  ;;  %1527 = vst.msk [vmem:[#allocation2 + $0x148] sm:$0xff] %vm1485_vm4, %v4707_v51 }
 0x230   : > { %4125 = vmatmul.mubr.msk.bf16.gmra.mrb[28].mxu1 %vm1115_vm3, %v1104_v49  ;;  %1528 = vst.msk [vmem:[#allocation2 + $0x150] sm:$0xff] %vm1485_vm4, %v4707_v51  ;;  %1529 = vst.msk [vmem:[#allocation2 + $0x158] sm:$0xff] %vm1485_vm4, %v4707_v51 }
 0x231   : > { %1530 = vst.msk [vmem:[#allocation2 + $0x160] sm:$0xff] %vm1485_vm4, %v4707_v51  ;;  %1531 = vst.msk [vmem:[#allocation2 + $0x168] sm:$0xff] %vm1485_vm4, %v4707_v51 }
 0x232   : > { %1532 = vst.msk [vmem:[#allocation2 + $0x170] sm:$0xff] %vm1485_vm4, %v4707_v51  ;;  %1533 = vst.msk [vmem:[#allocation2 + $0x178] sm:$0xff] %vm1485_vm4, %v4707_v51 }
 0x233   : > { %1534 = vst.msk [vmem:[#allocation2 + $0x180] sm:$0xff] %vm1485_vm4, %v4707_v51  ;;  %1535 = vst.msk [vmem:[#allocation2 + $0x188] sm:$0xff] %vm1485_vm4, %v4707_v51 }
 0x234   : > { %1536 = vst.msk [vmem:[#allocation2 + $0x190] sm:$0xff] %vm1485_vm4, %v4707_v51  ;;  %1537 = vst.msk [vmem:[#allocation2 + $0x198] sm:$0xff] %vm1485_vm4, %v4707_v51 }
 0x235   : > { %1538 = vst.msk [vmem:[#allocation2 + $0x1a0] sm:$0xff] %vm1485_vm4, %v4707_v51  ;;  %1539 = vst.msk [vmem:[#allocation2 + $0x1a8] sm:$0xff] %vm1485_vm4, %v4707_v51 }
 0x236   : > { %1540 = vst.msk [vmem:[#allocation2 + $0x1b0] sm:$0xff] %vm1485_vm4, %v4707_v51  ;;  %1541 = vst.msk [vmem:[#allocation2 + $0x1b8] sm:$0xff] %vm1485_vm4, %v4707_v51 }
 0x237   : > { %1542 = vst.msk [vmem:[#allocation2 + $0x1c0] sm:$0xff] %vm1485_vm4, %v4707_v51  ;;  %1543 = vst.msk [vmem:[#allocation2 + $0x1c8] sm:$0xff] %vm1485_vm4, %v4707_v51 }
 0x238   : > { %1544 = vst.msk [vmem:[#allocation2 + $0x1d0] sm:$0xff] %vm1485_vm4, %v4707_v51  ;;  %1545 = vst.msk [vmem:[#allocation2 + $0x1d8] sm:$0xff] %vm1485_vm4, %v4707_v51 }
 0x239   : > { %1546 = vst.msk [vmem:[#allocation2 + $0x1e0] sm:$0xff] %vm1485_vm4, %v4707_v51  ;;  %1547 = vst.msk [vmem:[#allocation2 + $0x1e8] sm:$0xff] %vm1485_vm4, %v4707_v51 }
 0x23a   : > { %1548 = vst.msk [vmem:[#allocation2 + $0x1f0] sm:$0xff] %vm1485_vm4, %v4707_v51  ;;  %1549 = vst.msk [vmem:[#allocation2 + $0x1f8] sm:$0xff] %vm1485_vm4, %v4707_v51 }
 0x23b   : > { %1550 = vst.msk [vmem:[#allocation2 + $0x200] sm:$0xff] %vm1485_vm4, %v4707_v51  ;;  %1551 = vst.msk [vmem:[#allocation2 + $0x208] sm:$0xff] %vm1485_vm4, %v4707_v51 }
 0x23c   : > { %1552 = vst.msk [vmem:[#allocation2 + $0x210] sm:$0xff] %vm1485_vm4, %v4707_v51  ;;  %1553 = vst.msk [vmem:[#allocation2 + $0x218] sm:$0xff] %vm1485_vm4, %v4707_v51 }
 0x23d   : > { %1554 = vst.msk [vmem:[#allocation2 + $0x220] sm:$0xff] %vm1485_vm4, %v4707_v51  ;;  %1555 = vst.msk [vmem:[#allocation2 + $0x228] sm:$0xff] %vm1485_vm4, %v4707_v51 }
 0x23e   : > { %1556 = vst.msk [vmem:[#allocation2 + $0x230] sm:$0xff] %vm1485_vm4, %v4707_v51  ;;  %1557 = vst.msk [vmem:[#allocation2 + $0x238] sm:$0xff] %vm1485_vm4, %v4707_v51 }
 0x2cb   : > { %v4098_v62 = vpop.f32.mrb[0].mxu1 }
 0x2cc   : > { %v1207_v1 = vadd.f32 %v4098_v62, %v5348_v61  ;;  %v1198_v2 = vpop.f32.mrb[1].mxu1 }
 0x2cd   : > { %v1199_v4 = vadd.f32 %v5348_v61, %v1198_v2  ;;  %v4099_v5 = vpop.f32.mrb[2].mxu1 }
 0x2ce   : > { %v1327_v9 = vadd.f32 3.0, %v1207_v1  ;;  %v1210_v10 = vadd.f32 %v4099_v5, %v5348_v61  ;;  %v1201_v11 = vpop.f32.mrb[3].mxu1 }
 0x2cf   : > { %v1325_v12 = vadd.f32 3.0, %v1199_v4  ;;  %v1202_v13 = vadd.f32 %v5348_v61, %v1201_v11 }
 0x2d0   : > { %v1359_v14 = vmax.f32 %v1327_v9, 0.0  ;;  %v1328_v15 = vadd.f32 3.0, %v1210_v10 }
 0x2d1   : > { %v1357_v20 = vmax.f32 %v1325_v12, 0.0  ;;  %v1326_v63 = vadd.f32 3.0, %v1202_v13 }
 0x2d2   : > { %v1391_v21 = vmin.f32 %v1359_v14, 6.0  ;;  %v1360_v22 = vmax.f32 %v1328_v15, 0.0  ;;  %v5376_v14 = vld [vmem:[#allocation8 + $0x6] ss:$0 sm:$0xff] }
 0x2d3   : > { %v1389_v25 = vmin.f32 %v1357_v20, 6.0  ;;  %v1358_v26 = vmax.f32 %v1326_v63, 0.0  ;;  %v4102_v27 = vpop.f32.mrb[4].mxu1  ;;  %v5379_v20 = vld [vmem:[#allocation8 + $0x3] ss:$0 sm:$0xff] }
 0x2d4   : > { %v1423_v30 = vmul.f32 %v1391_v21, %v1207_v1  ;;  %v1392_v31 = vmin.f32 %v1360_v22, 6.0  ;;  %v1223_v32 = vadd.f32 %v4102_v27, %v5348_v61  ;;  %v1214_v33 = vpop.f32.mrb[5].mxu1 }
 0x2d5   : > { %v1421_v35 = vmul.f32 %v1389_v25, %v1199_v4  ;;  %v1390_v36 = vmin.f32 %v1358_v26, 6.0  ;;  %v1215_v37 = vadd.f32 %v5348_v61, %v1214_v33  ;;  %v4103_v38 = vpop.f32.mrb[6].mxu1  ;;  %v5382_v25 = vld [vmem:[#allocation8 + $0x4] ss:$0 sm:$0xff] }
 0x2d6   : > { %v1455_v40 = vmul.f32 0.16666667, %v1423_v30  ;;  %v1424_v41 = vmul.f32 %v1392_v31, %v1210_v10  ;;  %v1331_v42 = vadd.f32 3.0, %v1223_v32  ;;  %v1226_v43 = vadd.f32 %v4103_v38, %v5348_v61  ;;  %v1217_v0 = vpop.f32.mrb[7].mxu1 }
 0x2d7   : > { %v1453_v45 = vmul.f32 0.16666667, %v1421_v35  ;;  %v1422_v46 = vmul.f32 %v1390_v36, %v1202_v13  ;;  %v1329_v47 = vadd.f32 3.0, %v1215_v37  ;;  %v1218_v48 = vadd.f32 %v5348_v61, %v1217_v0 }
 0x2d8   : > { %1561 = vst.msk [vmem:[#allocation2 + $0x48] sm:$0xff] %vm1485_vm4, %v1455_v40  ;;  %v1456_v49 = vmul.f32 0.16666667, %v1424_v41  ;;  %v1363_v50 = vmax.f32 %v1331_v42, 0.0  ;;  %v1332_v52 = vadd.f32 3.0, %v1226_v43  ;;  %v1871_v13 = vadd.f32 %v1839_v57, %v1767_v53 }
 0x2d9   : > { %1559 = vst.msk [vmem:[#allocation2 + $0x28] sm:$0xff] %vm1485_vm4, %v1453_v45  ;;  %v1454_v54 = vmul.f32 0.16666667, %v1422_v46  ;;  %v1361_v55 = vmax.f32 %v1329_v47, 0.0  ;;  %v1330_v56 = vadd.f32 3.0, %v1218_v48 }
 0x2da   : > { %1562 = vst.msk [vmem:[#allocation2 + $0x50] sm:$0xff] %vm1485_vm4, %v1456_v49  ;;  %v1395_v58 = vmin.f32 %v1363_v50, 6.0  ;;  %v1364_v59 = vmax.f32 %v1332_v52, 0.0 }
 0x2db   : > { %1560 = vst.msk [vmem:[#allocation2 + $0x30] sm:$0xff] %vm1485_vm4, %v1454_v54  ;;  %v1393_v60 = vmin.f32 %v1361_v55, 6.0  ;;  %v1362_v62 = vmax.f32 %v1330_v56, 0.0  ;;  %v4106_v1 = vpop.f32.mrb[8].mxu1 }
 0x2dc   : > { %v1427_v2 = vmul.f32 %v1395_v58, %v1223_v32  ;;  %v1396_v3 = vmin.f32 %v1364_v59, 6.0  ;;  %v1239_v4 = vadd.f32 %v4106_v1, %v5348_v61  ;;  %v1230_v5 = vpop.f32.mrb[9].mxu1  ;;  %v5418_v59 = vld [vmem:[#allocation8 + $0x5] ss:$0 sm:$0xff] }
 0x2dd   : > { %v1425_v9 = vmul.f32 %v1393_v60, %v1215_v37  ;;  %v1394_v10 = vmin.f32 %v1362_v62, 6.0  ;;  %v1231_v11 = vadd.f32 %v5348_v61, %v1230_v5  ;;  %v4107_v12 = vpop.f32.mrb[10].mxu1 }
 0x2de   : > { %v1459_v15 = vmul.f32 0.16666667, %v1427_v2  ;;  %v1428_v16 = vmul.f32 %v1396_v3, %v1226_v43  ;;  %v1335_v17 = vadd.f32 3.0, %v1239_v4  ;;  %v1242_v18 = vadd.f32 %v4107_v12, %v5348_v61  ;;  %v1233_v19 = vpop.f32.mrb[11].mxu1 }
 0x2df   : > { %v1457_v63 = vmul.f32 0.16666667, %v1425_v9  ;;  %v1426_v21 = vmul.f32 %v1394_v10, %v1218_v48  ;;  %v1333_v22 = vadd.f32 3.0, %v1231_v11  ;;  %v1234_v23 = vadd.f32 %v5348_v61, %v1233_v19  ;;  %v5384_v26 = vld [vmem:[#allocation2 + $0x47] sm:$0xff] }
 0x2e0   : > { %1565 = vst.msk [vmem:[#allocation2 + $0x88] sm:$0xff] %vm1485_vm4, %v1459_v15  ;;  %v1460_v27 = vmul.f32 0.16666667, %v1428_v16  ;;  %v1367_v28 = vmax.f32 %v1335_v17, 0.0  ;;  %v1336_v29 = vadd.f32 3.0, %v1242_v18  ;;  %v5387_v30 = vld [vmem:[#allocation2 + $0x27] sm:$0xff]  ;;  %v5393_v32 = vmul.f32 %v5376_v14, %v5384_v26 }
 0x2e1   : > { %v5389_v31 = vld [vmem:[#allocation2 + $0x28] sm:$0xff]  ;;  %1563 = vst.msk [vmem:[#allocation2 + $0x68] sm:$0xff] %vm1485_vm4, %v1457_v63  ;;  %v1458_v33 = vmul.f32 0.16666667, %v1426_v21  ;;  %v1365_v34 = vmax.f32 %v1333_v22, 0.0  ;;  %v1334_v35 = vadd.f32 3.0, %v1234_v23  ;;  %v1942_v36 = vmul.f32 %v5379_v20, %v5387_v30 }
 0x2e2   : > { %v5398_v37 = vld [vmem:[#allocation2 + $0x4f] sm:$0xff]  ;;  %1566 = vst.msk [vmem:[#allocation2 + $0x90] sm:$0xff] %vm1485_vm4, %v1460_v27  ;;  %v1399_v38 = vmin.f32 %v1367_v28, 6.0  ;;  %v1368_v39 = vmax.f32 %v1336_v29, 0.0  ;;  %v2046_v42 = vmul.f32 %v5382_v25, %v5389_v31 }
 0x2e3   : > { %v5401_v40 = vld [vmem:[#allocation2 + $0x2f] sm:$0xff]  ;;  %v5409_v43 = vmul.f32 %v5376_v14, %v5398_v37  ;;  %1564 = vst.msk [vmem:[#allocation2 + $0x70] sm:$0xff] %vm1485_vm4, %v1458_v33  ;;  %v1397_v0 = vmin.f32 %v1365_v34, 6.0  ;;  %v1366_v44 = vmax.f32 %v1334_v35, 0.0  ;;  %v4110_v45 = vpop.f32.mrb[12].mxu1  ;;  %v1974_v47 = vadd.f32 %v1942_v36, %v1870_v7 }
 0x2e4   : > { %v5403_v41 = vld [vmem:[#allocation2 + $0x30] sm:$0xff]  ;;  %v1943_v46 = vmul.f32 %v5379_v20, %v5401_v40  ;;  %v1431_v48 = vmul.f32 %v1399_v38, %v1239_v4  ;;  %v1400_v49 = vmin.f32 %v1368_v39, 6.0  ;;  %v1255_v50 = vadd.f32 %v4110_v45, %v5348_v61  ;;  %v1246_v52 = vpop.f32.mrb[13].mxu1  ;;  %v5421_v4 = vld [vmem:[#allocation8 + $0x7] ss:$0 sm:$0xff] }
 0x2e5   : > { %v2047_v53 = vmul.f32 %v5382_v25, %v5403_v41  ;;  %v1429_v54 = vmul.f32 %v1397_v0, %v1231_v11  ;;  %v1398_v55 = vmin.f32 %v1366_v44, 6.0  ;;  %v1247_v56 = vadd.f32 %v5348_v61, %v1246_v52  ;;  %v4111_v57 = vpop.f32.mrb[14].mxu1  ;;  %v5424_v11 = vld [vmem:[#allocation2 + $0x29] sm:$0xff]  ;;  %v5426_v12 = vld [vmem:[#allocation2 + $0x31] sm:$0xff] }
 0x2e6   : > { %v1975_v58 = vadd.f32 %v1943_v46, %v1871_v13  ;;  %v1463_v60 = vmul.f32 0.16666667, %v1431_v48  ;;  %v1432_v62 = vmul.f32 %v1400_v49, %v1242_v18  ;;  %v1339_v1 = vadd.f32 3.0, %v1255_v50  ;;  %v1249_v3 = vpop.f32.mrb[15].mxu1  ;;  %v5429_v18 = vld [vmem:[#allocation2 + $0x48] sm:$0xff]  ;;  %v5431_v19 = vld [vmem:[#allocation2 + $0x50] sm:$0xff] }
 0x2e7   : > { %v1258_v2 = vadd.f32 %v4111_v57, %v5348_v61  ;;  %v1461_v5 = vmul.f32 0.16666667, %v1429_v54  ;;  %v1430_v7 = vmul.f32 %v1398_v55, %v1234_v23  ;;  %v1337_v9 = vadd.f32 3.0, %v1247_v56 }
 0x2e8   : > { %v1250_v10 = vadd.f32 %v5348_v61, %v1249_v3  ;;  %1569 = vst.msk [vmem:[#allocation2 + $0xc8] sm:$0xff] %vm1485_vm4, %v1463_v60  ;;  %v1464_v13 = vmul.f32 0.16666667, %v1432_v62  ;;  %v1371_v15 = vmax.f32 %v1339_v1, 0.0  ;;  %v2078_v17 = vadd.f32 %v2046_v42, %v1974_v47 }
 0x2e9   : > { %v1340_v16 = vadd.f32 3.0, %v1258_v2  ;;  %1567 = vst.msk [vmem:[#allocation2 + $0xa8] sm:$0xff] %vm1485_vm4, %v1461_v5  ;;  %v1462_v63 = vmul.f32 0.16666667, %v1430_v7  ;;  %v1369_v21 = vmax.f32 %v1337_v9, 0.0  ;;  %v2079_v23 = vadd.f32 %v2047_v53, %v1975_v58  ;;  %v5448_v5 = vld [vmem:[#allocation2 + $0x49] sm:$0xff] }
 0x2ea   : > { %v1338_v22 = vadd.f32 3.0, %v1250_v10  ;;  %1570 = vst.msk [vmem:[#allocation2 + $0xd0] sm:$0xff] %vm1485_vm4, %v1464_v13  ;;  %v1403_v27 = vmin.f32 %v1371_v15, 6.0  ;;  %v2150_v29 = vmul.f32 %v5418_v59, %v5424_v11  ;;  %v2151_v33 = vmul.f32 %v5418_v59, %v5426_v12  ;;  %v5450_v7 = vld [vmem:[#allocation8 + $0x8] ss:$0 sm:$0xff]  ;;  %v5454_v15 = vld [vmem:[#allocation2 + $0x51] sm:$0xff] }
 0x2eb   : > { %v1372_v28 = vmax.f32 %v1340_v16, 0.0  ;;  %1568 = vst.msk [vmem:[#allocation2 + $0xb0] sm:$0xff] %vm1485_vm4, %v1462_v63  ;;  %v1401_v34 = vmin.f32 %v1369_v21, 6.0  ;;  %v4114_v36 = vpop.f32.mrb[16].mxu1  ;;  %v2359_v38 = vmul.f32 %v5421_v4, %v5429_v18  ;;  %v2360_v39 = vmul.f32 %v5421_v4, %v5431_v19 }
 0x2ec   : > { %v1370_v35 = vmax.f32 %v1338_v22, 0.0  ;;  %v1435_v42 = vmul.f32 %v1403_v27, %v1255_v50  ;;  %v1271_v44 = vadd.f32 %v4114_v36, %v5348_v61  ;;  %v1262_v45 = vpop.f32.mrb[17].mxu1  ;;  %v2182_v46 = vadd.f32 %v2150_v29, %v2078_v17 }
 0x2ed   : > { %v1404_v0 = vmin.f32 %v1372_v28, 6.0  ;;  %v1433_v47 = vmul.f32 %v1401_v34, %v1247_v56  ;;  %v1263_v49 = vadd.f32 %v5348_v61, %v1262_v45  ;;  %v4115_v52 = vpop.f32.mrb[18].mxu1  ;;  %v2183_v53 = vadd.f32 %v2151_v33, %v2079_v23 }
 0x2ee   : > { %v1402_v48 = vmin.f32 %v1370_v35, 6.0  ;;  %v1467_v54 = vmul.f32 0.16666667, %v1435_v42  ;;  %v1343_v57 = vadd.f32 3.0, %v1271_v44  ;;  %v1274_v58 = vadd.f32 %v4115_v52, %v5348_v61  ;;  %v1265_v60 = vpop.f32.mrb[19].mxu1 }
 0x2ef   : > { %v1436_v55 = vmul.f32 %v1404_v0, %v1258_v2  ;;  %v1465_v62 = vmul.f32 0.16666667, %v1433_v47  ;;  %v1341_v50 = vadd.f32 3.0, %v1263_v49  ;;  %v1266_v3 = vadd.f32 %v5348_v61, %v1265_v60  ;;  %v5466_v52 = vld [vmem:[#allocation9] ss:$0 sm:$0xff] }
 0x2f0   : > { %v1434_v1 = vmul.f32 %v1402_v48, %v1250_v10  ;;  %1573 = vst.msk [vmem:[#allocation2 + $0x108] sm:$0xff] %vm1485_vm4, %v1467_v54  ;;  %v1375_v9 = vmax.f32 %v1343_v57, 0.0  ;;  %v1344_v13 = vadd.f32 3.0, %v1274_v58  ;;  %v2287_v2 = vadd.f32 %v5393_v32, %v2182_v46 }
 0x2f1   : > { %v1468_v56 = vmul.f32 0.16666667, %v1436_v55  ;;  %1571 = vst.msk [vmem:[#allocation2 + $0xe8] sm:$0xff] %vm1485_vm4, %v1465_v62  ;;  %v1373_v10 = vmax.f32 %v1341_v50, 0.0  ;;  %v1342_v17 = vadd.f32 3.0, %v1266_v3  ;;  %v2288_v63 = vadd.f32 %v5409_v43, %v2183_v53 }
 0x2f2   : > { %v1466_v16 = vmul.f32 0.16666667, %v1434_v1  ;;  %v1407_v21 = vmin.f32 %v1375_v9, 6.0  ;;  %v1376_v22 = vmax.f32 %v1344_v13, 0.0  ;;  %v2391_v23 = vadd.f32 %v2359_v38, %v2287_v2 }
 0x2f3   : > { %1574 = vst.msk [vmem:[#allocation2 + $0x110] sm:$0xff] %vm1485_vm4, %v1468_v56  ;;  %v2463_v27 = vmul.f32 %v5450_v7, %v5448_v5  ;;  %v1405_v32 = vmin.f32 %v1373_v10, 6.0  ;;  %v1374_v28 = vmax.f32 %v1342_v17, 0.0  ;;  %v4118_v29 = vpop.f32.mrb[20].mxu1  ;;  %v2392_v33 = vadd.f32 %v2360_v39, %v2288_v63 }
 0x2f4   : > { %1572 = vst.msk [vmem:[#allocation2 + $0xf0] sm:$0xff] %vm1485_vm4, %v1466_v16  ;;  %v2464_v34 = vmul.f32 %v5450_v7, %v5454_v15  ;;  %v1439_v35 = vmul.f32 %v1407_v21, %v1271_v44  ;;  %v1408_v36 = vmin.f32 %v1376_v22, 6.0  ;;  %v1287_v43 = vadd.f32 %v4118_v29, %v5348_v61  ;;  %v1278_v42 = vpop.f32.mrb[21].mxu1 }
 0x2f5   : > { %v2495_v0 = vadd.f32 %v2463_v27, %v2391_v23  ;;  %v1437_v45 = vmul.f32 %v1405_v32, %v1263_v49  ;;  %v1406_v38 = vmin.f32 %v1374_v28, 6.0  ;;  %v1279_v46 = vadd.f32 %v5348_v61, %v1278_v42  ;;  %v4119_v47 = vpop.f32.mrb[22].mxu1 }
 0x2f6   : > { %v2496_v48 = vadd.f32 %v2464_v34, %v2392_v33  ;;  %v1471_v53 = vmul.f32 0.16666667, %v1439_v35  ;;  %v1440_v54 = vmul.f32 %v1408_v36, %v1274_v58  ;;  %v1347_v39 = vadd.f32 3.0, %v1287_v43  ;;  %v1281_v57 = vpop.f32.mrb[23].mxu1 }
 0x2f7   : > { %v1290_v55 = vadd.f32 %v4119_v47, %v5348_v61  ;;  %v1469_v44 = vmul.f32 0.16666667, %v1437_v45  ;;  %v1438_v60 = vmul.f32 %v1406_v38, %v1266_v3  ;;  %v1345_v62 = vadd.f32 3.0, %v1279_v46 }
 0x2f8   : > { %v1282_v1 = vadd.f32 %v5348_v61, %v1281_v57  ;;  %1577 = vst.msk [vmem:[#allocation2 + $0x148] sm:$0xff] %vm1485_vm4, %v1471_v53  ;;  %v1472_v49 = vmul.f32 0.16666667, %v1440_v54  ;;  %v1379_v50 = vmax.f32 %v1347_v39, 0.0  ;;  %v2534_v9 = vadd.f32 %v5466_v52, %v2495_v0 }
 0x2f9   : > { %v1348_v56 = vadd.f32 3.0, %v1290_v55  ;;  %1575 = vst.msk [vmem:[#allocation2 + $0x128] sm:$0xff] %vm1485_vm4, %v1469_v44  ;;  %v1470_v13 = vmul.f32 0.16666667, %v1438_v60  ;;  %v1377_v58 = vmax.f32 %v1345_v62, 0.0  ;;  %v2535_v16 = vadd.f32 %v5466_v52, %v2496_v48 }
 0x2fa   : > { %v1346_v2 = vadd.f32 3.0, %v1282_v1  ;;  %1578 = vst.msk [vmem:[#allocation2 + $0x150] sm:$0xff] %vm1485_vm4, %v1472_v49  ;;  %v1411_v3 = vmin.f32 %v1379_v50, 6.0  ;;  %v2566_v17 = vadd.f32 3.0, %v2534_v9  ;;  %v1632_v63 = vmul.f32 %v5352_v6, %v5387_v30 }
 0x2fb   : > { %v1380_v10 = vmax.f32 %v1348_v56, 0.0  ;;  %1576 = vst.msk [vmem:[#allocation2 + $0x130] sm:$0xff] %vm1485_vm4, %v1470_v13  ;;  %v1409_v21 = vmin.f32 %v1377_v58, 6.0  ;;  %v4122_v23 = vpop.f32.mrb[24].mxu1  ;;  %v2567_v27 = vadd.f32 3.0, %v2535_v16  ;;  %v1633_v32 = vmul.f32 %v5352_v6, %v5401_v40 }
 0x2fc   : > { %v1378_v22 = vmax.f32 %v1346_v2, 0.0  ;;  %v1443_v28 = vmul.f32 %v1411_v3, %v1287_v43  ;;  %v1303_v33 = vadd.f32 %v4122_v23, %v5348_v61  ;;  %v1294_v34 = vpop.f32.mrb[25].mxu1  ;;  %v2598_v35 = vmax.f32 %v2566_v17, 0.0 }
 0x2fd   : > { %v1412_v29 = vmin.f32 %v1380_v10, 6.0  ;;  %v1441_v36 = vmul.f32 %v1409_v21, %v1279_v46  ;;  %v1295_v0 = vadd.f32 %v5348_v61, %v1294_v34  ;;  %v4123_v30 = vpop.f32.mrb[26].mxu1  ;;  %v2599_v45 = vmax.f32 %v2567_v27, 0.0 }
 0x2fe   : > { %v1410_v42 = vmin.f32 %v1378_v22, 6.0  ;;  %v1475_v38 = vmul.f32 0.16666667, %v1443_v28  ;;  %v1351_v48 = vadd.f32 3.0, %v1303_v33  ;;  %v1306_v53 = vadd.f32 %v4123_v30, %v5348_v61  ;;  %v1297_v54 = vpop.f32.mrb[27].mxu1 }
 0x2ff   : > { %v1444_v47 = vmul.f32 %v1412_v29, %v1290_v55  ;;  %v1473_v39 = vmul.f32 0.16666667, %v1441_v36  ;;  %v1349_v43 = vadd.f32 3.0, %v1295_v0  ;;  %v1298_v57 = vadd.f32 %v5348_v61, %v1297_v54 }
 0x300   : > { %v1442_v40 = vmul.f32 %v1410_v42, %v1282_v1  ;;  %1581 = vst.msk [vmem:[#allocation2 + $0x188] sm:$0xff] %vm1485_vm4, %v1475_v38  ;;  %v1383_v46 = vmax.f32 %v1351_v48, 0.0  ;;  %v1352_v60 = vadd.f32 3.0, %v1306_v53  ;;  %v2630_v62 = vmin.f32 %v2598_v35, 6.0 }
 0x301   : > { %v1476_v44 = vmul.f32 0.16666667, %v1444_v47  ;;  %1579 = vst.msk [vmem:[#allocation2 + $0x168] sm:$0xff] %vm1485_vm4, %v1473_v39  ;;  %v1381_v50 = vmax.f32 %v1349_v43, 0.0  ;;  %v1350_v55 = vadd.f32 3.0, %v1298_v57  ;;  %v2631_v56 = vmin.f32 %v2599_v45, 6.0 }
 0x302   : > { %v1474_v49 = vmul.f32 0.16666667, %v1442_v40  ;;  %v1415_v13 = vmin.f32 %v1383_v46, 6.0  ;;  %v1384_v58 = vmax.f32 %v1352_v60, 0.0  ;;  %v2662_v1 = vmul.f32 %v2630_v62, %v2534_v9  ;;  %v5512_v46 = vld [vmem:[#allocation2 + $0x70] sm:$0xff] }
 0x303   : > { %1582 = vst.msk [vmem:[#allocation2 + $0x190] sm:$0xff] %vm1485_vm4, %v1476_v44  ;;  %v1736_v2 = vmul.f32 %v5354_v8, %v5389_v31  ;;  %v1413_v3 = vmin.f32 %v1381_v50, 6.0  ;;  %v1382_v10 = vmax.f32 %v1350_v55, 0.0  ;;  %v2663_v17 = vmul.f32 %v2631_v56, %v2535_v16  ;;  %v4126_v21 = vpop.f32.mrb[28].mxu1  ;;  %v5519_v55 = vld [vmem:[#allocation2 + $0x69] sm:$0xff]  ;;  %v5521_v56 = vld [vmem:[#allocation2 + $0x71] sm:$0xff] }
 0x304   : > { %1580 = vst.msk [vmem:[#allocation2 + $0x170] sm:$0xff] %vm1485_vm4, %v1474_v49  ;;  %v1737_v22 = vmul.f32 %v5354_v8, %v5403_v41  ;;  %v1447_v23 = vmul.f32 %v1415_v13, %v1303_v33  ;;  %v1416_v27 = vmin.f32 %v1384_v58, 6.0  ;;  %v2694_v28 = vmul.f32 0.16666667, %v2662_v1  ;;  %v1310_v34 = vpop.f32.mrb[29].mxu1 }
 0x305   : > { %v1319_v29 = vadd.f32 %v4126_v21, %v5348_v61  ;;  %v1445_v35 = vmul.f32 %v1413_v3, %v1295_v0  ;;  %v1414_v9 = vmin.f32 %v1382_v10, 6.0  ;;  %v2695_v36 = vmul.f32 0.16666667, %v2663_v17  ;;  %v4127_v31 = vpop.f32.mrb[30].mxu1 }
 0x306   : > { %v1768_v42 = vadd.f32 %v1736_v2, %v1632_v63  ;;  %v1479_v30 = vmul.f32 0.16666667, %v1447_v23  ;;  %v1448_v45 = vmul.f32 %v1416_v27, %v1306_v53  ;;  %v1769_v47 = vadd.f32 %v1737_v22, %v1633_v32  ;;  %v1313_v16 = vpop.f32.mrb[31].mxu1  ;;  %v5500_v53 = vld [vmem:[#allocation2 + $0x67] sm:$0xff]  ;;  %v5502_v32 = vld [vmem:[#allocation2 + $0x6f] sm:$0xff] }
 0x307   : > { %v1355_v38 = vadd.f32 3.0, %v1319_v29  ;;  %v1477_v48 = vmul.f32 0.16666667, %v1445_v35  ;;  %v1446_v54 = vmul.f32 %v1414_v9, %v1298_v57  ;;  %v2726_v39 = vpack.c.bf16 %v2695_v36, %v2694_v28 }
 0x308   : > { %v1840_v41 = vmul.f32 %v5360_v24, %v5424_v11  ;;  %1585 = vst.msk [vmem:[#allocation2 + $0x1c8] sm:$0xff] %vm1485_vm4, %v1479_v30  ;;  %v1480_v33 = vmul.f32 0.16666667, %v1448_v45  ;;  %v1841_v0 = vmul.f32 %v5360_v24, %v5426_v12  ;;  %v1944_v63 = vmul.f32 %v5379_v20, %v5384_v26  ;;  %v5510_v12 = vld [vmem:[#allocation2 + $0x68] sm:$0xff] }
 0x309   : > { %v1387_v40 = vmax.f32 %v1355_v38, 0.0  ;;  %1583 = vst.msk [vmem:[#allocation2 + $0x1a8] sm:$0xff] %vm1485_vm4, %v1477_v48  ;;  %v1478_v43 = vmul.f32 0.16666667, %v1446_v54  ;;  %4136 = vmatprep.mubr.msk.bf16.mxu1 %vm1485_vm4, %v2726_v39  ;;  %v1945_v57 = vmul.f32 %v5379_v20, %v5398_v37  ;;  %v2048_v44 = vmul.f32 %v5382_v25, %v5429_v18 }
 0x30a   : > { %v1872_v11 = vadd.f32 %v1840_v41, %v1768_v42  ;;  %1586 = vst.msk [vmem:[#allocation2 + $0x1d0] sm:$0xff] %vm1485_vm4, %v1480_v33  ;;  %v1873_v62 = vadd.f32 %v1841_v0, %v1769_v47  ;;  %v2049_v49 = vmul.f32 %v5382_v25, %v5431_v19  ;;  %v2152_v50 = vmul.f32 %v5418_v59, %v5448_v5 }
 0x30b   : > { %v1419_v60 = vmin.f32 %v1387_v40, 6.0  ;;  %1584 = vst.msk [vmem:[#allocation2 + $0x1b0] sm:$0xff] %vm1485_vm4, %v1478_v43  ;;  %v2153_v58 = vmul.f32 %v5418_v59, %v5454_v15  ;;  %v2257_v1 = vmul.f32 %v5376_v14, %v5500_v53  ;;  %v2258_v2 = vmul.f32 %v5376_v14, %v5502_v32 }
 0x30c   : > { %v1976_v13 = vadd.f32 %v1944_v63, %v1872_v11  ;;  %v1977_v10 = vadd.f32 %v1945_v57, %v1873_v62  ;;  %v2361_v17 = vmul.f32 %v5421_v4, %v5510_v12  ;;  %v2362_v21 = vmul.f32 %v5421_v4, %v5512_v46 }
 0x30d   : > { %v1451_v3 = vmul.f32 %v1419_v60, %v1319_v29  ;;  %v2465_v23 = vmul.f32 %v5450_v7, %v5519_v55  ;;  %v2466_v27 = vmul.f32 %v5450_v7, %v5521_v56  ;;  %v1311_v28 = vadd.f32 %v5348_v61, %v1310_v34 }
 0x30e   : > { %v2080_v22 = vadd.f32 %v2048_v44, %v1976_v13  ;;  %v2081_v9 = vadd.f32 %v2049_v49, %v1977_v10  ;;  %v1322_v29 = vadd.f32 %v4127_v31, %v5348_v61  ;;  %v1314_v36 = vadd.f32 %v5348_v61, %v1313_v16  ;;  %v5561_v10 = vld [vmem:[#allocation2 + $0x87] sm:$0xff] }
 0x30f   : > { %v1483_v35 = vmul.f32 0.16666667, %v1451_v3  ;;  %v1353_v30 = vadd.f32 3.0, %v1311_v28  ;;  %v1634_v45 = vmul.f32 %v5352_v6, %v5384_v26  ;;  %v1635_v38 = vmul.f32 %v5352_v6, %v5398_v37 }
 0x310   : > { %v2184_v42 = vadd.f32 %v2152_v50, %v2080_v22  ;;  %v2185_v47 = vadd.f32 %v2153_v58, %v2081_v9  ;;  %v1356_v48 = vadd.f32 3.0, %v1322_v29  ;;  %v1354_v54 = vadd.f32 3.0, %v1314_v36 }
 0x311   : > { %1589 = vst.msk [vmem:[#allocation2 + $0x208] sm:$0xff] %vm1485_vm4, %v1483_v35  ;;  %v1738_v34 = vmul.f32 %v5354_v8, %v5429_v18  ;;  %v1385_v31 = vmax.f32 %v1353_v30, 0.0  ;;  %v1739_v61 = vmul.f32 %v5354_v8, %v5431_v19  ;;  %v1842_v16 = vmul.f32 %v5360_v24, %v5448_v5  ;;  %v5575_v30 = vld [vmem:[#allocation2 + $0x89] sm:$0xff] }
 0x312   : > { %v2289_v39 = vadd.f32 %v2257_v1, %v2184_v42  ;;  %v2290_v26 = vadd.f32 %v2258_v2, %v2185_v47  ;;  %v1388_v41 = vmax.f32 %v1356_v48, 0.0  ;;  %v1386_v33 = vmax.f32 %v1354_v54, 0.0  ;;  %v5573_v42 = vld [vmem:[#allocation2 + $0x90] sm:$0xff] }
 0x313   : > { %v1770_v37 = vadd.f32 %v1738_v34, %v1634_v45  ;;  %v1417_v0 = vmin.f32 %v1385_v31, 6.0  ;;  %v1771_v63 = vadd.f32 %v1739_v61, %v1635_v38  ;;  %v1843_v43 = vmul.f32 %v5360_v24, %v5454_v15  ;;  %v5577_v45 = vld [vmem:[#allocation2 + $0x91] sm:$0xff] }
 0x314   : > { %v2393_v40 = vadd.f32 %v2361_v17, %v2289_v39  ;;  %v2394_v11 = vadd.f32 %v2362_v21, %v2290_v26  ;;  %v1420_v18 = vmin.f32 %v1388_v41, 6.0  ;;  %v1418_v57 = vmin.f32 %v1386_v33, 6.0  ;;  %v5563_v17 = vld [vmem:[#allocation2 + $0x8f] sm:$0xff] }
 0x315   : > { %v1874_v44 = vadd.f32 %v1842_v16, %v1770_v37  ;;  %v1449_v62 = vmul.f32 %v1417_v0, %v1311_v28  ;;  %v1875_v19 = vadd.f32 %v1843_v43, %v1771_v63  ;;  %v1946_v5 = vmul.f32 %v5379_v20, %v5500_v53  ;;  %v5566_v28 = vld [vmem:[#allocation2 + $0x88] sm:$0xff] }
 0x316   : > { %v2497_v60 = vadd.f32 %v2465_v23, %v2393_v40  ;;  %v2498_v49 = vadd.f32 %v2466_v27, %v2394_v11  ;;  %v1452_v50 = vmul.f32 %v1420_v18, %v1322_v29  ;;  %v1450_v13 = vmul.f32 %v1418_v57, %v1314_v36 }
 0x317   : > { %v1947_v58 = vmul.f32 %v5379_v20, %v5502_v32  ;;  %v1481_v2 = vmul.f32 0.16666667, %v1449_v62  ;;  %v1978_v15 = vadd.f32 %v1946_v5, %v1874_v44  ;;  %v2050_v3 = vmul.f32 %v5382_v25, %v5510_v12 }
 0x318   : > { %v2536_v1 = vadd.f32 %v5466_v52, %v2497_v60  ;;  %v2537_v21 = vadd.f32 %v5466_v52, %v2498_v49  ;;  %v1484_v22 = vmul.f32 0.16666667, %v1452_v50  ;;  %v1482_v23 = vmul.f32 0.16666667, %v1450_v13 }
 0x319   : > { %v1979_v27 = vadd.f32 %v1947_v58, %v1875_v19  ;;  %1587 = vst.msk [vmem:[#allocation2 + $0x1e8] sm:$0xff] %vm1485_vm4, %v1481_v2  ;;  %v2051_v9 = vmul.f32 %v5382_v25, %v5512_v46  ;;  %v2082_v29 = vadd.f32 %v2050_v3, %v1978_v15  ;;  %v2154_v36 = vmul.f32 %v5418_v59, %v5519_v55  ;;  %v5611_v3 = vld [vmem:[#allocation2 + $0xa7] sm:$0xff] }
 0x31a   : > { %v2568_v35 = vadd.f32 3.0, %v2536_v1  ;;  %v2569_v38 = vadd.f32 3.0, %v2537_v21  ;;  %1590 = vst.msk [vmem:[#allocation2 + $0x210] sm:$0xff] %vm1485_vm4, %v1484_v22  ;;  %1588 = vst.msk [vmem:[#allocation2 + $0x1f0] sm:$0xff] %vm1485_vm4, %v1482_v23  ;;  %v2155_v47 = vmul.f32 %v5418_v59, %v5521_v56  ;;  %v2259_v48 = vmul.f32 %v5376_v14, %v5561_v10  ;;  %v5618_v23 = vld [vmem:[#allocation2 + $0xaf] sm:$0xff] }
 0x31b   : > { %v2260_v54 = vmul.f32 %v5376_v14, %v5563_v17  ;;  %v2083_v39 = vadd.f32 %v2051_v9, %v1979_v27  ;;  %v2186_v31 = vadd.f32 %v2154_v36, %v2082_v29  ;;  %v2363_v61 = vmul.f32 %v5421_v4, %v5566_v28  ;;  %v5620_v27 = vld [vmem:[#allocation2 + $0xa8] sm:$0xff] }
 0x31c   : > { %v2600_v34 = vmax.f32 %v2568_v35, 0.0  ;;  %v2601_v16 = vmax.f32 %v2569_v38, 0.0  ;;  %v2364_v26 = vmul.f32 %v5421_v4, %v5573_v42  ;;  %v2467_v41 = vmul.f32 %v5450_v7, %v5575_v30  ;;  %v5624_v38 = vld [vmem:[#allocation2 + $0xb0] sm:$0xff] }
 0x31d   : > { %v2468_v33 = vmul.f32 %v5450_v7, %v5577_v45  ;;  %v2187_v40 = vadd.f32 %v2155_v47, %v2083_v39  ;;  %v2291_v0 = vadd.f32 %v2259_v48, %v2186_v31  ;;  %v1636_v63 = vmul.f32 %v5352_v6, %v5500_v53  ;;  %v5626_v47 = vld [vmem:[#allocation2 + $0xa9] sm:$0xff]  ;;  %v5633_v31 = vld [vmem:[#allocation2 + $0xb1] sm:$0xff] }
 0x31e   : > { %v2632_v37 = vmin.f32 %v2600_v34, 6.0  ;;  %v2633_v43 = vmin.f32 %v2601_v16, 6.0  ;;  %v1637_v11 = vmul.f32 %v5352_v6, %v5502_v32  ;;  %v1740_v18 = vmul.f32 %v5354_v8, %v5510_v12 }
 0x31f   : > { %v1741_v57 = vmul.f32 %v5354_v8, %v5512_v46  ;;  %v2292_v60 = vadd.f32 %v2260_v54, %v2187_v40  ;;  %v2395_v62 = vadd.f32 %v2363_v61, %v2291_v0  ;;  %v1844_v19 = vmul.f32 %v5360_v24, %v5519_v55 }
 0x320   : > { %v2664_v44 = vmul.f32 %v2632_v37, %v2536_v1  ;;  %v2665_v5 = vmul.f32 %v2633_v43, %v2537_v21  ;;  %v1772_v49 = vadd.f32 %v1740_v18, %v1636_v63  ;;  %v1845_v53 = vmul.f32 %v5360_v24, %v5521_v56 }
 0x321   : > { %v1773_v50 = vadd.f32 %v1741_v57, %v1637_v11  ;;  %v2396_v32 = vadd.f32 %v2364_v26, %v2292_v60  ;;  %v2499_v58 = vadd.f32 %v2467_v41, %v2395_v62  ;;  %v1948_v12 = vmul.f32 %v5379_v20, %v5561_v10 }
 0x322   : > { %v2696_v13 = vmul.f32 0.16666667, %v2664_v44  ;;  %v2697_v2 = vmul.f32 0.16666667, %v2665_v5  ;;  %v1876_v46 = vadd.f32 %v1844_v19, %v1772_v49  ;;  %v1949_v15 = vmul.f32 %v5379_v20, %v5563_v17 }
 0x323   : > { %v1877_v1 = vadd.f32 %v1845_v53, %v1773_v50  ;;  %v2500_v55 = vadd.f32 %v2468_v33, %v2396_v32  ;;  %v2538_v21 = vadd.f32 %v5466_v52, %v2499_v58  ;;  %v2052_v56 = vmul.f32 %v5382_v25, %v5566_v28 }
 0x324   : > { %v2053_v22 = vmul.f32 %v5382_v25, %v5573_v42  ;;  %v2727_v35 = vpack.c.bf16 %v2697_v2, %v2696_v13  ;;  %v1980_v9 = vadd.f32 %v1948_v12, %v1876_v46  ;;  %v2156_v36 = vmul.f32 %v5418_v59, %v5575_v30 }
 0x325   : > { %v1981_v29 = vadd.f32 %v1949_v15, %v1877_v1  ;;  %v2539_v48 = vadd.f32 %v5466_v52, %v2500_v55  ;;  %v2570_v54 = vadd.f32 3.0, %v2538_v21  ;;  %v2157_v34 = vmul.f32 %v5418_v59, %v5577_v45  ;;  %v5664_v55 = vld [vmem:[#allocation2 + $0xc7] sm:$0xff] }
 0x326   : > { %v2261_v39 = vmul.f32 %v5376_v14, %v5611_v3  ;;  %4137 = vmatmul.mubr.msk.bf16.vlgmr.msra.gmra.mrb[32].mxu1 %vm1485_vm4, %v2727_v35  ;;  %v2084_v61 = vadd.f32 %v2052_v56, %v1980_v9  ;;  %v2262_v26 = vmul.f32 %v5376_v14, %v5618_v23  ;;  %v2365_v41 = vmul.f32 %v5421_v4, %v5620_v27  ;;  %v5672_v9 = vld [vmem:[#allocation2 + $0xc8] sm:$0xff] }
 0x327   : > { %v2085_v16 = vadd.f32 %v2053_v22, %v1981_v29  ;;  %v2571_v33 = vadd.f32 3.0, %v2539_v48  ;;  %v2602_v37 = vmax.f32 %v2570_v54, 0.0  ;;  %v2366_v40 = vmul.f32 %v5421_v4, %v5624_v38 }
 0x328   : > { %v2469_v0 = vmul.f32 %v5450_v7, %v5626_v47  ;;  %v2188_v63 = vadd.f32 %v2156_v36, %v2084_v61  ;;  %v2470_v11 = vmul.f32 %v5450_v7, %v5633_v31  ;;  %v1638_v18 = vmul.f32 %v5352_v6, %v5561_v10  ;;  %v5682_v61 = vld [vmem:[#allocation2 + $0xd1] sm:$0xff] }
 0x329   : > { %v2189_v43 = vadd.f32 %v2157_v34, %v2085_v16  ;;  %v2603_v57 = vmax.f32 %v2571_v33, 0.0  ;;  %v2634_v44 = vmin.f32 %v2602_v37, 6.0  ;;  %v1639_v60 = vmul.f32 %v5352_v6, %v5563_v17  ;;  %v5678_v34 = vld [vmem:[#allocation2 + $0xd0] sm:$0xff] }
 0x32a   : > { %v1742_v62 = vmul.f32 %v5354_v8, %v5566_v28  ;;  %v2293_v19 = vadd.f32 %v2261_v39, %v2188_v63  ;;  %v1743_v49 = vmul.f32 %v5354_v8, %v5573_v42  ;;  %v1846_v50 = vmul.f32 %v5360_v24, %v5575_v30  ;;  %v5680_v39 = vld [vmem:[#allocation2 + $0xc9] sm:$0xff] }
 0x32b   : > { %v2294_v5 = vadd.f32 %v2262_v26, %v2189_v43  ;;  %v2635_v53 = vmin.f32 %v2603_v57, 6.0  ;;  %v2666_v13 = vmul.f32 %v2634_v44, %v2538_v21  ;;  %v1847_v10 = vmul.f32 %v5360_v24, %v5577_v45  ;;  %v5666_v45 = vld [vmem:[#allocation2 + $0xcf] sm:$0xff] }
 0x32c   : > { %v1774_v32 = vadd.f32 %v1742_v62, %v1638_v18  ;;  %v2397_v58 = vadd.f32 %v2365_v41, %v2293_v19  ;;  %v1775_v6 = vadd.f32 %v1743_v49, %v1639_v60  ;;  %v1950_v17 = vmul.f32 %v5379_v20, %v5611_v3  ;;  %v5697_v19 = vld [vmem:[#allocation8] ss:$0 sm:$0xff] }
 0x32d   : > { %v2398_v12 = vadd.f32 %v2366_v40, %v2294_v5  ;;  %v2667_v28 = vmul.f32 %v2635_v53, %v2539_v48  ;;  %v2698_v2 = vmul.f32 0.16666667, %v2666_v13  ;;  %v1951_v8 = vmul.f32 %v5379_v20, %v5618_v23  ;;  %v5703_v53 = vld [vmem:[#allocation8 + $0x1] ss:$0 sm:$0xff] }
 0x32e   : > { %v1878_v46 = vadd.f32 %v1846_v50, %v1774_v32  ;;  %v2501_v42 = vadd.f32 %v2469_v0, %v2397_v58  ;;  %v1879_v1 = vadd.f32 %v1847_v10, %v1775_v6  ;;  %v2054_v15 = vmul.f32 %v5382_v25, %v5620_v27 }
 0x32f   : > { %v2502_v30 = vadd.f32 %v2470_v11, %v2398_v12  ;;  %v2699_v21 = vmul.f32 0.16666667, %v2667_v28  ;;  %v2055_v22 = vmul.f32 %v5382_v25, %v5624_v38  ;;  %v2158_v35 = vmul.f32 %v5418_v59, %v5626_v47 }
 0x330   : > { %v1982_v56 = vadd.f32 %v1950_v17, %v1878_v46  ;;  %v2540_v29 = vadd.f32 %v5466_v52, %v2501_v42  ;;  %v1983_v48 = vadd.f32 %v1951_v8, %v1879_v1  ;;  %v2159_v54 = vmul.f32 %v5418_v59, %v5633_v31 }
 0x331   : > { %v2541_v36 = vadd.f32 %v5466_v52, %v2502_v30  ;;  %v2728_v16 = vpack.c.bf16 %v2699_v21, %v2698_v2  ;;  %v2263_v41 = vmul.f32 %v5376_v14, %v5664_v55  ;;  %v2264_v33 = vmul.f32 %v5376_v14, %v5666_v45 }
 0x332   : > { %v2086_v26 = vadd.f32 %v2054_v15, %v1982_v56  ;;  %v2572_v37 = vadd.f32 3.0, %v2540_v29  ;;  %v2087_v0 = vadd.f32 %v2055_v22, %v1983_v48  ;;  %v2367_v63 = vmul.f32 %v5421_v4, %v5672_v9  ;;  %v5719_v22 = vld [vmem:[#allocation2 + $0xe7] sm:$0xff] }
 0x333   : > { %v2573_v40 = vadd.f32 3.0, %v2541_v36  ;;  %4140 = vmatprep.mubr.msk.bf16.mxu1 %vm1485_vm4, %v2728_v16  ;;  %v2368_v11 = vmul.f32 %v5421_v4, %v5678_v34  ;;  %v2471_v18 = vmul.f32 %v5450_v7, %v5680_v39  ;;  %v2472_v57 = vmul.f32 %v5450_v7, %v5682_v61  ;;  %v5726_v48 = vld [vmem:[#allocation2 + $0xe8] sm:$0xff] }
 0x334   : > { %v2190_v43 = vadd.f32 %v2158_v35, %v2086_v26  ;;  %v2604_v44 = vmax.f32 %v2572_v37, 0.0  ;;  %v2191_v62 = vadd.f32 %v2159_v54, %v2087_v0  ;;  %v1640_v5 = vmul.f32 %v5697_v19, %v5611_v3  ;;  %v5728_v54 = vld [vmem:[#allocation2 + $0xf0] sm:$0xff] }
 0x335   : > { %v2605_v60 = vmax.f32 %v2573_v40, 0.0  ;;  %v1641_v50 = vmul.f32 %v5697_v19, %v5618_v23  ;;  %v1744_v13 = vmul.f32 %v5703_v53, %v5620_v27  ;;  %v1745_v32 = vmul.f32 %v5703_v53, %v5624_v38  ;;  %v5735_v37 = vld [vmem:[#allocation2 + $0xe9] sm:$0xff] }
 0x336   : > { %v2295_v49 = vadd.f32 %v2263_v41, %v2190_v43  ;;  %v2636_v10 = vmin.f32 %v2604_v44, 6.0  ;;  %v2296_v12 = vadd.f32 %v2264_v33, %v2191_v62  ;;  %v1848_v6 = vmul.f32 %v5360_v24, %v5626_v47 }
 0x337   : > { %v2637_v58 = vmin.f32 %v2605_v60, 6.0  ;;  %v1776_v3 = vadd.f32 %v1744_v13, %v1640_v5  ;;  %v1777_v28 = vadd.f32 %v1745_v32, %v1641_v50  ;;  %v1849_v23 = vmul.f32 %v5360_v24, %v5633_v31 }
 0x338   : > { %v2399_v17 = vadd.f32 %v2367_v63, %v2295_v49  ;;  %v2668_v2 = vmul.f32 %v2636_v10, %v2540_v29  ;;  %v2400_v8 = vadd.f32 %v2368_v11, %v2296_v12  ;;  %v1952_v27 = vmul.f32 %v5379_v20, %v5664_v55  ;;  %v5739_v11 = vld [vmem:[#allocation2 + $0xf1] sm:$0xff] }
 0x339   : > { %v2669_v46 = vmul.f32 %v2637_v58, %v2541_v36  ;;  %v1880_v38 = vadd.f32 %v1848_v6, %v1776_v3  ;;  %v1881_v30 = vadd.f32 %v1849_v23, %v1777_v28  ;;  %v1953_v1 = vmul.f32 %v5379_v20, %v5666_v45  ;;  %v5724_v36 = vld [vmem:[#allocation2 + $0xef] sm:$0xff]  ;;  %v5760_v23 = vld [vmem:[#allocation8 + $0x2] ss:$0 sm:$0xff] }
 0x33a   : > { %v2503_v42 = vadd.f32 %v2471_v18, %v2399_v17  ;;  %v2700_v15 = vmul.f32 0.16666667, %v2668_v2  ;;  %v2504_v21 = vadd.f32 %v2472_v57, %v2400_v8  ;;  %v2056_v56 = vmul.f32 %v5382_v25, %v5672_v9 }
 0x33b   : > { %v2701_v47 = vmul.f32 0.16666667, %v2669_v46  ;;  %v1984_v31 = vadd.f32 %v1952_v27, %v1880_v38  ;;  %v1985_v35 = vadd.f32 %v1953_v1, %v1881_v30  ;;  %v2057_v29 = vmul.f32 %v5382_v25, %v5678_v34 }
 0x33c   : > { %v2542_v24 = vadd.f32 %v5466_v52, %v2503_v42  ;;  %v2543_v26 = vadd.f32 %v5466_v52, %v2504_v21  ;;  %v2160_v41 = vmul.f32 %v5418_v59, %v5680_v39  ;;  %v2161_v33 = vmul.f32 %v5418_v59, %v5682_v61 }
 0x33d   : > { %v2729_v16 = vpack.c.bf16 %v2701_v47, %v2700_v15  ;;  %v2088_v0 = vadd.f32 %v2056_v56, %v1984_v31  ;;  %v2089_v63 = vadd.f32 %v2057_v29, %v1985_v35  ;;  %v2265_v43 = vmul.f32 %v5376_v14, %v5719_v22  ;;  %v5776_v31 = vld [vmem:[#allocation2 + $0x10f] sm:$0xff] }
 0x33e   : > { %v2574_v40 = vadd.f32 3.0, %v2542_v24  ;;  %v2575_v18 = vadd.f32 3.0, %v2543_v26  ;;  %v2266_v57 = vmul.f32 %v5376_v14, %v5724_v36  ;;  %v2369_v44 = vmul.f32 %v5421_v4, %v5726_v48 }
 0x33f   : > { %4141 = vmatmul.mubr.msk.bf16.gmra.mrb[36].mxu1 %vm1485_vm4, %v2729_v16  ;;  %v2370_v60 = vmul.f32 %v5421_v4, %v5728_v54  ;;  %v2192_v5 = vadd.f32 %v2160_v41, %v2088_v0  ;;  %v2193_v49 = vadd.f32 %v2161_v33, %v2089_v63  ;;  %v2473_v50 = vmul.f32 %v5450_v7, %v5735_v37  ;;  %v5784_v41 = vld [vmem:[#allocation2 + $0x110] sm:$0xff]  ;;  %v5790_v63 = vld [vmem:[#allocation8 + $0x6] ss:$0 sm:$0xff] }
 0x340   : > { %v2606_v62 = vmax.f32 %v2574_v40, 0.0  ;;  %v2607_v13 = vmax.f32 %v2575_v18, 0.0  ;;  %v2474_v32 = vmul.f32 %v5450_v7, %v5739_v11  ;;  %v1642_v10 = vmul.f32 %v5697_v19, %v5664_v55  ;;  %v5786_v33 = vld [vmem:[#allocation2 + $0x109] sm:$0xff]  ;;  %v5794_v18 = vld [vmem:[#allocation2 + $0x111] sm:$0xff] }
 0x341   : > { %v1643_v14 = vmul.f32 %v5697_v19, %v5666_v45  ;;  %v2297_v12 = vadd.f32 %v2265_v43, %v2192_v5  ;;  %v2298_v6 = vadd.f32 %v2266_v57, %v2193_v49  ;;  %v1746_v17 = vmul.f32 %v5703_v53, %v5672_v9 }
 0x342   : > { %v2638_v58 = vmin.f32 %v2606_v62, 6.0  ;;  %v2639_v3 = vmin.f32 %v2607_v13, 6.0  ;;  %v1747_v28 = vmul.f32 %v5703_v53, %v5678_v34  ;;  %v1850_v2 = vmul.f32 %v5760_v23, %v5680_v39  ;;  %v5770_v39 = vld [vmem:[#allocation2 + $0x107] sm:$0xff] }
 0x343   : > { %v1851_v55 = vmul.f32 %v5760_v23, %v5682_v61  ;;  %v2401_v45 = vadd.f32 %v2369_v44, %v2297_v12  ;;  %v2402_v8 = vadd.f32 %v2370_v60, %v2298_v6  ;;  %v1778_v27 = vadd.f32 %v1746_v17, %v1642_v10 }
 0x344   : > { %v2670_v46 = vmul.f32 %v2638_v58, %v2542_v24  ;;  %v2671_v42 = vmul.f32 %v2639_v3, %v2543_v26  ;;  %v1779_v38 = vadd.f32 %v1747_v28, %v1643_v14  ;;  %v1954_v9 = vmul.f32 %v5379_v20, %v5719_v22  ;;  %v5782_v26 = vld [vmem:[#allocation2 + $0x108] sm:$0xff] }
 0x345   : > { %v1955_v34 = vmul.f32 %v5379_v20, %v5724_v36  ;;  %v2505_v1 = vadd.f32 %v2473_v50, %v2401_v45  ;;  %v2506_v15 = vadd.f32 %v2474_v32, %v2402_v8  ;;  %v1882_v47 = vadd.f32 %v1850_v2, %v1778_v27 }
 0x346   : > { %v2702_v30 = vmul.f32 0.16666667, %v2670_v46  ;;  %v2703_v21 = vmul.f32 0.16666667, %v2671_v42  ;;  %v1883_v61 = vadd.f32 %v1851_v55, %v1779_v38  ;;  %v2058_v56 = vmul.f32 %v5382_v25, %v5726_v48 }
 0x347   : > { %v2059_v24 = vmul.f32 %v5382_v25, %v5728_v54  ;;  %v2544_v35 = vadd.f32 %v5466_v52, %v2505_v1  ;;  %v2545_v20 = vadd.f32 %v5466_v52, %v2506_v15  ;;  %v1986_v29 = vadd.f32 %v1954_v9, %v1882_v47  ;;  %v5819_v9 = vld [vmem:[#allocation8 + $0x3] ss:$0 sm:$0xff] }
 0x348   : > { %v2162_v16 = vmul.f32 %v5418_v59, %v5735_v37  ;;  %v2730_v40 = vpack.c.bf16 %v2703_v21, %v2702_v30  ;;  %v1987_v0 = vadd.f32 %v1955_v34, %v1883_v61  ;;  %v2163_v25 = vmul.f32 %v5418_v59, %v5739_v11  ;;  %v5825_v47 = vld [vmem:[#allocation2 + $0x127] sm:$0xff] }
 0x349   : > { %v2267_v43 = vmul.f32 %v5790_v63, %v5770_v39  ;;  %v2576_v57 = vadd.f32 3.0, %v2544_v35  ;;  %v2577_v44 = vadd.f32 3.0, %v2545_v20  ;;  %v2090_v60 = vadd.f32 %v2058_v56, %v1986_v29  ;;  %v5827_v61 = vld [vmem:[#allocation8 + $0x4] ss:$0 sm:$0xff] }
 0x34a   : > { %v2268_v62 = vmul.f32 %v5790_v63, %v5776_v31  ;;  %4144 = vmatprep.mubr.msk.bf16.mxu1 %vm1485_vm4, %v2730_v40  ;;  %v2091_v5 = vadd.f32 %v2059_v24, %v1987_v0  ;;  %v2371_v49 = vmul.f32 %v5421_v4, %v5782_v26  ;;  %v2372_v59 = vmul.f32 %v5421_v4, %v5784_v41  ;;  %v5838_v0 = vld [vmem:[#allocation8 + $0x5] ss:$0 sm:$0xff] }
 0x34b   : > { %v2475_v50 = vmul.f32 %v5450_v7, %v5786_v33  ;;  %v2608_v13 = vmax.f32 %v2576_v57, 0.0  ;;  %v2609_v32 = vmax.f32 %v2577_v44, 0.0  ;;  %v2194_v10 = vadd.f32 %v2162_v16, %v2090_v60  ;;  %v5844_v57 = vld [vmem:[#allocation2 + $0x129] sm:$0xff] }
 0x34c   : > { %v2476_v14 = vmul.f32 %v5450_v7, %v5794_v18  ;;  %v2195_v58 = vadd.f32 %v2163_v25, %v2091_v5  ;;  %v1644_v12 = vmul.f32 %v5697_v19, %v5719_v22  ;;  %v1645_v6 = vmul.f32 %v5697_v19, %v5724_v36 }
 0x34d   : > { %v1748_v17 = vmul.f32 %v5703_v53, %v5726_v48  ;;  %v2640_v4 = vmin.f32 %v2608_v13, 6.0  ;;  %v2641_v3 = vmin.f32 %v2609_v32, 6.0  ;;  %v2299_v28 = vadd.f32 %v2267_v43, %v2194_v10  ;;  %v5842_v43 = vld [vmem:[#allocation2 + $0x130] sm:$0xff]  ;;  %v5856_v32 = vld [vmem:[#allocation8 + $0x7] ss:$0 sm:$0xff] }
 0x34e   : > { %v1749_v2 = vmul.f32 %v5703_v53, %v5728_v54  ;;  %v2300_v55 = vadd.f32 %v2268_v62, %v2195_v58  ;;  %v1852_v45 = vmul.f32 %v5760_v23, %v5735_v37  ;;  %v1853_v22 = vmul.f32 %v5760_v23, %v5739_v11 }
 0x34f   : > { %v1780_v46 = vadd.f32 %v1748_v17, %v1644_v12  ;;  %v2672_v8 = vmul.f32 %v2640_v4, %v2544_v35  ;;  %v2673_v27 = vmul.f32 %v2641_v3, %v2545_v20  ;;  %v2403_v36 = vadd.f32 %v2371_v49, %v2299_v28  ;;  %v5833_v35 = vld [vmem:[#allocation2 + $0x12f] sm:$0xff] }
 0x350   : > { %v1781_v42 = vadd.f32 %v1749_v2, %v1645_v6  ;;  %v2404_v38 = vadd.f32 %v2372_v59, %v2300_v55  ;;  %v1956_v34 = vmul.f32 %v5819_v9, %v5770_v39  ;;  %v1957_v54 = vmul.f32 %v5819_v9, %v5776_v31  ;;  %v5835_v20 = vld [vmem:[#allocation2 + $0x128] sm:$0xff]  ;;  %v5851_v49 = vld [vmem:[#allocation2 + $0x131] sm:$0xff] }
 0x351   : > { %v1884_v48 = vadd.f32 %v1852_v45, %v1780_v46  ;;  %v2704_v30 = vmul.f32 0.16666667, %v2672_v8  ;;  %v2705_v1 = vmul.f32 0.16666667, %v2673_v27  ;;  %v2507_v37 = vadd.f32 %v2475_v50, %v2403_v36 }
 0x352   : > { %v1885_v15 = vadd.f32 %v1853_v22, %v1781_v42  ;;  %v2508_v11 = vadd.f32 %v2476_v14, %v2404_v38  ;;  %v2060_v56 = vmul.f32 %v5827_v61, %v5782_v26  ;;  %v2061_v24 = vmul.f32 %v5827_v61, %v5784_v41 }
 0x353   : > { %v1988_v21 = vadd.f32 %v1956_v34, %v1884_v48  ;;  %v2731_v29 = vpack.c.bf16 %v2705_v1, %v2704_v30  ;;  %v2546_v16 = vadd.f32 %v5466_v52, %v2507_v37  ;;  %v2164_v25 = vmul.f32 %v5838_v0, %v5786_v33 }
 0x354   : > { %v1989_v40 = vadd.f32 %v1957_v54, %v1885_v15  ;;  %v2547_v44 = vadd.f32 %v5466_v52, %v2508_v11  ;;  %v2165_v62 = vmul.f32 %v5838_v0, %v5794_v18  ;;  %v2269_v5 = vmul.f32 %v5790_v63, %v5825_v47 }
 0x355   : > { %v2092_v60 = vadd.f32 %v2060_v56, %v1988_v21  ;;  %4145 = vmatmul.mubr.msk.bf16.gmra.mrb[40].mxu1 %vm1485_vm4, %v2731_v29  ;;  %v2578_v59 = vadd.f32 3.0, %v2546_v16  ;;  %v2270_v13 = vmul.f32 %v5790_v63, %v5833_v35  ;;  %v2373_v10 = vmul.f32 %v5856_v32, %v5835_v20  ;;  %v5884_v21 = vld [vmem:[#allocation2 + $0x147] sm:$0xff] }
 0x356   : > { %v2093_v50 = vadd.f32 %v2061_v24, %v1989_v40  ;;  %v2579_v14 = vadd.f32 3.0, %v2547_v44  ;;  %v2374_v12 = vmul.f32 %v5856_v32, %v5842_v43  ;;  %v2477_v6 = vmul.f32 %v5450_v7, %v5844_v57  ;;  %v5891_v40 = vld [vmem:[#allocation2 + $0x148] sm:$0xff] }
 0x357   : > { %v2196_v58 = vadd.f32 %v2164_v25, %v2092_v60  ;;  %v2610_v17 = vmax.f32 %v2578_v59, 0.0  ;;  %v2478_v3 = vmul.f32 %v5450_v7, %v5851_v49  ;;  %v1646_v28 = vmul.f32 %v5697_v19, %v5770_v39  ;;  %v5900_v59 = vld [vmem:[#allocation2 + $0x149] sm:$0xff] }
 0x358   : > { %v2197_v4 = vadd.f32 %v2165_v62, %v2093_v50  ;;  %v2611_v2 = vmax.f32 %v2579_v14, 0.0  ;;  %v1647_v46 = vmul.f32 %v5697_v19, %v5776_v31  ;;  %v1750_v45 = vmul.f32 %v5703_v53, %v5782_v26 }
 0x359   : > { %v2301_v55 = vadd.f32 %v2269_v5, %v2196_v58  ;;  %v2642_v22 = vmin.f32 %v2610_v17, 6.0  ;;  %v1751_v27 = vmul.f32 %v5703_v53, %v5784_v41  ;;  %v1854_v36 = vmul.f32 %v5760_v23, %v5786_v33  ;;  %v5898_v5 = vld [vmem:[#allocation2 + $0x150] sm:$0xff] }
 0x35a   : > { %v2302_v8 = vadd.f32 %v2270_v13, %v2197_v4  ;;  %v2643_v7 = vmin.f32 %v2611_v2, 6.0  ;;  %v1782_v38 = vadd.f32 %v1750_v45, %v1646_v28  ;;  %v1855_v39 = vmul.f32 %v5760_v23, %v5794_v18  ;;  %v5904_v58 = vld [vmem:[#allocation2 + $0x151] sm:$0xff]  ;;  %v5913_v2 = vld [vmem:[#allocation8 + $0x8] ss:$0 sm:$0xff] }
 0x35b   : > { %v2405_v42 = vadd.f32 %v2373_v10, %v2301_v55  ;;  %v2674_v48 = vmul.f32 %v2642_v22, %v2546_v16  ;;  %v1783_v31 = vadd.f32 %v1751_v27, %v1647_v46  ;;  %v1958_v26 = vmul.f32 %v5819_v9, %v5825_v47  ;;  %v5889_v16 = vld [vmem:[#allocation2 + $0x14f] sm:$0xff] }
 0x35c   : > { %v2406_v34 = vadd.f32 %v2374_v12, %v2302_v8  ;;  %v2675_v54 = vmul.f32 %v2643_v7, %v2547_v44  ;;  %v1886_v1 = vadd.f32 %v1854_v36, %v1782_v38  ;;  %v1959_v41 = vmul.f32 %v5819_v9, %v5833_v35 }
 0x35d   : > { %v2509_v30 = vadd.f32 %v2477_v6, %v2405_v42  ;;  %v2706_v37 = vmul.f32 0.16666667, %v2674_v48  ;;  %v1887_v15 = vadd.f32 %v1855_v39, %v1783_v31  ;;  %v2062_v11 = vmul.f32 %v5827_v61, %v5835_v20 }
 0x35e   : > { %v2510_v33 = vadd.f32 %v2478_v3, %v2406_v34  ;;  %v2707_v18 = vmul.f32 0.16666667, %v2675_v54  ;;  %v1990_v24 = vadd.f32 %v1958_v26, %v1886_v1  ;;  %v2063_v29 = vmul.f32 %v5827_v61, %v5842_v43 }
 0x35f   : > { %v2548_v56 = vadd.f32 %v5466_v52, %v2509_v30  ;;  %v1991_v44 = vadd.f32 %v1959_v41, %v1887_v15  ;;  %v2166_v60 = vmul.f32 %v5838_v0, %v5844_v57  ;;  %v2167_v62 = vmul.f32 %v5838_v0, %v5851_v49 }
 0x360   : > { %v2549_v25 = vadd.f32 %v5466_v52, %v2510_v33  ;;  %v2732_v50 = vpack.c.bf16 %v2707_v18, %v2706_v37  ;;  %v2094_v10 = vadd.f32 %v2062_v11, %v1990_v24  ;;  %v2271_v14 = vmul.f32 %v5790_v63, %v5884_v21  ;;  %v5941_v24 = vld [vmem:[#allocation9] ss:$0 sm:$0xff] }
 0x361   : > { %v2580_v13 = vadd.f32 3.0, %v2548_v56  ;;  %v2095_v12 = vadd.f32 %v2063_v29, %v1991_v44  ;;  %v2272_v6 = vmul.f32 %v5790_v63, %v5889_v16  ;;  %v2375_v17 = vmul.f32 %v5856_v32, %v5891_v40 }
 0x362   : > { %v2581_v52 = vadd.f32 3.0, %v2549_v25  ;;  %4148 = vmatprep.mubr.msk.bf16.mxu1 %vm1485_vm4, %v2732_v50  ;;  %v2198_v3 = vadd.f32 %v2166_v60, %v2094_v10  ;;  %v2376_v28 = vmul.f32 %v5856_v32, %v5898_v5  ;;  %v2479_v55 = vmul.f32 %v5913_v2, %v5900_v59  ;;  %v5950_v50 = vld [vmem:[#allocation2 + $0x170] sm:$0xff] }
 0x363   : > { %v2612_v4 = vmax.f32 %v2580_v13, 0.0  ;;  %v2199_v45 = vadd.f32 %v2167_v62, %v2095_v12  ;;  %v2480_v22 = vmul.f32 %v5913_v2, %v5904_v58  ;;  %v1648_v8 = vmul.f32 %v5697_v19, %v5825_v47  ;;  %v5948_v62 = vld [vmem:[#allocation2 + $0x168] sm:$0xff] }
 0x364   : > { %v2613_v46 = vmax.f32 %v2581_v52, 0.0  ;;  %v2303_v36 = vadd.f32 %v2271_v14, %v2198_v3  ;;  %v1649_v7 = vmul.f32 %v5697_v19, %v5833_v35  ;;  %v1752_v42 = vmul.f32 %v5703_v53, %v5835_v20  ;;  %v5955_v12 = vld [vmem:[#allocation2 + $0x169] sm:$0xff] }
 0x365   : > { %v2644_v27 = vmin.f32 %v2612_v4, 6.0  ;;  %v2304_v39 = vadd.f32 %v2272_v6, %v2199_v45  ;;  %v1753_v48 = vmul.f32 %v5703_v53, %v5842_v43  ;;  %v1856_v34 = vmul.f32 %v5760_v23, %v5844_v57  ;;  %v5957_v6 = vld [vmem:[#allocation2 + $0x171] sm:$0xff] }
 0x366   : > { %v2645_v38 = vmin.f32 %v2613_v46, 6.0  ;;  %v2407_v26 = vadd.f32 %v2375_v17, %v2303_v36  ;;  %v1784_v54 = vadd.f32 %v1752_v42, %v1648_v8  ;;  %v1857_v47 = vmul.f32 %v5760_v23, %v5851_v49  ;;  %v5939_v49 = vld [vmem:[#allocation2 + $0x16f] sm:$0xff] }
 0x367   : > { %v2676_v31 = vmul.f32 %v2644_v27, %v2548_v56  ;;  %v2408_v1 = vadd.f32 %v2376_v28, %v2304_v39  ;;  %v1785_v35 = vadd.f32 %v1753_v48, %v1649_v7  ;;  %v1960_v20 = vmul.f32 %v5819_v9, %v5884_v21  ;;  %v5937_v56 = vld [vmem:[#allocation2 + $0x167] sm:$0xff] }
 0x368   : > { %v2677_v30 = vmul.f32 %v2645_v38, %v2549_v25  ;;  %v2511_v37 = vadd.f32 %v2479_v55, %v2407_v26  ;;  %v1888_v33 = vadd.f32 %v1856_v34, %v1784_v54  ;;  %v1961_v43 = vmul.f32 %v5819_v9, %v5889_v16 }
 0x369   : > { %v2708_v41 = vmul.f32 0.16666667, %v2676_v31  ;;  %v2512_v57 = vadd.f32 %v2480_v22, %v2408_v1  ;;  %v1889_v11 = vadd.f32 %v1857_v47, %v1785_v35  ;;  %v2064_v18 = vmul.f32 %v5827_v61, %v5891_v40 }
 0x36a   : > { %v2709_v15 = vmul.f32 0.16666667, %v2677_v30  ;;  %v2550_v29 = vadd.f32 %v5941_v24, %v2511_v37  ;;  %v1992_v25 = vadd.f32 %v1960_v20, %v1888_v33  ;;  %v2065_v44 = vmul.f32 %v5827_v61, %v5898_v5 }
 0x36b   : > { %v2168_v60 = vmul.f32 %v5838_v0, %v5900_v59  ;;  %v2551_v10 = vadd.f32 %v5941_v24, %v2512_v57  ;;  %v1993_v14 = vadd.f32 %v1961_v43, %v1889_v11  ;;  %v2169_v52 = vmul.f32 %v5838_v0, %v5904_v58 }
 0x36c   : > { %v2733_v13 = vpack.c.bf16 %v2709_v15, %v2708_v41  ;;  %v2582_v17 = vadd.f32 3.0, %v2550_v29  ;;  %v2096_v4 = vadd.f32 %v2064_v18, %v1992_v25  ;;  %v2273_v3 = vmul.f32 %v5790_v63, %v5937_v56 }
 0x36d   : > { %v2274_v28 = vmul.f32 %v5790_v63, %v5939_v49  ;;  %v2583_v55 = vadd.f32 3.0, %v2551_v10  ;;  %v2097_v46 = vadd.f32 %v2065_v44, %v1993_v14  ;;  %v2377_v45 = vmul.f32 %v5856_v32, %v5948_v62  ;;  %v5994_v44 = vld [vmem:[#allocation2 + $0x18f] sm:$0xff] }
 0x36e   : > { %4149 = vmatmul.mubr.msk.bf16.gmra.mrb[44].mxu1 %vm1485_vm4, %v2733_v13  ;;  %v2378_v22 = vmul.f32 %v5856_v32, %v5950_v50  ;;  %v2614_v8 = vmax.f32 %v2582_v17, 0.0  ;;  %v2200_v27 = vadd.f32 %v2168_v60, %v2096_v4  ;;  %v2481_v36 = vmul.f32 %v5913_v2, %v5955_v12  ;;  %v6001_v17 = vld [vmem:[#allocation2 + $0x190] sm:$0xff] }
 0x36f   : > { %v2482_v7 = vmul.f32 %v5913_v2, %v5957_v6  ;;  %v2615_v42 = vmax.f32 %v2583_v55, 0.0  ;;  %v2201_v38 = vadd.f32 %v2169_v52, %v2097_v46  ;;  %v1650_v39 = vmul.f32 %v5697_v19, %v5884_v21  ;;  %v5999_v52 = vld [vmem:[#allocation2 + $0x188] sm:$0xff] }
 0x370   : > { %v1651_v48 = vmul.f32 %v5697_v19, %v5889_v16  ;;  %v2646_v34 = vmin.f32 %v2614_v8, 6.0  ;;  %v2305_v31 = vadd.f32 %v2273_v3, %v2200_v27  ;;  %v1754_v26 = vmul.f32 %v5703_v53, %v5891_v40  ;;  %v6003_v4 = vld [vmem:[#allocation2 + $0x189] sm:$0xff] }
 0x371   : > { %v1755_v54 = vmul.f32 %v5703_v53, %v5898_v5  ;;  %v2647_v47 = vmin.f32 %v2615_v42, 6.0  ;;  %v2306_v30 = vadd.f32 %v2274_v28, %v2201_v38  ;;  %v1858_v1 = vmul.f32 %v5760_v23, %v5900_v59  ;;  %v5988_v59 = vld [vmem:[#allocation2 + $0x187] sm:$0xff] }
 0x372   : > { %v1859_v35 = vmul.f32 %v5760_v23, %v5904_v58  ;;  %v2678_v21 = vmul.f32 %v2646_v34, %v2550_v29  ;;  %v2409_v20 = vadd.f32 %v2377_v45, %v2305_v31  ;;  %v1786_v41 = vadd.f32 %v1754_v26, %v1650_v39  ;;  %v6010_v45 = vld [vmem:[#allocation2 + $0x191] sm:$0xff] }
 0x373   : > { %v1787_v16 = vadd.f32 %v1755_v54, %v1651_v48  ;;  %v2679_v37 = vmul.f32 %v2647_v47, %v2551_v10  ;;  %v2410_v33 = vadd.f32 %v2378_v22, %v2306_v30  ;;  %v1962_v40 = vmul.f32 %v5819_v9, %v5937_v56 }
 0x374   : > { %v1963_v5 = vmul.f32 %v5819_v9, %v5939_v49  ;;  %v2710_v43 = vmul.f32 0.16666667, %v2678_v21  ;;  %v2513_v15 = vadd.f32 %v2481_v36, %v2409_v20  ;;  %v1890_v57 = vadd.f32 %v1858_v1, %v1786_v41 }
 0x375   : > { %v1891_v11 = vadd.f32 %v1859_v35, %v1787_v16  ;;  %v2711_v18 = vmul.f32 0.16666667, %v2679_v37  ;;  %v2514_v58 = vadd.f32 %v2482_v7, %v2410_v33  ;;  %v2066_v29 = vmul.f32 %v5827_v61, %v5948_v62 }
 0x376   : > { %v2067_v25 = vmul.f32 %v5827_v61, %v5950_v50  ;;  %v2552_v60 = vadd.f32 %v5941_v24, %v2513_v15  ;;  %v1994_v13 = vadd.f32 %v1962_v40, %v1890_v57  ;;  %v2170_v14 = vmul.f32 %v5838_v0, %v5955_v12 }
 0x377   : > { %v1995_v10 = vadd.f32 %v1963_v5, %v1891_v11  ;;  %v2734_v3 = vpack.c.bf16 %v2711_v18, %v2710_v43  ;;  %v2553_v28 = vadd.f32 %v5941_v24, %v2514_v58  ;;  %v2171_v55 = vmul.f32 %v5838_v0, %v5957_v6 }
 0x378   : > { %v2275_v46 = vmul.f32 %v5790_v63, %v5988_v59  ;;  %v2584_v22 = vadd.f32 3.0, %v2552_v60  ;;  %v2098_v8 = vadd.f32 %v2066_v29, %v1994_v13  ;;  %v2276_v36 = vmul.f32 %v5790_v63, %v5994_v44 }
 0x379   : > { %v2099_v27 = vadd.f32 %v2067_v25, %v1995_v10  ;;  %4152 = vmatprep.mubr.msk.bf16.mxu1 %vm1485_vm4, %v2734_v3  ;;  %v2585_v7 = vadd.f32 3.0, %v2553_v28  ;;  %v2379_v42 = vmul.f32 %v5856_v32, %v5999_v52  ;;  %v2380_v38 = vmul.f32 %v5856_v32, %v6001_v17  ;;  %v6045_v10 = vld [vmem:[#allocation2 + $0x1af] sm:$0xff] }
 0x37a   : > { %v2483_v39 = vmul.f32 %v5913_v2, %v6003_v4  ;;  %v2616_v48 = vmax.f32 %v2584_v22, 0.0  ;;  %v2202_v34 = vadd.f32 %v2170_v14, %v2098_v8  ;;  %v2484_v26 = vmul.f32 %v5913_v2, %v6010_v45  ;;  %v6053_v22 = vld [vmem:[#allocation2 + $0x1b0] sm:$0xff] }
 0x37b   : > { %v2203_v31 = vadd.f32 %v2171_v55, %v2099_v27  ;;  %v2617_v54 = vmax.f32 %v2585_v7, 0.0  ;;  %v1652_v47 = vmul.f32 %v5697_v19, %v5937_v56  ;;  %v1653_v30 = vmul.f32 %v5697_v19, %v5939_v49  ;;  %v6055_v8 = vld [vmem:[#allocation2 + $0x1a9] sm:$0xff] }
 0x37c   : > { %v1756_v1 = vmul.f32 %v5703_v53, %v5948_v62  ;;  %v2648_v35 = vmin.f32 %v2616_v48, 6.0  ;;  %v2307_v21 = vadd.f32 %v2275_v46, %v2202_v34  ;;  %v1757_v41 = vmul.f32 %v5703_v53, %v5950_v50  ;;  %v6051_v46 = vld [vmem:[#allocation2 + $0x1a8] sm:$0xff] }
 0x37d   : > { %v2308_v20 = vadd.f32 %v2276_v36, %v2203_v31  ;;  %v2649_v16 = vmin.f32 %v2617_v54, 6.0  ;;  %v1860_v33 = vmul.f32 %v5760_v23, %v5955_v12  ;;  %v1861_v56 = vmul.f32 %v5760_v23, %v5957_v6  ;;  %v6039_v12 = vld [vmem:[#allocation2 + $0x1a7] sm:$0xff] }
 0x37e   : > { %v1788_v37 = vadd.f32 %v1756_v1, %v1652_v47  ;;  %v2680_v40 = vmul.f32 %v2648_v35, %v2552_v60  ;;  %v2411_v5 = vadd.f32 %v2379_v42, %v2307_v21  ;;  %v1789_v43 = vadd.f32 %v1757_v41, %v1653_v30 }
 0x37f   : > { %v2412_v49 = vadd.f32 %v2380_v38, %v2308_v20  ;;  %v2681_v15 = vmul.f32 %v2649_v16, %v2553_v28  ;;  %v1964_v57 = vmul.f32 %v5819_v9, %v5988_v59  ;;  %v1965_v50 = vmul.f32 %v5819_v9, %v5994_v44  ;;  %v6061_v38 = vld [vmem:[#allocation2 + $0x1b1] sm:$0xff] }
 0x380   : > { %v1892_v62 = vadd.f32 %v1860_v33, %v1788_v37  ;;  %v2712_v11 = vmul.f32 0.16666667, %v2680_v40  ;;  %v2515_v18 = vadd.f32 %v2483_v39, %v2411_v5  ;;  %v1893_v29 = vadd.f32 %v1861_v56, %v1789_v43 }
 0x381   : > { %v2516_v58 = vadd.f32 %v2484_v26, %v2412_v49  ;;  %v2713_v25 = vmul.f32 0.16666667, %v2681_v15  ;;  %v2068_v60 = vmul.f32 %v5827_v61, %v5999_v52  ;;  %v2069_v13 = vmul.f32 %v5827_v61, %v6001_v17 }
 0x382   : > { %v1996_v6 = vadd.f32 %v1964_v57, %v1892_v62  ;;  %v2554_v14 = vadd.f32 %v5941_v24, %v2515_v18  ;;  %v1997_v28 = vadd.f32 %v1965_v50, %v1893_v29  ;;  %v2172_v55 = vmul.f32 %v5838_v0, %v6003_v4 }
 0x383   : > { %v2555_v3 = vadd.f32 %v5941_v24, %v2516_v58  ;;  %v2735_v27 = vpack.c.bf16 %v2713_v25, %v2712_v11  ;;  %v2173_v7 = vmul.f32 %v5838_v0, %v6010_v45  ;;  %v2277_v42 = vmul.f32 %v5790_v63, %v6039_v12 }
 0x384   : > { %v2100_v36 = vadd.f32 %v2068_v60, %v1996_v6  ;;  %v2586_v39 = vadd.f32 3.0, %v2554_v14  ;;  %v2101_v34 = vadd.f32 %v2069_v13, %v1997_v28  ;;  %v2278_v31 = vmul.f32 %v5790_v63, %v6045_v10  ;;  %v6097_v28 = vld [vmem:[#allocation2 + $0x1cf] sm:$0xff] }
 0x385   : > { %v2587_v48 = vadd.f32 3.0, %v2555_v3  ;;  %4153 = vmatmul.mubr.msk.bf16.gmra.mrb[48].mxu1 %vm1485_vm4, %v2735_v27  ;;  %v2381_v54 = vmul.f32 %v5856_v32, %v6051_v46  ;;  %v2382_v47 = vmul.f32 %v5856_v32, %v6053_v22  ;;  %v2485_v30 = vmul.f32 %v5913_v2, %v6055_v8 }
 0x386   : > { %v2204_v26 = vadd.f32 %v2172_v55, %v2100_v36  ;;  %v2618_v1 = vmax.f32 %v2586_v39, 0.0  ;;  %v2205_v21 = vadd.f32 %v2173_v7, %v2101_v34  ;;  %v2486_v20 = vmul.f32 %v5913_v2, %v6061_v38  ;;  %v6099_v55 = vld [vmem:[#allocation2 + $0x1c8] sm:$0xff]  ;;  %v6104_v39 = vld [vmem:[#allocation2 + $0x1d0] sm:$0xff] }
 0x387   : > { %v2619_v35 = vmax.f32 %v2587_v48, 0.0  ;;  %v1654_v16 = vmul.f32 %v5697_v19, %v5988_v59  ;;  %v1655_v37 = vmul.f32 %v5697_v19, %v5994_v44  ;;  %v1758_v33 = vmul.f32 %v5703_v53, %v5999_v52  ;;  %v6106_v48 = vld [vmem:[#allocation2 + $0x1c9] sm:$0xff] }
 0x388   : > { %v2309_v41 = vadd.f32 %v2277_v42, %v2204_v26  ;;  %v2650_v56 = vmin.f32 %v2618_v1, 6.0  ;;  %v2310_v5 = vadd.f32 %v2278_v31, %v2205_v21  ;;  %v1759_v49 = vmul.f32 %v5703_v53, %v6001_v17 }
 0x389   : > { %v2651_v40 = vmin.f32 %v2619_v35, 6.0  ;;  %v1790_v15 = vadd.f32 %v1758_v33, %v1654_v16  ;;  %v1862_v62 = vmul.f32 %v5760_v23, %v6003_v4  ;;  %v1863_v59 = vmul.f32 %v5760_v23, %v6010_v45  ;;  %v6090_v4 = vld [vmem:[#allocation2 + $0x1c7] sm:$0xff] }
 0x38a   : > { %v2413_v43 = vadd.f32 %v2381_v54, %v2309_v41  ;;  %v2682_v57 = vmul.f32 %v2650_v56, %v2554_v14  ;;  %v2414_v44 = vadd.f32 %v2382_v47, %v2310_v5  ;;  %v1791_v11 = vadd.f32 %v1759_v49, %v1655_v37  ;;  %v6112_v47 = vld [vmem:[#allocation2 + $0x1d1] sm:$0xff] }
 0x38b   : > { %v2683_v50 = vmul.f32 %v2651_v40, %v2555_v3  ;;  %v1894_v52 = vadd.f32 %v1862_v62, %v1790_v15  ;;  %v1966_v58 = vmul.f32 %v5819_v9, %v6039_v12  ;;  %v1967_v17 = vmul.f32 %v5819_v9, %v6045_v10 }
 0x38c   : > { %v2517_v18 = vadd.f32 %v2485_v30, %v2413_v43  ;;  %v2714_v29 = vmul.f32 0.16666667, %v2682_v57  ;;  %v2518_v6 = vadd.f32 %v2486_v20, %v2414_v44  ;;  %v1895_v60 = vadd.f32 %v1863_v59, %v1791_v11 }
 0x38d   : > { %v2715_v25 = vmul.f32 0.16666667, %v2683_v50  ;;  %v1998_v13 = vadd.f32 %v1966_v58, %v1894_v52  ;;  %v2070_v14 = vmul.f32 %v5827_v61, %v6051_v46  ;;  %v2071_v3 = vmul.f32 %v5827_v61, %v6053_v22 }
 0x38e   : > { %v2556_v45 = vadd.f32 %v5941_v24, %v2517_v18  ;;  %v2557_v36 = vadd.f32 %v5941_v24, %v2518_v6  ;;  %v1999_v7 = vadd.f32 %v1967_v17, %v1895_v60  ;;  %v2174_v42 = vmul.f32 %v5838_v0, %v6055_v8 }
 0x38f   : > { %v2736_v27 = vpack.c.bf16 %v2715_v25, %v2714_v29  ;;  %v2102_v31 = vadd.f32 %v2070_v14, %v1998_v13  ;;  %v2175_v26 = vmul.f32 %v5838_v0, %v6061_v38  ;;  %v2279_v54 = vmul.f32 %v5790_v63, %v6090_v4  ;;  %v6143_v14 = vld [vmem:[#allocation2 + $0x1e7] sm:$0xff] }
 0x390   : > { %v2588_v34 = vadd.f32 3.0, %v2556_v45  ;;  %v2589_v30 = vadd.f32 3.0, %v2557_v36  ;;  %v2103_v1 = vadd.f32 %v2071_v3, %v1999_v7  ;;  %v2280_v35 = vmul.f32 %v5790_v63, %v6097_v28 }
 0x391   : > { %4156 = vmatprep.mubr.msk.bf16.mxu1 %vm1485_vm4, %v2736_v27  ;;  %v2383_v21 = vmul.f32 %v5856_v32, %v6099_v55  ;;  %v2206_v41 = vadd.f32 %v2174_v42, %v2102_v31  ;;  %v2384_v16 = vmul.f32 %v5856_v32, %v6104_v39  ;;  %v2487_v37 = vmul.f32 %v5913_v2, %v6106_v48  ;;  %v6152_v42 = vld [vmem:[#allocation2 + $0x1e8] sm:$0xff] }
 0x392   : > { %v2620_v20 = vmax.f32 %v2588_v34, 0.0  ;;  %v2621_v33 = vmax.f32 %v2589_v30, 0.0  ;;  %v2207_v56 = vadd.f32 %v2175_v26, %v2103_v1  ;;  %v2488_v40 = vmul.f32 %v5913_v2, %v6112_v47  ;;  %v6154_v34 = vld [vmem:[#allocation2 + $0x1f0] sm:$0xff] }
 0x393   : > { %v1656_v5 = vmul.f32 %v5697_v19, %v6039_v12  ;;  %v2311_v43 = vadd.f32 %v2279_v54, %v2206_v41  ;;  %v1657_v15 = vmul.f32 %v5697_v19, %v6045_v10  ;;  %v1760_v62 = vmul.f32 %v5703_v53, %v6051_v46  ;;  %v6159_v1 = vld [vmem:[#allocation2 + $0x1e9] sm:$0xff] }
 0x394   : > { %v2652_v49 = vmin.f32 %v2620_v20, 6.0  ;;  %v2653_v59 = vmin.f32 %v2621_v33, 6.0  ;;  %v2312_v57 = vadd.f32 %v2280_v35, %v2207_v56  ;;  %v1761_v50 = vmul.f32 %v5703_v53, %v6053_v22  ;;  %v6161_v35 = vld [vmem:[#allocation2 + $0x1f1] sm:$0xff] }
 0x395   : > { %v1864_v44 = vmul.f32 %v5760_v23, %v6055_v8  ;;  %v2415_v18 = vadd.f32 %v2383_v21, %v2311_v43  ;;  %v1792_v52 = vadd.f32 %v1760_v62, %v1656_v5  ;;  %v1865_v12 = vmul.f32 %v5760_v23, %v6061_v38  ;;  %v6145_v38 = vld [vmem:[#allocation2 + $0x1ef] sm:$0xff] }
 0x396   : > { %v2684_v11 = vmul.f32 %v2652_v49, %v2556_v45  ;;  %v2685_v58 = vmul.f32 %v2653_v59, %v2557_v36  ;;  %v2416_v17 = vadd.f32 %v2384_v16, %v2312_v57  ;;  %v1793_v10 = vadd.f32 %v1761_v50, %v1657_v15 }
 0x397   : > { %v1968_v46 = vmul.f32 %v5819_v9, %v6090_v4  ;;  %v2519_v25 = vadd.f32 %v2487_v37, %v2415_v18  ;;  %v1896_v6 = vadd.f32 %v1864_v44, %v1792_v52  ;;  %v1969_v22 = vmul.f32 %v5819_v9, %v6097_v28 }
 0x398   : > { %v2716_v29 = vmul.f32 0.16666667, %v2684_v11  ;;  %v2717_v60 = vmul.f32 0.16666667, %v2685_v58  ;;  %v2520_v8 = vadd.f32 %v2488_v40, %v2416_v17  ;;  %v1897_v45 = vadd.f32 %v1865_v12, %v1793_v10 }
 0x399   : > { %v2072_v13 = vmul.f32 %v5827_v61, %v6099_v55  ;;  %v2558_v3 = vadd.f32 %v5941_v24, %v2519_v25  ;;  %v2000_v27 = vadd.f32 %v1968_v46, %v1896_v6  ;;  %v2073_v36 = vmul.f32 %v5827_v61, %v6104_v39 }
 0x39a   : > { %v2176_v7 = vmul.f32 %v5838_v0, %v6106_v48  ;;  %v2737_v31 = vpack.c.bf16 %v2717_v60, %v2716_v29  ;;  %v2559_v26 = vadd.f32 %v5941_v24, %v2520_v8  ;;  %v2001_v54 = vadd.f32 %v1969_v22, %v1897_v45 }
 0x39b   : > { %v2177_v30 = vmul.f32 %v5838_v0, %v6112_v47  ;;  %v2590_v21 = vadd.f32 3.0, %v2558_v3  ;;  %v2104_v20 = vadd.f32 %v2072_v13, %v2000_v27  ;;  %v2281_v41 = vmul.f32 %v5790_v63, %v6143_v14 }
 0x39c   : > { %v2282_v16 = vmul.f32 %v5790_v63, %v6145_v38  ;;  %4157 = vmatmul.mubr.msk.bf16.gmra.mrb[52].mxu1 %vm1485_vm4, %v2737_v31  ;;  %v2591_v37 = vadd.f32 3.0, %v2559_v26  ;;  %v2105_v33 = vadd.f32 %v2073_v36, %v2001_v54  ;;  %v2385_v56 = vmul.f32 %v5856_v32, %v6152_v42  ;;  %v2348_v54 = vld [vmem:[#allocation2 + $0x210] sm:$0xff] }
 0x39d   : > { %v2386_v40 = vmul.f32 %v5856_v32, %v6154_v34  ;;  %v2622_v5 = vmax.f32 %v2590_v21, 0.0  ;;  %v2208_v49 = vadd.f32 %v2176_v7, %v2104_v20  ;;  %v2489_v43 = vmul.f32 %v5913_v2, %v6159_v1 }
 0x39e   : > { %v2490_v15 = vmul.f32 %v5913_v2, %v6161_v35  ;;  %v2623_v62 = vmax.f32 %v2591_v37, 0.0  ;;  %v2209_v59 = vadd.f32 %v2177_v30, %v2105_v33  ;;  %v1658_v57 = vmul.f32 %v5697_v19, %v6090_v4  ;;  %v2451_v30 = vld [vmem:[#allocation2 + $0x209] sm:$0xff]  ;;  %v2452_v37 = vld [vmem:[#allocation2 + $0x211] sm:$0xff] }
 0x39f   : > { %v1659_v50 = vmul.f32 %v5697_v19, %v6097_v28  ;;  %v2654_v44 = vmin.f32 %v2622_v5, 6.0  ;;  %v2313_v11 = vadd.f32 %v2281_v41, %v2208_v49  ;;  %v1762_v18 = vmul.f32 %v5703_v53, %v6099_v55 }
 0x3a0   : > { %v1763_v52 = vmul.f32 %v5703_v53, %v6104_v39  ;;  %v2655_v12 = vmin.f32 %v2623_v62, 6.0  ;;  %v2314_v58 = vadd.f32 %v2282_v16, %v2209_v59  ;;  %v1866_v17 = vmul.f32 %v5760_v23, %v6106_v48  ;;  %v2243_v48 = vld [vmem:[#allocation2 + $0x207] sm:$0xff] }
 0x3a1   : > { %v1867_v10 = vmul.f32 %v5760_v23, %v6112_v47  ;;  %v2686_v4 = vmul.f32 %v2654_v44, %v2558_v3  ;;  %v2417_v46 = vadd.f32 %v2385_v56, %v2313_v11  ;;  %v1794_v29 = vadd.f32 %v1762_v18, %v1658_v57  ;;  %v2244_v3 = vld [vmem:[#allocation2 + $0x20f] sm:$0xff]  ;;  %v4386_v18 = vld [vmem:[#allocation8] ss:$0 sm:$0xff] }
 0x3a2   : > { %v1795_v19 = vadd.f32 %v1763_v52, %v1659_v50  ;;  %v2687_v28 = vmul.f32 %v2655_v12, %v2559_v26  ;;  %v2418_v25 = vadd.f32 %v2386_v40, %v2314_v58  ;;  %v1970_v55 = vmul.f32 %v5819_v9, %v6143_v14  ;;  %v2347_v26 = vld [vmem:[#allocation2 + $0x208] sm:$0xff]  ;;  %v4387_v58 = vld [vmem:[#allocation8 + $0x1] ss:$0 sm:$0xff] }
 0x3a3   : > { %v1971_v53 = vmul.f32 %v5819_v9, %v6145_v38  ;;  %v2718_v39 = vmul.f32 0.16666667, %v2686_v4  ;;  %v2521_v6 = vadd.f32 %v2489_v43, %v2417_v46  ;;  %v1898_v22 = vadd.f32 %v1866_v17, %v1794_v29 }
 0x3a4   : > { %v1899_v60 = vadd.f32 %v1867_v10, %v1795_v19  ;;  %v2719_v8 = vmul.f32 0.16666667, %v2687_v28  ;;  %v2522_v45 = vadd.f32 %v2490_v15, %v2418_v25  ;;  %v2074_v47 = vmul.f32 %v5827_v61, %v6152_v42 }
 0x3a5   : > { %v2075_v13 = vmul.f32 %v5827_v61, %v6154_v34  ;;  %v2560_v27 = vadd.f32 %v5941_v24, %v2521_v6  ;;  %v2002_v36 = vadd.f32 %v1970_v55, %v1898_v22  ;;  %v2178_v31 = vmul.f32 %v5838_v0, %v6159_v1 }
 0x3a6   : > { %v2003_v7 = vadd.f32 %v1971_v53, %v1899_v60  ;;  %v2738_v21 = vpack.c.bf16 %v2719_v8, %v2718_v39  ;;  %v2561_v20 = vadd.f32 %v5941_v24, %v2522_v45  ;;  %v2179_v41 = vmul.f32 %v5838_v0, %v6161_v35 }
 0x3a7   : > { %v2283_v16 = vmul.f32 %v5790_v63, %v2243_v48  ;;  %v2592_v33 = vadd.f32 3.0, %v2560_v27  ;;  %v2106_v56 = vadd.f32 %v2074_v47, %v2002_v36  ;;  %v2284_v5 = vmul.f32 %v5790_v63, %v2244_v3 }
 0x3a8   : > { %v2107_v40 = vadd.f32 %v2075_v13, %v2003_v7  ;;  %4160 = vmatprep.mubr.msk.bf16.mxu1 %vm1485_vm4, %v2738_v21  ;;  %v2593_v49 = vadd.f32 3.0, %v2561_v20  ;;  %v2387_v43 = vmul.f32 %v5856_v32, %v2347_v26  ;;  %v2388_v15 = vmul.f32 %v5856_v32, %v2348_v54  ;;  %v2245_v13 = vld [vmem:[#allocation2 + $0x227] sm:$0xff] }
 0x3a9   : > { %v2491_v62 = vmul.f32 %v5913_v2, %v2451_v30  ;;  %v2624_v59 = vmax.f32 %v2592_v33, 0.0  ;;  %v2210_v57 = vadd.f32 %v2178_v31, %v2106_v56  ;;  %v2492_v44 = vmul.f32 %v5913_v2, %v2452_v37  ;;  %v2350_v33 = vld [vmem:[#allocation2 + $0x230] sm:$0xff] }
 0x3aa   : > { %v2211_v50 = vadd.f32 %v2179_v41, %v2107_v40  ;;  %v2625_v11 = vmax.f32 %v2593_v49, 0.0  ;;  %v1660_v52 = vmul.f32 %v4386_v18, %v6143_v14  ;;  %v1661_v12 = vmul.f32 %v4386_v18, %v6145_v38  ;;  %v2453_v56 = vld [vmem:[#allocation2 + $0x229] sm:$0xff] }
 0x3ab   : > { %v1764_v17 = vmul.f32 %v4387_v58, %v6152_v42  ;;  %v2656_v10 = vmin.f32 %v2624_v59, 6.0  ;;  %v2315_v4 = vadd.f32 %v2283_v16, %v2210_v57  ;;  %v1765_v29 = vmul.f32 %v4387_v58, %v6154_v34 }
 0x3ac   : > { %v2316_v46 = vadd.f32 %v2284_v5, %v2211_v50  ;;  %v2657_v19 = vmin.f32 %v2625_v11, 6.0  ;;  %v1868_v25 = vmul.f32 %v5760_v23, %v6159_v1  ;;  %v1869_v55 = vmul.f32 %v5760_v23, %v6161_v35  ;;  %v2246_v35 = vld [vmem:[#allocation2 + $0x22f] sm:$0xff] }
 0x3ad   : > { %v1796_v28 = vadd.f32 %v1764_v17, %v1660_v52  ;;  %v2688_v53 = vmul.f32 %v2656_v10, %v2560_v27  ;;  %v2419_v14 = vadd.f32 %v2387_v43, %v2315_v4  ;;  %v1797_v38 = vadd.f32 %v1765_v29, %v1661_v12 }
 0x3ae   : > { %v2420_v39 = vadd.f32 %v2388_v15, %v2316_v46  ;;  %v2689_v6 = vmul.f32 %v2657_v19, %v2561_v20  ;;  %v1972_v42 = vmul.f32 %v5819_v9, %v2243_v48  ;;  %v1973_v60 = vmul.f32 %v5819_v9, %v2244_v3  ;;  %v2349_v9 = vld [vmem:[#allocation2 + $0x228] sm:$0xff]  ;;  %v2454_v15 = vld [vmem:[#allocation2 + $0x231] sm:$0xff] }
 0x3af   : > { %v1900_v22 = vadd.f32 %v1868_v25, %v1796_v28  ;;  %v2720_v8 = vmul.f32 0.16666667, %v2688_v53  ;;  %v2523_v34 = vadd.f32 %v2491_v62, %v2419_v14  ;;  %v1901_v47 = vadd.f32 %v1869_v55, %v1797_v38 }
 0x3b0   : > { %v2524_v45 = vadd.f32 %v2492_v44, %v2420_v39  ;;  %v2721_v36 = vmul.f32 0.16666667, %v2689_v6  ;;  %v2076_v7 = vmul.f32 %v5827_v61, %v2347_v26  ;;  %v2077_v23 = vmul.f32 %v5827_v61, %v2348_v54  ;;  %v2986_v61 = vld [vmem:[%s6702_s9] sm:$0xff] }
 0x3b1   : > { %v2004_v1 = vadd.f32 %v1972_v42, %v1900_v22  ;;  %v2562_v27 = vadd.f32 %v5941_v24, %v2523_v34  ;;  %v2005_v21 = vadd.f32 %v1973_v60, %v1901_v47  ;;  %v2180_v48 = vmul.f32 %v5838_v0, %v2451_v30  ;;  %v2987_v30 = vld [vmem:[%s6702_s9 + $0x8] sm:$0xff] }
 0x3b2   : > { %v2563_v31 = vadd.f32 %v5941_v24, %v2524_v45  ;;  %v2739_v3 = vpack.c.bf16 %v2721_v36, %v2720_v8  ;;  %v2181_v41 = vmul.f32 %v5838_v0, %v2452_v37  ;;  %v2285_v16 = vmul.f32 %v5790_v63, %v2245_v13  ;;  %v2988_v0 = vld [vmem:[%s6702_s9 + $0x10] sm:$0xff]  ;;  %v2989_v37 = vld [vmem:[%s6702_s9 + $0x18] sm:$0xff] }
 0x3b3   : > { %v2108_v20 = vadd.f32 %v2076_v7, %v2004_v1  ;;  %v2594_v26 = vadd.f32 3.0, %v2562_v27  ;;  %v2109_v40 = vadd.f32 %v2077_v23, %v2005_v21  ;;  %v2286_v5 = vmul.f32 %v5790_v63, %v2246_v35 }
 0x3b4   : > { %v2595_v54 = vadd.f32 3.0, %v2563_v31  ;;  %4161 = vmatmul.mubr.msk.bf16.gmra.mrb[56].mxu1 %vm1485_vm4, %v2739_v3  ;;  %v2389_v43 = vmul.f32 %v5856_v32, %v2349_v9  ;;  %v2390_v57 = vmul.f32 %v5856_v32, %v2350_v33  ;;  %v2493_v44 = vmul.f32 %v5913_v2, %v2453_v56 }
 0x3b5   : > { %v2212_v49 = vadd.f32 %v2180_v48, %v2108_v20  ;;  %v2626_v62 = vmax.f32 %v2594_v26, 0.0  ;;  %v2213_v59 = vadd.f32 %v2181_v41, %v2109_v40  ;;  %v2990_v11 = vpack.c.bf16 %v2987_v30, %v2986_v61 }
 0x3b6   : > { %v2627_v63 = vmax.f32 %v2595_v54, 0.0  ;;  %v2991_v18 = vpack.c.bf16 %v2989_v37, %v2988_v0  ;;  %v2494_v17 = vmul.f32 %v5913_v2, %v2454_v15 }
 0x3b7   : > { %v2317_v50 = vadd.f32 %v2285_v16, %v2212_v49  ;;  %v2658_v52 = vmin.f32 %v2626_v62, 6.0  ;;  %v2318_v58 = vadd.f32 %v2286_v5, %v2213_v59  ;;  %4168 = vmatprep.subr.bf16.mxu0 %v2990_v11 }
 0x3b8   : > { %v2659_v12 = vmin.f32 %v2627_v63, 6.0  ;;  %4169 = vmatpush3.bf16.msra.mxu0 %v2990_v11 }
 0x3b9   : > { %v2421_v10 = vadd.f32 %v2389_v43, %v2317_v50  ;;  %v2690_v4 = vmul.f32 %v2658_v52, %v2562_v27  ;;  %v2422_v29 = vadd.f32 %v2390_v57, %v2318_v58  ;;  %4170 = vmatprep.subr.bf16.mxu0 %v2991_v18 }
 0x3ba   : > { %v2691_v46 = vmul.f32 %v2659_v12, %v2563_v31 }
 0x3bb   : > { %v2525_v19 = vadd.f32 %v2493_v44, %v2421_v10  ;;  %v2722_v28 = vmul.f32 0.16666667, %v2690_v4  ;;  %v2526_v25 = vadd.f32 %v2494_v17, %v2422_v29 }
 0x3bc   : > { %v2723_v32 = vmul.f32 0.16666667, %v2691_v46  ;;  %4171 = vmatpush3.bf16.msra.mxu0 %v2991_v18 }
 0x3bd   : > { %v2564_v55 = vadd.f32 %v5941_v24, %v2525_v19  ;;  %v2565_v14 = vadd.f32 %v5941_v24, %v2526_v25  ;;  %4224 = vmatprep.subr.bf16.mxu0 %v4707_v51  ;;  %v6249_v24 = vld [vmem:[#allocation11] ss:$0 sm:$0xff] }
 0x3be   : > { %v2740_v53 = vpack.c.bf16 %v2723_v32, %v2722_v28 }
 0x3bf   : > { %v2596_v39 = vadd.f32 3.0, %v2564_v55  ;;  %v2597_v2 = vadd.f32 3.0, %v2565_v14 }
 0x3c0   : > { %4164 = vmatprep.mubr.msk.bf16.mxu1 %vm1485_vm4, %v2740_v53 }
 0x3c1   : > { %v2628_v38 = vmax.f32 %v2596_v39, 0.0  ;;  %v2629_v6 = vmax.f32 %v2597_v2, 0.0 }
 0x3c3   : > { %v2660_v22 = vmin.f32 %v2628_v38, 6.0  ;;  %v2661_v42 = vmin.f32 %v2629_v6, 6.0 }
 0x3c5   : > { %v2692_v60 = vmul.f32 %v2660_v22, %v2564_v55  ;;  %v2693_v8 = vmul.f32 %v2661_v42, %v2565_v14 }
 0x3c7   : > { %v2724_v34 = vmul.f32 0.16666667, %v2692_v60  ;;  %v2725_v45 = vmul.f32 0.16666667, %v2693_v8 }
 0x3c9   : > { %v2741_v47 = vpack.c.bf16 %v2725_v45, %v2724_v34 }
 0x3cb   : > { %4165 = vmatmul.mubr.msk.bf16.gmra.mrb[60].mxu1 %vm1485_vm4, %v2741_v47 }
 0x3cc   : > { %4220 = vmatprep.mubr.msk.bf16.mxu1 %vm4708_vm6, %v4707_v51 }
 0x3f9   : > { %v4138_v13 = vpop.f32.mrb[32].mxu1 }
 0x3fa   : > { %v2843_v36 = vpop.f32.mrb[33].mxu1  ;;  %v2852_v7 = vadd.f32 %v4138_v13, %v6249_v24 }
 0x3fb   : > { %v4139_v1 = vpop.f32.mrb[34].mxu1  ;;  %v2844_v27 = vadd.f32 %v6249_v24, %v2843_v36 }
 0x3fc   : > { %v2855_v23 = vadd.f32 %v4139_v1, %v6249_v24  ;;  %v2846_v35 = vpop.f32.mrb[35].mxu1 }
 0x3fd   : > { %v2847_v31 = vadd.f32 %v6249_v24, %v2846_v35 }
 0x3fe   : > { %v2971_v21 = vpack.c.bf16 %v2855_v23, %v2852_v7 }
 0x3ff   : > { %v2970_v48 = vpack.c.bf16 %v2847_v31, %v2844_v27 }
 0x401   : > { %4172 = vmatprep.mubr.msk.bf16.mxu0 %vm2999_vm5, %v2970_v48  ;;  %v3282_v48 = vld [vmem:[%s6704_s11 + $0x8] sm:$0xff] }
 0x402   : > { %4173 = vmatmul.mubr.msk.bf16.vlgmr.msra.gmra.mrb[32].mxu0 %vm2999_vm5, %v2971_v21  ;;  %v3281_v21 = vld [vmem:[%s6704_s11] sm:$0xff] }
 0x412   : > { %v4142_v9 = vpop.f32.mrb[36].mxu1 }
 0x413   : > { %v2859_v3 = vpop.f32.mrb[37].mxu1  ;;  %v2868_v41 = vadd.f32 %v4142_v9, %v6249_v24  ;;  %v3297_v9 = vpack.c.bf16 %v3282_v48, %v3281_v21 }
 0x414   : > { %v4143_v20 = vpop.f32.mrb[38].mxu1  ;;  %v2860_v56 = vadd.f32 %v6249_v24, %v2859_v3 }
 0x415   : > { %v2871_v16 = vadd.f32 %v4143_v20, %v6249_v24  ;;  %v2862_v33 = vpop.f32.mrb[39].mxu1  ;;  %4205 = vmatpush3.bf16.msra.mxu1 %v3297_v9 }
 0x416   : > { %v2863_v61 = vadd.f32 %v6249_v24, %v2862_v33  ;;  %4206 = vmatprep.subr.bf16.mxu1 %v4707_v51 }
 0x417   : > { %v2973_v26 = vpack.c.bf16 %v2871_v16, %v2868_v41 }
 0x418   : > { %v2972_v54 = vpack.c.bf16 %v2863_v61, %v2860_v56 }
 0x41a   : > { %4176 = vmatprep.mubr.msk.bf16.mxu0 %vm2999_vm5, %v2972_v54 }
 0x41b   : > { %4177 = vmatmul.mubr.msk.bf16.gmra.mrb[36].mxu0 %vm2999_vm5, %v2973_v26 }
 0x428   : > { %v4146_v40 = vpop.f32.mrb[40].mxu1 }
 0x429   : > { %v2875_v5 = vpop.f32.mrb[41].mxu1  ;;  %v2884_v0 = vadd.f32 %v4146_v40, %v6249_v24 }
 0x42a   : > { %v4147_v30 = vpop.f32.mrb[42].mxu1  ;;  %v2876_v43 = vadd.f32 %v6249_v24, %v2875_v5  ;;  %v3283_v5 = vld [vmem:[%s6704_s11 + $0x10] sm:$0xff] }
 0x42b   : > { %v2887_v37 = vadd.f32 %v4147_v30, %v6249_v24  ;;  %v2878_v49 = vpop.f32.mrb[43].mxu1  ;;  %v3284_v30 = vld [vmem:[%s6704_s11 + $0x18] sm:$0xff] }
 0x42c   : > { %v2879_v15 = vadd.f32 %v6249_v24, %v2878_v49 }
 0x42d   : > { %v2975_v62 = vpack.c.bf16 %v2887_v37, %v2884_v0  ;;  %v3298_v0 = vpack.c.bf16 %v3284_v30, %v3283_v5  ;;  %v3286_v37 = vld [vmem:[%s6704_s11 + $0x28] sm:$0xff] }
 0x42e   : > { %v2974_v63 = vpack.c.bf16 %v2879_v15, %v2876_v43  ;;  %v6320_v43 = vld [vmem:[#allocation12] ss:$0 sm:$0xff]  ;;  %v3294_v30 = vld [vmem:[%s6704_s11 + $0x68] sm:$0xff] }
 0x42f   : > { %4207 = vmatpush3.bf16.msra.mxu1 %v3298_v0 }
 0x430   : > { %4180 = vmatprep.mubr.msk.bf16.mxu0 %vm2999_vm5, %v2974_v63  ;;  %4208 = vmatprep.subr.bf16.mxu1 %v4707_v51  ;;  %v3288_v63 = vld [vmem:[%s6704_s11 + $0x38] sm:$0xff] }
 0x431   : > { %4181 = vmatmul.mubr.msk.bf16.gmra.mrb[40].mxu0 %vm2999_vm5, %v2975_v62  ;;  %v3287_v62 = vld [vmem:[%s6704_s11 + $0x30] sm:$0xff] }
 0x441   : > { %v4150_v59 = vpop.f32.mrb[44].mxu1 }
 0x442   : > { %v2891_v57 = vpop.f32.mrb[45].mxu1  ;;  %v2900_v44 = vadd.f32 %v4150_v59, %v6249_v24 }
 0x443   : > { %v4151_v50 = vpop.f32.mrb[46].mxu1  ;;  %v2892_v52 = vadd.f32 %v6249_v24, %v2891_v57  ;;  %v3300_v57 = vpack.c.bf16 %v3288_v63, %v3287_v62  ;;  %v3349_v62 = vld [vmem:[%s6706_s13 + $0x8] sm:$0xff]  ;;  %v3350_v63 = vld [vmem:[%s6706_s13 + $0x10] sm:$0xff] }
 0x444   : > { %v2903_v11 = vadd.f32 %v4151_v50, %v6249_v24  ;;  %v2894_v18 = vpop.f32.mrb[47].mxu1 }
 0x445   : > { %v2895_v12 = vadd.f32 %v6249_v24, %v2894_v18 }
 0x446   : > { %v2977_v58 = vpack.c.bf16 %v2903_v11, %v2900_v44 }
 0x447   : > { %v2976_v17 = vpack.c.bf16 %v2895_v12, %v2892_v52 }
 0x449   : > { %4184 = vmatprep.mubr.msk.bf16.mxu0 %vm2999_vm5, %v2976_v17 }
 0x44a   : > { %4185 = vmatmul.mubr.msk.bf16.gmra.mrb[44].mxu0 %vm2999_vm5, %v2977_v58 }
 0x458   : > { %v4154_v10 = vpop.f32.mrb[48].mxu1 }
 0x459   : > { %v2907_v4 = vpop.f32.mrb[49].mxu1  ;;  %v2916_v29 = vadd.f32 %v4154_v10, %v6249_v24 }
 0x45a   : > { %v4155_v46 = vpop.f32.mrb[50].mxu1  ;;  %v2908_v32 = vadd.f32 %v6249_v24, %v2907_v4 }
 0x45b   : > { %v2919_v19 = vadd.f32 %v4155_v46, %v6249_v24  ;;  %v2910_v28 = vpop.f32.mrb[51].mxu1 }
 0x45c   : > { %v2911_v25 = vadd.f32 %v6249_v24, %v2910_v28 }
 0x45d   : > { %v2979_v55 = vpack.c.bf16 %v2919_v19, %v2916_v29 }
 0x45e   : > { %v2978_v53 = vpack.c.bf16 %v2911_v25, %v2908_v32  ;;  %v3289_v32 = vld [vmem:[%s6704_s11 + $0x40] sm:$0xff]  ;;  %v3290_v25 = vld [vmem:[%s6704_s11 + $0x48] sm:$0xff] }
 0x460   : > { %4188 = vmatprep.mubr.msk.bf16.mxu0 %vm2999_vm5, %v2978_v53  ;;  %v3301_v53 = vpack.c.bf16 %v3290_v25, %v3289_v32 }
 0x461   : > { %4189 = vmatmul.mubr.msk.bf16.gmra.mrb[48].mxu0 %vm2999_vm5, %v2979_v55 }
 0x46f   : > { %v4158_v14 = vpop.f32.mrb[52].mxu1 }
 0x470   : > { %v2923_v39 = vpop.f32.mrb[53].mxu1  ;;  %v2932_v38 = vadd.f32 %v4158_v14, %v6249_v24 }
 0x471   : > { %v4159_v2 = vpop.f32.mrb[54].mxu1  ;;  %v2924_v42 = vadd.f32 %v6249_v24, %v2923_v39 }
 0x472   : > { %v2935_v6 = vadd.f32 %v4159_v2, %v6249_v24  ;;  %v2926_v22 = vpop.f32.mrb[55].mxu1 }
 0x473   : > { %v2927_v60 = vadd.f32 %v6249_v24, %v2926_v22 }
 0x474   : > { %v2981_v8 = vpack.c.bf16 %v2935_v6, %v2932_v38 }
 0x475   : > { %v2980_v34 = vpack.c.bf16 %v2927_v60, %v2924_v42 }
 0x477   : > { %4192 = vmatprep.mubr.msk.bf16.mxu0 %vm2999_vm5, %v2980_v34 }
 0x478   : > { %4193 = vmatmul.mubr.msk.bf16.gmra.mrb[52].mxu0 %vm2999_vm5, %v2981_v8 }
 0x487   : > { %v4162_v45 = vpop.f32.mrb[56].mxu1 }
 0x488   : > { %v2939_v47 = vpop.f32.mrb[57].mxu1  ;;  %v2948_v36 = vadd.f32 %v4162_v45, %v6249_v24 }
 0x489   : > { %v4163_v13 = vpop.f32.mrb[58].mxu1  ;;  %v2940_v23 = vadd.f32 %v6249_v24, %v2939_v47 }
 0x48a   : > { %v2951_v1 = vadd.f32 %v4163_v13, %v6249_v24  ;;  %v2942_v7 = vpop.f32.mrb[59].mxu1 }
 0x48b   : > { %v2943_v35 = vadd.f32 %v6249_v24, %v2942_v7 }
 0x48c   : > { %v2983_v27 = vpack.c.bf16 %v2951_v1, %v2948_v36 }
 0x48d   : > { %v2982_v31 = vpack.c.bf16 %v2943_v35, %v2940_v23 }
 0x48f   : > { %4196 = vmatprep.mubr.msk.bf16.mxu0 %vm2999_vm5, %v2982_v31 }
 0x490   : > { %4197 = vmatmul.mubr.msk.bf16.gmra.mrb[56].mxu0 %vm2999_vm5, %v2983_v27 }
 0x49e   : > { %v4166_v3 = vpop.f32.mrb[60].mxu1 }
 0x49f   : > { %v2955_v20 = vpop.f32.mrb[61].mxu1  ;;  %v2964_v16 = vadd.f32 %v4166_v3, %v6249_v24 }
 0x4a0   : > { %v4167_v41 = vpop.f32.mrb[62].mxu1  ;;  %v2956_v61 = vadd.f32 %v6249_v24, %v2955_v20 }
 0x4a1   : > { %v2967_v33 = vadd.f32 %v4167_v41, %v6249_v24  ;;  %v2958_v56 = vpop.f32.mrb[63].mxu1 }
 0x4a2   : > { %v2959_v26 = vadd.f32 %v6249_v24, %v2958_v56  ;;  %v3285_v24 = vld [vmem:[%s6704_s11 + $0x20] sm:$0xff] }
 0x4a3   : > { %v2985_v54 = vpack.c.bf16 %v2967_v33, %v2964_v16  ;;  %v3299_v49 = vpack.c.bf16 %v3286_v37, %v3285_v24  ;;  %v3295_v24 = vld [vmem:[%s6704_s11 + $0x70] sm:$0xff]  ;;  %v3296_v37 = vld [vmem:[%s6704_s11 + $0x78] sm:$0xff] }
 0x4a4   : > { %v2984_v40 = vpack.c.bf16 %v2959_v26, %v2956_v61  ;;  %v3291_v26 = vld [vmem:[%s6704_s11 + $0x50] sm:$0xff] }
 0x4a5   : > { %4209 = vmatpush3.bf16.msra.mxu1 %v3299_v49  ;;  %v3304_v49 = vpack.c.bf16 %v3296_v37, %v3295_v24 }
 0x4a6   : > { %4200 = vmatprep.mubr.msk.bf16.mxu0 %vm2999_vm5, %v2984_v40  ;;  %4210 = vmatprep.subr.bf16.mxu1 %v4707_v51  ;;  %v3293_v40 = vld [vmem:[%s6704_s11 + $0x60] sm:$0xff] }
 0x4a7   : > { %4201 = vmatmul.mubr.msk.bf16.gmra.mrb[60].mxu0 %vm2999_vm5, %v2985_v54  ;;  %v3292_v54 = vld [vmem:[%s6704_s11 + $0x58] sm:$0xff]  ;;  %v3303_v0 = vpack.c.bf16 %v3294_v30, %v3293_v40 }
 0x4a8   : > { %v3302_v5 = vpack.c.bf16 %v3292_v54, %v3291_v26  ;;  %4240 = vmatprep.mubr.msk.bf16.mxu0 %vm4708_vm6, %v4707_v51 }
 0x4a9   : > { %4211 = vmatpush3.bf16.msra.mxu1 %v3300_v57  ;;  %v3351_v57 = vld [vmem:[%s6706_s13 + $0x18] sm:$0xff] }
 0x4aa   : > { %4212 = vmatprep.subr.bf16.mxu1 %v4707_v51 }
 0x4ad   : > { %4213 = vmatpush3.bf16.msra.mxu1 %v3301_v53 }
 0x4ae   : > { %4214 = vmatprep.subr.bf16.mxu1 %v4707_v51 }
 0x4b1   : > { %4215 = vmatpush3.bf16.msra.mxu1 %v3302_v5 }
 0x4b2   : > { %4216 = vmatprep.subr.bf16.mxu1 %v4707_v51 }
 0x4b5   : > { %4217 = vmatpush3.bf16.msra.mxu1 %v3303_v0 }
 0x4b6   : > { %4218 = vmatprep.subr.bf16.mxu1 %v4707_v51 }
 0x4b9   : > { %4219 = vmatpush3.bf16.msra.mxu1 %v3304_v49 }
 0x4d5   : > { %v4174_v15 = vpop.f32.mrb[32].mxu0 }
 0x4d6   : > { %v3082_v59 = vpop.f32.mrb[33].mxu0  ;;  %v3091_v18 = vadd.f32 %v4174_v15, %v6320_v43  ;;  %v3348_v15 = vld [vmem:[%s6706_s13] sm:$0xff] }
 0x4d7   : > { %v3083_v50 = vadd.f32 %v6320_v43, %v3082_v59  ;;  %v4175_v44 = vpop.f32.mrb[34].mxu0  ;;  %v3364_v59 = vpack.c.bf16 %v3349_v62, %v3348_v15 }
 0x4d8   : > { %v3085_v11 = vpop.f32.mrb[35].mxu0  ;;  %v3094_v58 = vadd.f32 %v4175_v44, %v6320_v43  ;;  %v3211_v10 = vmax.f32 %v3091_v18, 0.0  ;;  %v3353_v18 = vld [vmem:[%s6706_s13 + $0x28] sm:$0xff] }
 0x4d9   : > { %v3086_v52 = vadd.f32 %v6320_v43, %v3085_v11  ;;  %v3209_v12 = vmax.f32 %v3083_v50, 0.0  ;;  %4225 = vmatpush3.bf16.msra.mxu0 %v3364_v59  ;;  %v3365_v50 = vpack.c.bf16 %v3351_v57, %v3350_v63  ;;  %v3352_v11 = vld [vmem:[%s6706_s13 + $0x20] sm:$0xff] }
 0x4da   : > { %v3212_v46 = vmax.f32 %v3094_v58, 0.0  ;;  %4226 = vmatprep.subr.bf16.mxu0 %v4707_v51 }
 0x4db   : > { %v3210_v17 = vmax.f32 %v3086_v52, 0.0 }
 0x4dd   : > { %v3241_v4 = vadd.f32 %v3210_v17, %v3209_v12  ;;  %4227 = vmatpush3.bf16.msra.mxu0 %v3365_v50 }
 0x4de   : > { %4228 = vmatprep.subr.bf16.mxu0 %v4707_v51 }
 0x4df   : > { %v3242_v29 = vadd.f32 %v3241_v4, %v3211_v10  ;;  %v3366_v10 = vpack.c.bf16 %v3353_v18, %v3352_v11 }
 0x4e1   : > { %v3243_v19 = vadd.f32 %v3242_v29, %v3212_v46  ;;  %4229 = vmatpush3.bf16.msra.mxu0 %v3366_v10 }
 0x4e2   : > { %4230 = vmatprep.subr.bf16.mxu0 %v4707_v51 }
 0x4ee   : > { %v4178_v28 = vpop.f32.mrb[36].mxu0 }
 0x4ef   : > { %v3098_v55 = vpop.f32.mrb[37].mxu0  ;;  %v3107_v38 = vadd.f32 %v4178_v28, %v6320_v43  ;;  %v3355_v28 = vld [vmem:[%s6706_s13 + $0x38] sm:$0xff] }
 0x4f0   : > { %v3099_v14 = vadd.f32 %v6320_v43, %v3098_v55  ;;  %v4179_v39 = vpop.f32.mrb[38].mxu0 }
 0x4f1   : > { %v3101_v2 = vpop.f32.mrb[39].mxu0  ;;  %v3110_v60 = vadd.f32 %v4179_v39, %v6320_v43  ;;  %v3215_v34 = vmax.f32 %v3107_v38, 0.0  ;;  %v3357_v38 = vld [vmem:[%s6706_s13 + $0x48] sm:$0xff] }
 0x4f2   : > { %v3213_v6 = vmax.f32 %v3099_v14, 0.0  ;;  %v3102_v22 = vadd.f32 %v6320_v43, %v3101_v2  ;;  %v3356_v2 = vld [vmem:[%s6706_s13 + $0x40] sm:$0xff] }
 0x4f3   : > { %v3216_v47 = vmax.f32 %v3110_v60, 0.0 }
 0x4f4   : > { %v3244_v42 = vadd.f32 %v3243_v19, %v3213_v6  ;;  %v3214_v8 = vmax.f32 %v3102_v22, 0.0  ;;  %v3354_v19 = vld [vmem:[%s6706_s13 + $0x30] sm:$0xff] }
 0x4f5   : > { %v3367_v53 = vpack.c.bf16 %v3355_v28, %v3354_v19 }
 0x4f6   : > { %v3245_v45 = vadd.f32 %v3244_v42, %v3214_v8  ;;  %v3368_v42 = vpack.c.bf16 %v3357_v38, %v3356_v2  ;;  %v3358_v8 = vld [vmem:[%s6706_s13 + $0x50] sm:$0xff] }
 0x4f7   : > { %4231 = vmatpush3.bf16.msra.mxu0 %v3367_v53 }
 0x4f8   : > { %v3246_v13 = vadd.f32 %v3245_v45, %v3215_v34  ;;  %4232 = vmatprep.subr.bf16.mxu0 %v4707_v51  ;;  %v3359_v34 = vld [vmem:[%s6706_s13 + $0x58] sm:$0xff] }
 0x4f9   : > { %v3369_v45 = vpack.c.bf16 %v3359_v34, %v3358_v8 }
 0x4fa   : > { %v3247_v36 = vadd.f32 %v3246_v13, %v3216_v47  ;;  %v3360_v47 = vld [vmem:[%s6706_s13 + $0x60] sm:$0xff]  ;;  %v3361_v13 = vld [vmem:[%s6706_s13 + $0x68] sm:$0xff] }
 0x4fb   : > { %4233 = vmatpush3.bf16.msra.mxu0 %v3368_v42 }
 0x4fc   : > { %4234 = vmatprep.subr.bf16.mxu0 %v4707_v51 }
 0x4ff   : > { %4235 = vmatpush3.bf16.msra.mxu0 %v3369_v45 }
 0x500   : > { %4236 = vmatprep.subr.bf16.mxu0 %v4707_v51 }
 0x504   : > { %v4182_v1 = vpop.f32.mrb[40].mxu0 }
 0x505   : > { %v3114_v7 = vpop.f32.mrb[41].mxu0  ;;  %v3123_v31 = vadd.f32 %v4182_v1, %v6320_v43  ;;  %v3362_v1 = vld [vmem:[%s6706_s13 + $0x70] sm:$0xff] }
 0x506   : > { %v3115_v23 = vadd.f32 %v6320_v43, %v3114_v7  ;;  %v4183_v35 = vpop.f32.mrb[42].mxu0  ;;  %v3363_v7 = vld [vmem:[%s6706_s13 + $0x78] sm:$0xff] }
 0x507   : > { %v3117_v27 = vpop.f32.mrb[43].mxu0  ;;  %v3126_v3 = vadd.f32 %v4183_v35, %v6320_v43  ;;  %v3219_v41 = vmax.f32 %v3123_v31, 0.0 }
 0x508   : > { %v3217_v21 = vmax.f32 %v3115_v23, 0.0  ;;  %v3118_v48 = vadd.f32 %v6320_v43, %v3117_v27  ;;  %v3371_v23 = vpack.c.bf16 %v3363_v7, %v3362_v1 }
 0x509   : > { %v3220_v33 = vmax.f32 %v3126_v3, 0.0 }
 0x50a   : > { %v3248_v9 = vadd.f32 %v3247_v36, %v3217_v21  ;;  %v3218_v20 = vmax.f32 %v3118_v48, 0.0  ;;  %v3370_v36 = vpack.c.bf16 %v3361_v13, %v3360_v47 }
 0x50c   : > { %v3249_v16 = vadd.f32 %v3248_v9, %v3218_v20  ;;  %4237 = vmatpush3.bf16.msra.mxu0 %v3370_v36 }
 0x50d   : > { %4238 = vmatprep.subr.bf16.mxu0 %v4707_v51 }
 0x50e   : > { %v3250_v56 = vadd.f32 %v3249_v16, %v3219_v41 }
 0x510   : > { %v3251_v61 = vadd.f32 %v3250_v56, %v3220_v33  ;;  %4239 = vmatpush3.bf16.msra.mxu0 %v3371_v23 }
 0x51d   : > { %v4186_v44 = vpop.f32.mrb[44].mxu0 }
 0x51e   : > { %v3130_v52 = vpop.f32.mrb[45].mxu0  ;;  %v3139_v4 = vadd.f32 %v4186_v44, %v6320_v43 }
 0x51f   : > { %v3131_v12 = vadd.f32 %v6320_v43, %v3130_v52  ;;  %v4187_v58 = vpop.f32.mrb[46].mxu0 }
 0x520   : > { %v3133_v17 = vpop.f32.mrb[47].mxu0  ;;  %v3142_v25 = vadd.f32 %v4187_v58, %v6320_v43  ;;  %v3223_v14 = vmax.f32 %v3139_v4, 0.0 }
 0x521   : > { %v3221_v46 = vmax.f32 %v3131_v12, 0.0  ;;  %v3134_v29 = vadd.f32 %v6320_v43, %v3133_v17 }
 0x522   : > { %v3224_v6 = vmax.f32 %v3142_v25, 0.0 }
 0x523   : > { %v3252_v32 = vadd.f32 %v3251_v61, %v3221_v46  ;;  %v3222_v55 = vmax.f32 %v3134_v29, 0.0 }
 0x525   : > { %v3253_v39 = vadd.f32 %v3252_v32, %v3222_v55 }
 0x527   : > { %v3254_v22 = vadd.f32 %v3253_v39, %v3223_v14 }
 0x529   : > { %v3255_v60 = vadd.f32 %v3254_v22, %v3224_v6 }
 0x534   : > { %v4190_v35 = vpop.f32.mrb[48].mxu0 }
 0x535   : > { %v3146_v27 = vpop.f32.mrb[49].mxu0  ;;  %v3155_v9 = vadd.f32 %v4190_v35, %v6320_v43 }
 0x536   : > { %v3147_v31 = vadd.f32 %v6320_v43, %v3146_v27  ;;  %v4191_v21 = vpop.f32.mrb[50].mxu0 }
 0x537   : > { %v3149_v48 = vpop.f32.mrb[51].mxu0  ;;  %v3158_v16 = vadd.f32 %v4191_v21, %v6320_v43  ;;  %v3227_v56 = vmax.f32 %v3155_v9, 0.0 }
 0x538   : > { %v3225_v3 = vmax.f32 %v3147_v31, 0.0  ;;  %v3150_v20 = vadd.f32 %v6320_v43, %v3149_v48 }
 0x539   : > { %v3228_v26 = vmax.f32 %v3158_v16, 0.0  ;;  %v3416_v16 = vld [vmem:[%s6708_s15 + $0x8] sm:$0xff] }
 0x53a   : > { %v3256_v41 = vadd.f32 %v3255_v60, %v3225_v3  ;;  %v3226_v33 = vmax.f32 %v3150_v20, 0.0 }
 0x53c   : > { %v3257_v61 = vadd.f32 %v3256_v41, %v3226_v33  ;;  %v3418_v33 = vld [vmem:[%s6708_s15 + $0x18] sm:$0xff] }
 0x53e   : > { %v3258_v54 = vadd.f32 %v3257_v61, %v3227_v56  ;;  %v3422_v61 = vld [vmem:[%s6708_s15 + $0x38] sm:$0xff] }
 0x540   : > { %v3259_v51 = vadd.f32 %v3258_v54, %v3228_v26  ;;  %v3415_v26 = vld [vmem:[%s6708_s15] sm:$0xff] }
 0x541   : > { %v3419_v54 = vld [vmem:[%s6708_s15 + $0x20] sm:$0xff] }
 0x54b   : > { %v4194_v40 = vpop.f32.mrb[52].mxu0 }
 0x54c   : > { %v3162_v5 = vpop.f32.mrb[53].mxu0  ;;  %v3171_v37 = vadd.f32 %v4194_v40, %v6320_v43  ;;  %v3479_v40 = vpack.c.bf16 %v3419_v54, %v3415_v26  ;;  %v3445_v26 = vld [vmem:[%s6708_s15 + $0xf0] sm:$0xff]  ;;  %v3450_v54 = vld [vmem:[%s6708_s15 + $0x118] sm:$0xff] }
 0x54d   : > { %v3163_v30 = vadd.f32 %v6320_v43, %v3162_v5  ;;  %v4195_v0 = vpop.f32.mrb[54].mxu0  ;;  %v3424_v5 = vld [vmem:[%s6708_s15 + $0x48] sm:$0xff] }
 0x54e   : > { %v3165_v24 = vpop.f32.mrb[55].mxu0  ;;  %v3174_v63 = vadd.f32 %v4195_v0, %v6320_v43  ;;  %v3231_v57 = vmax.f32 %v3171_v37, 0.0  ;;  %v3427_v37 = vld [vmem:[%s6708_s15 + $0x60] sm:$0xff] }
 0x54f   : > { %v3229_v49 = vmax.f32 %v3163_v30, 0.0  ;;  %v3166_v15 = vadd.f32 %v6320_v43, %v3165_v24  ;;  %v3428_v30 = vld [vmem:[%s6708_s15 + $0x68] sm:$0xff]  ;;  %v3423_v24 = vld [vmem:[%s6708_s15 + $0x40] sm:$0xff] }
 0x550   : > { %v3232_v44 = vmax.f32 %v3174_v63, 0.0  ;;  %v3484_v0 = vpack.c.bf16 %v3428_v30, %v3424_v5  ;;  %v3449_v30 = vld [vmem:[%s6708_s15 + $0x110] sm:$0xff] }
 0x551   : > { %v3260_v62 = vadd.f32 %v3259_v51, %v3229_v49  ;;  %v3230_v59 = vmax.f32 %v3166_v15, 0.0  ;;  %v3482_v51 = vpack.c.bf16 %v3422_v61, %v3418_v33  ;;  %v3483_v49 = vpack.c.bf16 %v3427_v37, %v3423_v24  ;;  %v3432_v15 = vld [vmem:[%s6708_s15 + $0x88] sm:$0xff]  ;;  %v3441_v61 = vld [vmem:[%s6708_s15 + $0xd0] sm:$0xff]  ;;  %v3458_v24 = vld [vmem:[%s6708_s15 + $0x158] sm:$0xff] }
 0x552   : > { %v3462_v37 = vld [vmem:[%s6708_s15 + $0x178] sm:$0xff] }
 0x553   : > { %v3261_v50 = vadd.f32 %v3260_v62, %v3230_v59  ;;  %3574 = vmatprep.subr.bf16.mxu0 %v3482_v51  ;;  %v3436_v62 = vld [vmem:[%s6708_s15 + $0xa8] sm:$0xff]  ;;  %v3431_v59 = vld [vmem:[%s6708_s15 + $0x80] sm:$0xff]  ;;  %v3454_v51 = vld [vmem:[%s6708_s15 + $0x138] sm:$0xff] }
 0x554   : > { %v3488_v63 = vpack.c.bf16 %v3436_v62, %v3432_v15  ;;  %v3498_v5 = vpack.c.bf16 %v3454_v51, %v3450_v54  ;;  %v3502_v15 = vpack.c.bf16 %v3462_v37, %v3458_v24  ;;  %v3457_v62 = vld [vmem:[%s6708_s15 + $0x150] sm:$0xff] }
 0x555   : > { %v3262_v11 = vadd.f32 %v3261_v50, %v3231_v57  ;;  %v3435_v57 = vld [vmem:[%s6708_s15 + $0xa0] sm:$0xff] }
 0x556   : > { %v3487_v50 = vpack.c.bf16 %v3435_v57, %v3431_v59  ;;  %v3466_v59 = vld [vmem:[%s6708_s15 + $0x198] sm:$0xff] }
 0x557   : > { %v3263_v18 = vadd.f32 %v3262_v11, %v3232_v44  ;;  %v3440_v44 = vld [vmem:[%s6708_s15 + $0xc8] sm:$0xff]  ;;  %v3470_v57 = vld [vmem:[%s6708_s15 + $0x1b8] sm:$0xff] }
 0x558   : > { %v3444_v11 = vld [vmem:[%s6708_s15 + $0xe8] sm:$0xff] }
 0x563   : > { %v4198_v52 = vpop.f32.mrb[56].mxu0 }
 0x564   : > { %v3178_v12 = vpop.f32.mrb[57].mxu0  ;;  %v3187_v4 = vadd.f32 %v4198_v52, %v6320_v43  ;;  %v3439_v52 = vld [vmem:[%s6708_s15 + $0xc0] sm:$0xff] }
 0x565   : > { %v3179_v58 = vadd.f32 %v6320_v43, %v3178_v12  ;;  %v4199_v17 = vpop.f32.mrb[58].mxu0  ;;  %v3443_v12 = vld [vmem:[%s6708_s15 + $0xe0] sm:$0xff] }
 0x566   : > { %v3181_v10 = vpop.f32.mrb[59].mxu0  ;;  %v3190_v28 = vadd.f32 %v4199_v17, %v6320_v43  ;;  %v3235_v25 = vmax.f32 %v3187_v4, 0.0  ;;  %v3448_v17 = vld [vmem:[%s6708_s15 + $0x108] sm:$0xff] }
 0x567   : > { %v3233_v46 = vmax.f32 %v3179_v58, 0.0  ;;  %v3182_v29 = vadd.f32 %v6320_v43, %v3181_v10  ;;  %v3491_v58 = vpack.c.bf16 %v3443_v12, %v3439_v52  ;;  %v3452_v10 = vld [vmem:[%s6708_s15 + $0x128] sm:$0xff]  ;;  %v3465_v52 = vld [vmem:[%s6708_s15 + $0x190] sm:$0xff] }
 0x568   : > { %v3236_v53 = vmax.f32 %v3190_v28, 0.0  ;;  %v3496_v4 = vpack.c.bf16 %v3452_v10, %v3448_v17  ;;  %v3456_v28 = vld [vmem:[%s6708_s15 + $0x148] sm:$0xff] }
 0x569   : > { %v3264_v19 = vadd.f32 %v3263_v18, %v3233_v46  ;;  %v3234_v32 = vmax.f32 %v3182_v29, 0.0  ;;  %v3492_v18 = vpack.c.bf16 %v3444_v11, %v3440_v44  ;;  %v3447_v46 = vld [vmem:[%s6708_s15 + $0x100] sm:$0xff]  ;;  %v3506_v44 = vpack.c.bf16 %v3470_v57, %v3466_v59  ;;  %v3472_v17 = vld [vmem:[%s6708_s15 + $0x1c8] sm:$0xff] }
 0x56a   : > { %v3451_v29 = vld [vmem:[%s6708_s15 + $0x120] sm:$0xff]  ;;  %v3476_v10 = vld [vmem:[%s6708_s15 + $0x1e8] sm:$0xff] }
 0x56b   : > { %v3265_v55 = vadd.f32 %v3264_v19, %v3234_v32  ;;  %v3495_v19 = vpack.c.bf16 %v3451_v29, %v3447_v46  ;;  %v3460_v32 = vld [vmem:[%s6708_s15 + $0x168] sm:$0xff]  ;;  %v3463_v11 = vld [vmem:[%s6708_s15 + $0x180] sm:$0xff]  ;;  %v3508_v29 = vpack.c.bf16 %v3476_v10, %v3472_v17 }
 0x56d   : > { %v3266_v14 = vadd.f32 %v3265_v55, %v3235_v25  ;;  %v3500_v25 = vpack.c.bf16 %v3460_v32, %v3456_v28  ;;  %v3455_v55 = vld [vmem:[%s6708_s15 + $0x140] sm:$0xff]  ;;  %v3478_v28 = vld [vmem:[%s6708_s15 + $0x1f8] sm:$0xff] }
 0x56e   : > { %v3471_v32 = vld [vmem:[%s6708_s15 + $0x1c0] sm:$0xff] }
 0x56f   : > { %v3267_v39 = vadd.f32 %v3266_v14, %v3236_v53  ;;  %v3459_v53 = vld [vmem:[%s6708_s15 + $0x160] sm:$0xff] }
 0x570   : > { %v3499_v14 = vpack.c.bf16 %v3459_v53, %v3455_v55  ;;  %v3475_v55 = vld [vmem:[%s6708_s15 + $0x1e0] sm:$0xff]  ;;  %v3473_v53 = vld [vmem:[%s6708_s15 + $0x1d0] sm:$0xff] }
 0x57a   : > { %v4202_v2 = vpop.f32.mrb[60].mxu0 }
 0x57b   : > { %v3194_v38 = vpop.f32.mrb[61].mxu0  ;;  %v3203_v60 = vadd.f32 %v4202_v2, %v6320_v43  ;;  %v3468_v2 = vld [vmem:[%s6708_s15 + $0x1a8] sm:$0xff] }
 0x57c   : > { %v3195_v6 = vadd.f32 %v6320_v43, %v3194_v38  ;;  %v4203_v22 = vpop.f32.mrb[62].mxu0 }
 0x57d   : > { %v3197_v42 = vpop.f32.mrb[63].mxu0  ;;  %v3206_v47 = vadd.f32 %v4203_v22, %v6320_v43  ;;  %v3239_v36 = vmax.f32 %v3203_v60, 0.0 }
 0x57e   : > { %v3237_v8 = vmax.f32 %v3195_v6, 0.0  ;;  %v3198_v34 = vadd.f32 %v6320_v43, %v3197_v42  ;;  %v3420_v43 = vld [vmem:[%s6708_s15 + $0x28] sm:$0xff]  ;;  %v3305_v6 = vld [vmem:[#allocation14] sm:$0x1] }
 0x57f   : > { %v3240_v7 = vmax.f32 %v3206_v47, 0.0  ;;  %v3480_v56 = vpack.c.bf16 %v3420_v43, %v3416_v16  ;;  %v3426_v47 = vld [vmem:[%s6708_s15 + $0x58] sm:$0xff] }
 0x580   : > { %v3268_v45 = vadd.f32 %v3267_v39, %v3237_v8  ;;  %v3238_v13 = vmax.f32 %v3198_v34, 0.0  ;;  %v3464_v39 = vld [vmem:[%s6708_s15 + $0x188] sm:$0xff]  ;;  %v3417_v8 = vld [vmem:[%s6708_s15 + $0x10] sm:$0xff]  ;;  %v3442_v16 = vld [vmem:[%s6708_s15 + $0xd8] sm:$0xff] }
 0x581   : > { %3533 = vmatprep.subr.bf16.mxu1 %v3480_v56  ;;  %v3504_v38 = vpack.c.bf16 %v3468_v2, %v3464_v39  ;;  %v3421_v34 = vld [vmem:[%s6708_s15 + $0x30] sm:$0xff]  ;;  %v3446_v43 = vld [vmem:[%s6708_s15 + $0xf8] sm:$0xff]  ;;  %v3507_v39 = vpack.c.bf16 %v3475_v55, %v3471_v32 }
 0x582   : > { %v3269_v1 = vadd.f32 %v3268_v45, %v3238_v13  ;;  %v3430_v13 = vld [vmem:[%s6708_s15 + $0x78] sm:$0xff]  ;;  %v3494_v56 = vpack.c.bf16 %v3446_v43, %v3442_v16 }
 0x584   : > { %v3270_v23 = vadd.f32 %v3269_v1, %v3239_v36 }
 0x586   : > { %v3271_v35 = vadd.f32 %v3270_v23, %v3240_v7  ;;  %v3481_v7 = vpack.c.bf16 %v3421_v34, %v3417_v8 }
 0x588   : > { %v3272_v27 = vrot.slane %v3271_v35, 4 }
 0x58a   : > { %v3273_v31 = vadd.f32 %v3272_v27, %v3271_v35  ;;  %v3486_v35 = vpack.c.bf16 %v3430_v13, %v3426_v47  ;;  %v3425_v27 = vld [vmem:[%s6708_s15 + $0x50] sm:$0xff]  ;;  %v3513_v47 = vlaneseq }
 0x58c   : > { %v3274_v21 = vrot.slane %v3273_v31, 2  ;;  %v3514_v13 = vshrl.u32 %v3513_v47, 7  ;;  %vm3703_vm9 = vcmp.lt.s32.totalorder %v3513_v47, 512 }
 0x58e   : > { %v3275_v48 = vadd.f32 %v3274_v21, %v3273_v31  ;;  %v3429_v31 = vld [vmem:[%s6708_s15 + $0x70] sm:$0xff]  ;;  %v3434_v21 = vld [vmem:[%s6708_s15 + $0x98] sm:$0xff] }
 0x590   : > { %v3276_v9 = vrot.slane %v3275_v48, 1 }
 0x592   : > { %v3277_v3 = vadd.f32 %v3276_v9, %v3275_v48  ;;  %v3438_v48 = vld [vmem:[%s6708_s15 + $0xb8] sm:$0xff]  ;;  %v3485_v9 = vpack.c.bf16 %v3429_v31, %v3425_v27 }
 0x594   : > { %v3279_v20 = vmul.f32 0.00390625, %v3277_v3  ;;  %v3490_v3 = vpack.c.bf16 %v3438_v48, %v3434_v21 }
 0x596   : > { %v3280_v41 = vpack.c.bf16 %v3279_v20, %v3279_v20  ;;  %v3433_v20 = vld [vmem:[%s6708_s15 + $0x90] sm:$0xff] }
 0x598   : > { %4221 = vmatmul.mubr.bf16.vlgmr.msra.gmra.mrb[64].mxu1 %v3280_v41  ;;  %v3437_v41 = vld [vmem:[%s6708_s15 + $0xb0] sm:$0xff] }
 0x599   : > { %3534 = vmatpush1.bf16.msra.mxu1 %v3479_v40  ;;  %v3489_v33 = vpack.c.bf16 %v3437_v41, %v3433_v20  ;;  %v3493_v40 = vpack.c.bf16 %v3445_v26, %v3441_v61  ;;  %v4710_v61 = vmov -inf  }
 0x59a   : > { %3535 = vmatprep.subr.bf16.mxu1 %v3484_v0  ;;  %v3453_v0 = vld [vmem:[%s6708_s15 + $0x130] sm:$0xff]  ;;  %v3630_v26 = vsel %vm3628_vm7, -1e+30, %v4710_v61 }
 0x59d   : > { %3536 = vmatpush1.bf16.msra.mxu1 %v3483_v49  ;;  %v3497_v49 = vpack.c.bf16 %v3453_v0, %v3449_v30 }
 0x59e   : > { %3537 = vmatprep.subr.bf16.mxu1 %v3488_v63  ;;  %v3461_v63 = vld [vmem:[%s6708_s15 + $0x170] sm:$0xff] }
 0x5a1   : > { %3538 = vmatpush1.bf16.msra.mxu1 %v3487_v50  ;;  %v3501_v50 = vpack.c.bf16 %v3461_v63, %v3457_v62 }
 0x5a2   : > { %3539 = vmatprep.subr.bf16.mxu1 %v3492_v18  ;;  %v3467_v18 = vld [vmem:[%s6708_s15 + $0x1a0] sm:$0xff] }
 0x5a3   : > { %v3503_v12 = vpack.c.bf16 %v3467_v18, %v3463_v11 }
 0x5a5   : > { %3540 = vmatpush1.bf16.msra.mxu1 %v3491_v58  ;;  %v3469_v58 = vld [vmem:[%s6708_s15 + $0x1b0] sm:$0xff] }
 0x5a6   : > { %3541 = vmatprep.subr.bf16.mxu1 %v3496_v4  ;;  %v4709_v4 = vmov 0   ;;  %v3505_v46 = vpack.c.bf16 %v3469_v58, %v3465_v52 }
 0x5a7   : > { %3565 = vmatprep.mubr.bf16.mxu1 %v4709_v4 }
 0x5a9   : > { %3542 = vmatpush1.bf16.msra.mxu1 %v3495_v19  ;;  %v3474_v19 = vld [vmem:[%s6708_s15 + $0x1d8] sm:$0xff] }
 0x5aa   : > { %3543 = vmatprep.subr.bf16.mxu1 %v3500_v25  ;;  %v3510_v25 = vpack.c.bf16 %v3478_v28, %v3474_v19 }
 0x5ad   : > { %3544 = vmatpush1.bf16.msra.mxu1 %v3499_v14  ;;  %v3477_v14 = vld [vmem:[%s6708_s15 + $0x1f0] sm:$0xff] }
 0x5ae   : > { %3545 = vmatprep.subr.bf16.mxu1 %v3504_v38  ;;  %v3509_v2 = vpack.c.bf16 %v3477_v14, %v3473_v53  ;;  %v3372_v38 = vld [vmem:[#allocation15] sm:$0x1] }
 0x5b1   : > { %3546 = vmatpush1.bf16.msra.mxu1 %v3503_v12 }
 0x5b2   : > { %3547 = vmatprep.subr.bf16.mxu1 %v3508_v29 }
 0x5b5   : > { %3548 = vmatpush1.bf16.msra.mxu1 %v3507_v39 }
 0x66b   : > { %v3340_v22 = vpop.f32.mrb[64].mxu1 }
 0x66c   : > { %v3341_v42 = vadd.f32 %v3340_v22, %v3305_v6  ;;  %v4222_v60 = vpop.f32.mrb[65].mxu1 }
 0x66d   : > { %v3343_v45 = vpop.f32.mrb[66].mxu1 }
 0x66e   : > { %v3346_v36 = vmax.f32 %v3341_v42, 0.0  ;;  %v4223_v1 = vpop.f32.mrb[67].mxu1 }
 0x66f   : > { %v3523_v1 = vsub.s32 2, %v3514_v13 }
 0x670   : > { %v3347_v23 = vpack.c.bf16 %v3346_v36, %v3346_v36  ;;  %v3515_v36 = vsub.s32 0, %v3514_v13 }
 0x672   : > { %4241 = vmatmul.mubr.bf16.vlgmr.msra.gmra.mrb[64].mxu0 %v3347_v23  ;;  %v3527_v23 = vsub.s32 3, %v3514_v13 }
 0x673   : > { %3575 = vmatpush1.bf16.msra.mxu0 %v3481_v7  ;;  %3606 = vmatprep.mubr.bf16.mxu0 %v4709_v4  ;;  %v3511_v7 = vld [vmem:[%s6709_s16] sm:$0xf] }
 0x674   : > { %3576 = vmatprep.subr.bf16.mxu0 %v3486_v35  ;;  %v3616_v35 = vand.u32 127, %v3513_v47  ;;  %v3516_v27 = vrot.slane %v3511_v7, %v3515_v36  ;;  %v3524_v31 = vrot.slane %v3511_v7, %v3523_v1  ;;  %v3528_v21 = vrot.slane %v3511_v7, %v3527_v23 }
 0x676   : > { %vm3620_vm8 = vcmp.lt.s32.totalorder %v3616_v35, 91 }
 0x677   : > { %3577 = vmatpush1.bf16.msra.mxu0 %v3485_v9 }
 0x678   : > { %3578 = vmatprep.subr.bf16.mxu0 %v3490_v3 }
 0x67b   : > { %3579 = vmatpush1.bf16.msra.mxu0 %v3489_v33 }
 0x67c   : > { %3580 = vmatprep.subr.bf16.mxu0 %v3494_v56 }
 0x67f   : > { %3581 = vmatpush1.bf16.msra.mxu0 %v3493_v40 }
 0x680   : > { %3582 = vmatprep.subr.bf16.mxu0 %v3498_v5 }
 0x683   : > { %3583 = vmatpush1.bf16.msra.mxu0 %v3497_v49 }
 0x684   : > { %3584 = vmatprep.subr.bf16.mxu0 %v3502_v15 }
 0x687   : > { %3585 = vmatpush1.bf16.msra.mxu0 %v3501_v50  ;;  %v3519_v50 = vsub.s32 1, %v3514_v13 }
 0x688   : > { %3586 = vmatprep.subr.bf16.mxu0 %v3506_v44  ;;  %v4711_v44 = vmov 1966171168  }
 0x689   : > { %v3679_v11 = vunpack.c.l.s4 %v4711_v44  ;;  %v3520_v18 = vrot.slane %v3511_v7, %v3519_v50 }
 0x68b   : > { %3587 = vmatpush1.bf16.msra.mxu0 %v3505_v46  ;;  %v3680_v52 = vunpack.c.0.s8 %v3679_v11 }
 0x68c   : > { %3588 = vmatprep.subr.bf16.mxu0 %v3510_v25 }
 0x68d   : > { %v3683_v10 = vsub.s32 %v3680_v52, %v3514_v13 }
 0x68f   : > { %3589 = vmatpush1.bf16.msra.mxu0 %v3509_v2 }
 0x745   : > { %v3407_v6 = vpop.f32.mrb[64].mxu0 }
 0x746   : > { %v3408_v22 = vadd.f32 %v3407_v6, %v3372_v38  ;;  %v4242_v42 = vpop.f32.mrb[65].mxu0 }
 0x747   : > { %v3410_v60 = vpop.f32.mrb[66].mxu0 }
 0x748   : > { %v3413_v8 = vmax.f32 %v3408_v22, 0.0  ;;  %v4243_v34 = vpop.f32.mrb[67].mxu0 }
 0x74a   : > { %v3414_v45 = vpack.c.bf16 %v3413_v8, %v3413_v8 }
 0x74c   : > { %3566 = vmatmul.mubr.bf16.vlgmr.msra.gmra.mrb[68].mxu1 %v3414_v45  ;;  %3607 = vmatmul.mubr.bf16.vlgmr.msra.gmra.mrb[68].mxu0 %v3414_v45 }
 0x81f   : > { %v3567_v48 = vpop.f32.mrb[68].mxu1  ;;  %v3608_v9 = vpop.f32.mrb[68].mxu0 }
 0x820   : > { %v3568_v3 = vadd.f32 %v3567_v48, %v3516_v27  ;;  %v3609_v20 = vadd.f32 %v3608_v9, %v3524_v31  ;;  %v3569_v41 = vpop.f32.mrb[69].mxu1  ;;  %v3610_v16 = vpop.f32.mrb[69].mxu0 }
 0x821   : > { %v3611_v43 = vadd.f32 %v3610_v16, %v3528_v21  ;;  %v3571_v33 = vpop.f32.mrb[70].mxu1  ;;  %v3612_v56 = vpop.f32.mrb[70].mxu0  ;;  %v3570_v17 = vadd.f32 %v3569_v41, %v3520_v18 }
 0x822   : > { %v3572_v54 = vpop.f32.mrb[71].mxu1  ;;  %v3613_v51 = vpop.f32.mrb[71].mxu0  ;;  %v3624_v40 = vsel %vm3620_vm8, %v3568_v3, -1e+30 }
 0x823   : > { %v3677_v5 = vcombine.low %v3609_v20, %v3611_v43  ;;  %v3629_v30 = vsel %vm3628_vm7, %v3624_v40, -inf }
 0x824   : > { %v3633_v0 = vmax.f32 %v3629_v30, %v3630_v26 }
 0x825   : > { %v3691_v29 = vrot.slane %v3677_v5, %v3683_v10 }
 0x826   : > { %v3635_v24 = vmax.f32 %v3633_v0, %v3630_v26 }
 0x828   : > { %3636 = vmax.xlane.f32.xlu0 %v3635_v24 }
 0x8b5   : > { %v3637_v37 = vpop.xlane.xlu0 %3636 }
 0x8b6   : > { %v3638_v49 = vsub.f32 %v3568_v3, %v3637_v37 }
 0x8b8   : > { %v3642_v15 = vmul.f32 1.442695, %v3638_v49 }
 0x8ba   : > { %4372 = vpow2.f32 %v3642_v15 }
 0x8c4   : > { %v4373_v62 = vpop.eup %4372 }
 0x8c5   : > { %v3650_v63 = vsel %vm3620_vm8, %v4373_v62, 0.0 }
 0x8c6   : > { %v3654_v59 = vsel %vm3628_vm7, %v3650_v63, 0.0 }
 0x8c7   : > { %3661 = vadd.xlane.f32.xlu0 %v3654_v59 }
 0x954   : > { %v3662_v57 = vpop.xlane.xlu0 %3661 }
 0x955   : > { %4374 = vrcp.f32 %v3662_v57 }
 0x95f   : > { %v4375_v12 = vpop.eup %4374 }
 0x960   : > { %v3664_v58 = vmul.f32 %v4375_v12, %v3650_v63 }
 0x962   : > { %v3668_v4 = vsel %vm3620_vm8, %v3664_v58, %v3568_v3 }
 0x963   : > { %v3676_v46 = vcombine.low %v3668_v4, %v3570_v17 }
 0x965   : > { %v3684_v19 = vrot.slane %v3676_v46, %v3683_v10 }
 0x967   : > { %v3692_v28 = vcombine.low %v3684_v19, %v3691_v29 }
 0x969   : > { %v3699_v32 = vrot.slane %v3692_v28, %v3683_v10 }
 0x96b   : > { %3705 = vst.msk [vmem:[%s644_s27] sm:$0xf] %vm3703_vm9, %v3699_v32 }
 0x96c   : > { %4625 = shalt.err (!%p4622_p9)
}
 0x96d   : > { %s4626_s1 = scalar_lea.hbm %s6651_s4, 64  ;;  %s4630_s29 = scalar_lea.hbm %s6764_s22, 128 }
 0x96e   : > { %p4627_p12 = scmp.ne.s32.totalorder %s6651_s4, %s4626_s1  ;;  %p4631_p3 = scmp.lt.u32.totalorder %s6651_s4, %s6764_s22 }
 0x96f   : > { %p4632_p4 = scmp.lt.u32.totalorder %s4630_s29, %s4626_s1  ;;  %p4634_p8 = scmp.lt.u32.totalorder %s4626_s1, %s6651_s4 }
 0x970   : > { %p4628_p10 = pnand %p4627_p12, %p6765_p11 }
 0x971   : > { %p4633_p7 = por %p4632_p4, %p4631_p3 }
 0x972   : > { %p4629_p2 = pneg %p4628_p10 }
 0x973   : > { %p4635_p13 = por %p4634_p8, %p4633_p7 }
 0x975   : > { %p4636_p1 = pnand %p4635_p13, %p4629_p2 }
 0x977   : > { %4639 = shalt.err (!%p4636_p1)
}
 0x978   : > { %4276 = dma.vmem_to_hbm [thread:$0]  (%p6765_p11), %s6653_s20, 64, %s6651_s4, %s3707_s0  }
 0x979 PF: > { %s6766_s19 = sld [smem:[#allocation27_spill]]  ;;  %s6767_s27 = sld [smem:[#allocation24_spill]] }
 0x97a   : > { %s6768_s6 = sld [smem:[#allocation31_spill]] }
 0x97f   : > { %p4323_p0 = scmp.ge.s32.totalorder %s6766_s19, 2  ;;  %s3733_s10 = sand.u32 1, %s6767_s27  }
 0x980   : > { %p6769_p6 = scmp.ne.s32.totalorder %s6768_s6, 0  ;;  %s3734_s30 = scalar_lea.sflag [#allocation5], %s3733_s10 }
 0x982   : > { %p4304_p5 = pnand %p4323_p0, %p6769_p6 }
 0x984   : > { %4677 = dma.done.wait (!%p4304_p5), %s3734_s30, 64  }
 0x985   : > { %4679 = vsyncadd (!%p4304_p5), %s3734_s30, 4294967232  ;;  %s6770_s27 = sld [smem:[#allocation28_spill]]  ;;  %s6771_s24 = sld [smem:[#allocation25_spill]] }
 0x986   : > { %s6772_s25 = sld [smem:[#allocation26_spill]]  ;;  %s6773_s26 = sld [smem:[#allocation29_spill]] }
 0x98b   : > { %p32_p9 = scmp.ge.s32.totalorder %s6770_s27, 4  }
 0x98d   :  { %34 = sbr.rel (!%p32_p9) target bundleno = 16 (0x10), region = 166 }
 0x994   :  { %3739 = vsyncpa [#allocation4], 1 }
 0x995   :  { %3741 = vsyncpa [#allocation4 + $0x1], 1 }
 0x996   :  { %3742 = vsyncpa [#allocation7], 1 }
 0x997   :  { %3743 = vsyncpa [#allocation10], 1 }
 0x998   :  { %3744 = vsyncpa [#allocation13], 1 }
 0x999   :  { %3745 = vsyncpa [#allocation16], 1 }
 0x99a   :  { %3746 = vsyncpa [#allocation5], 1 }
 0x99b   :  { %3748 = vsyncpa [#allocation5 + $0x1], 1 }

</bundles_post_ra>
